<compile_context>
chip_gen: v6e
topology: v6e:2x2x1
jax: 0.10.0
libtpu: 0.0.40
codegen_flags: <defaults>
</compile_context>

<pallas_src>
import jax
import jax.numpy as jnp
from jax.experimental import pallas as pl
from jax.experimental.pallas import tpu as pltpu

# Static shapes implied by the PyTorch module: input is (B, 1, C=2, T=750).
B = 2
C_ELEC = 2
T_IN = 750
T0 = T_IN - 4                      # 746 after the composed pipe0 conv (1x5)

# (cin, cout, t_src, t_pool, t_out) for pipe1..pipe3 (MaxPool(1,2) then Conv(.,(1,5)))
BLOCKS = []
_cin, _t = 25, T0
for _cout in (50, 100, 200):
    _tp = _t // 2
    _to = _tp - 4
    BLOCKS.append((_cin, _cout, _t, _tp, _to))
    _cin, _t = _cout, _to
T_HEAD = _t // 2                   # 43; flatten -> 200 * 43 = 8600

# Pool geometry (t_src, t_pool) for the four MaxPool2d((1,2)) stages.
POOLS = [(BLOCKS[0][2], BLOCKS[0][3]),
         (BLOCKS[1][2], BLOCKS[1][3]),
         (BLOCKS[2][2], BLOCKS[2][3]),
         (BLOCKS[2][4], T_HEAD)]


# ----------------------------------------------------------------------------
# Fused kernel: one grid step == one batch sample, everything stays in VMEM
# ----------------------------------------------------------------------------
def deepconvnet_kernel(x10_ref,
                       w0_ref, sc0_ref, sh0_ref,
                       sel1_ref, w1_ref, sc1_ref, sh1_ref,
                       sel2_ref, w2_ref, sc2_ref, sh2_ref,
                       sel3_ref, w3_ref, sc3_ref, sh3_ref,
                       sel4_ref, wh_ref, bh_ref,
                       o_ref):
    # pipe0: Conv(1->25,(1,5)) o Conv(25->25,(2,1)) composed into one (25,10)
    # bf16 filter -> a single K=10 MXU matmul, then folded BN + ReLU in f32.
    z = jnp.dot(w0_ref[...], x10_ref[0],
                preferred_element_type=jnp.float32)              # (25, 746) f32
    a = jnp.maximum(z * sc0_ref[...] + sh0_ref[...], 0.0)

    # pipe1..pipe3: MaxPool(1,2) + Dropout(eval=id) + Conv(.,(1,5)) + BN + ReLU
    block_cfg = (
        (BLOCKS[0], sel1_ref, w1_ref, sc1_ref, sh1_ref),
        (BLOCKS[1], sel2_ref, w2_ref, sc2_ref, sh2_ref),
        (BLOCKS[2], sel3_ref, w3_ref, sc3_ref, sh3_ref),
    )
    for (_ci, cout, t_src, t_pool, t_out), sel_ref, w_ref, sc_ref, sh_ref in block_cfg:
        # MaxPool2d((1,2)): pairwise max of unit-stride shifted slices (f32 VPU),
        # then a precomputed bf16 0/1 selection matmul keeps every 2nd column.
        m = jnp.maximum(a[:, :t_src - 1], a[:, 1:t_src]).astype(jnp.bfloat16)
        pooled = jnp.dot(m, sel_ref[...],
                         preferred_element_type=jnp.float32)     # (Cin, t_pool)
        pooled = pooled.astype(jnp.bfloat16)
        # Conv2d(Cin->Cout,(1,5)): 5 taps fused into K -> ONE (Cout,5*Cin) matmul.
        rhs = jnp.concatenate([pooled[:, k:k + t_out] for k in range(5)],
                              axis=0)                            # (5*Cin, t_out)
        z = jnp.dot(w_ref[...], rhs, preferred_element_type=jnp.float32)
        a = jnp.maximum(z * sc_ref[...] + sh_ref[...], 0.0)      # (Cout, t_out)

    # pipe4: MaxPool(1,2) + Flatten + Linear(8600 -> 2)  (head kept on VPU/XLU)
    t_src = BLOCKS[-1][4]
    m = jnp.maximum(a[:, :t_src - 1], a[:, 1:t_src]).astype(jnp.bfloat16)
    pooled = jnp.dot(m, sel4_ref[...],
                     preferred_element_type=jnp.float32)          # (200, 43) f32
    prod = pooled[None, None, :, :] * wh_ref[...][None, :, :, :]  # (1, 2, 200, 43)
    logits = jnp.sum(jnp.sum(prod, axis=3), axis=2)               # (1, 2)
    o_ref[0] = logits + bh_ref[...]


# ----------------------------------------------------------------------------
# pallas_call wrapper (single launch for the whole network)
# ----------------------------------------------------------------------------
@jax.jit
def deepconvnet_forward(x, fp):
    """x: (B, 1, 2, 750) NCHW float32 -> logits (B, 2)."""
    # im2col of the raw input for the composed pipe0 filter (10 = 2 rows x 5 taps);
    # pure input-layout glue at XLA level (~30 KB in bf16), done once.
    x10 = jnp.stack([x[:, 0, h, k:k + T0]
                     for h in range(C_ELEC) for k in range(5)],
                    axis=1).astype(jnp.bfloat16)                 # (B, 10, 746)

    c2 = lambda b: (0, 0)
    c3 = lambda b: (0, 0, 0)
    sel_shapes = [(ts - 1, tp) for ts, tp in POOLS]

    out = pl.pallas_call(
        deepconvnet_kernel,
        out_shape=jax.ShapeDtypeStruct((B, 1, 2), jnp.float32),
        grid=(B,),
        in_specs=[
            pl.BlockSpec((1, 10, T0), lambda b: (b, 0, 0)),      # per-sample input
            pl.BlockSpec((25, 10), c2),                          # pipe0 composed W
            pl.BlockSpec((25, 1), c2),
            pl.BlockSpec((25, 1), c2),
            pl.BlockSpec(sel_shapes[0], c2),                     # pool1 selection
            pl.BlockSpec((50, 125), c2),                         # pipe1 W (Cout,5*Cin)
            pl.BlockSpec((50, 1), c2),
            pl.BlockSpec((50, 1), c2),
            pl.BlockSpec(sel_shapes[1], c2),                     # pool2 selection
            pl.BlockSpec((100, 250), c2),                        # pipe2 W
            pl.BlockSpec((100, 1), c2),
            pl.BlockSpec((100, 1), c2),
            pl.BlockSpec(sel_shapes[2], c2),                     # pool3 selection
            pl.BlockSpec((200, 500), c2),                        # pipe3 W
            pl.BlockSpec((200, 1), c2),
            pl.BlockSpec((200, 1), c2),
            pl.BlockSpec(sel_shapes[3], c2),                     # head pool selection
            pl.BlockSpec((2, 200, T_HEAD), c3),                  # head weight (f32)
            pl.BlockSpec((1, 2), c2),                            # head bias
        ],
        out_specs=pl.BlockSpec((1, 1, 2), lambda b: (b, 0, 0)),
        compiler_params=pltpu.CompilerParams(
            dimension_semantics=("parallel",)),
        cost_estimate=pl.CostEstimate(
            flops=113_000_000, transcendentals=0, bytes_accessed=1_200_000),
    )(x10,
      fp["w0"], fp["sc0"], fp["sh0"],
      fp["sel1"], fp["w1"], fp["sc1"], fp["sh1"],
      fp["sel2"], fp["w2"], fp["sc2"], fp["sh2"],
      fp["sel3"], fp["w3"], fp["sc3"], fp["sh3"],
      fp["sel4"], fp["wh"], fp["bh"])
    return out[:, 0, :]


# ----------------------------------------------------------------------------
# Parameter handling: PyTorch-layout synthetic init + folding for the kernel
# ----------------------------------------------------------------------------
def init_params(key):
    """Deterministic synthetic parameters in PyTorch layout (eval-mode BN stats)."""
    keys = iter(jax.random.split(key, 40))

    def u(shape, fan_in):
        bound = (3.0 / float(fan_in)) ** 0.5        # variance-preserving uniform
        return jax.random.uniform(next(keys), shape, jnp.float32, -bound, bound)

    def bn(c):
        gamma = 1.0 + 0.1 * jax.random.normal(next(keys), (c,), jnp.float32)
        beta = 0.1 * jax.random.normal(next(keys), (c,), jnp.float32)
        mean = 0.1 * jax.random.normal(next(keys), (c,), jnp.float32)
        var = 1.0 + 0.2 * jnp.abs(jax.random.normal(next(keys), (c,), jnp.float32))
        return (gamma, beta, mean, var)

    p = {}
    p["pipe0"] = dict(conv1_w=u((25, 1, 1, 5), 5), conv1_b=u((25,), 5),
                      conv2_w=u((25, 25, 2, 1), 50), conv2_b=u((25,), 50),
                      bn=bn(25))
    for i, (cin, cout, *_rest) in enumerate(BLOCKS, start=1):
        p[f"pipe{i}"] = dict(conv_w=u((cout, cin, 1, 5), cin * 5),
                             conv_b=u((cout,), cin * 5),
                             bn=bn(cout))
    p["pipe4"] = dict(fc_w=u((2, 200 * T_HEAD), 200 * T_HEAD),
                      fc_b=u((2,), 200 * T_HEAD))
    return p


def fold_params(p):
    """Fold conv biases + BatchNorm into scale/shift, compose pipe0's two convs,
    fuse the 5 taps into the contraction dim (bf16 weights), and build the
    bf16 0/1 pooling-selection matrices once (they become kernel inputs)."""
    hi = jax.lax.Precision.HIGHEST

    def bn_fold(stats, conv_bias):
        gamma, beta, mean, var = stats
        scale = gamma * jax.lax.rsqrt(var + 1e-5)
        shift = beta - mean * scale + scale * conv_bias
        return scale[:, None], shift[:, None]

    def sel_matrix(t_src, t_pool):
        rows = jnp.arange(t_src - 1)[:, None]
        cols = jnp.arange(t_pool)[None, :]
        return (rows == 2 * cols).astype(jnp.bfloat16)    # exact 0/1 in bf16

    out = {}
    p0 = p["pipe0"]
    w1 = p0["conv1_w"][:, 0, 0, :]                 # (25, 5)     [i, k]
    w2 = p0["conv2_w"][:, :, :, 0]                 # (25, 25, 2) [o, i, h]
    w0 = jnp.einsum("oih,ik->ohk", w2, w1, precision=hi).reshape(25, 10)
    out["w0"] = w0.astype(jnp.bfloat16)
    b0c = p0["conv2_b"] + jnp.einsum("oih,i->o", w2, p0["conv1_b"], precision=hi)
    out["sc0"], out["sh0"] = bn_fold(p0["bn"], b0c)

    for i in range(1, 4):
        q = p[f"pipe{i}"]
        cout, cin = q["conv_w"].shape[0], q["conv_w"].shape[1]
        wk = jnp.transpose(q["conv_w"][:, :, 0, :], (0, 2, 1))   # (Cout, 5, Cin)
        out[f"w{i}"] = wk.reshape(cout, 5 * cin).astype(jnp.bfloat16)
        out[f"sc{i}"], out[f"sh{i}"] = bn_fold(q["bn"], q["conv_b"])

    for j, (t_src, t_pool) in enumerate(POOLS, start=1):
        out[f"sel{j}"] = sel_matrix(t_src, t_pool)

    out["wh"] = p["pipe4"]["fc_w"].reshape(2, 200, T_HEAD)   # channel-major flatten
    out["bh"] = p["pipe4"]["fc_b"][None, :]
    return out


# ----------------------------------------------------------------------------
# Pure-JAX (XLA) reference of the PyTorch eval-mode forward, for verification
# ----------------------------------------------------------------------------
def reference_forward(x, p):
    hi = jax.lax.Precision.HIGHEST

    def conv(x, w, b):
        y = jax.lax.conv_general_dilated(
            x, w, window_strides=(1, 1), padding="VALID",
            dimension_numbers=("NCHW", "OIHW", "NCHW"), precision=hi)
        return y + b[None, :, None, None]

    def bn(x, stats):
        g, bta, m, v = stats
        s = g * jax.lax.rsqrt(v + 1e-5)
        return x * s[None, :, None, None] + (bta - m * s)[None, :, None, None]

    def pool(x):
        w2 = (x.shape[-1] // 2) * 2
        return jnp.maximum(x[..., 0:w2:2], x[..., 1:w2:2])

    relu = lambda t: jnp.maximum(t, 0.0)

    p0 = p["pipe0"]
    a = conv(x, p0["conv1_w"], p0["conv1_b"])
    a = conv(a, p0["conv2_w"], p0["conv2_b"])
    a = relu(bn(a, p0["bn"]))
    for i in range(1, 4):
        q = p[f"pipe{i}"]
        a = relu(bn(conv(pool(a), q["conv_w"], q["conv_b"]), q["bn"]))
    a = pool(a)                                    # (B, 200, 1, 43)
    flat = a.reshape(a.shape[0], -1)               # (B, 8600)
    return jnp.dot(flat, p["pipe4"]["fc_w"].T, precision=hi) + p["pipe4"]["fc_b"][None, :]


if __name__ == "__main__":
    key = jax.random.PRNGKey(0)
    pkey, xkey = jax.random.split(key)
    params = init_params(pkey)
    folded = fold_params(params)
    x = jax.random.normal(xkey, (B, 1, C_ELEC, T_IN), jnp.float32)   # NCHW, like PyTorch

    out = deepconvnet_forward(x, folded)
    out = jax.block_until_ready(out)
    assert out.shape == (B, 2), out.shape
    assert bool(jnp.all(jnp.isfinite(out)))

    ref = reference_forward(x, params)
    assert bool(jnp.allclose(out, ref, rtol=5e-2, atol=5e-2)), (out, ref)
    print("KERNEL_OK")
</pallas_src>

<mosaic_0001>
module attributes {stable_mosaic.version = 11 : i64} {
  func.func @deepconvnet_kernel(%arg0: i32, %arg1: memref<1x10x746xbf16, #tpu.memory_space<vmem>>, %arg2: memref<25x10xbf16, #tpu.memory_space<vmem>>, %arg3: memref<25x1xf32, #tpu.memory_space<vmem>>, %arg4: memref<25x1xf32, #tpu.memory_space<vmem>>, %arg5: memref<745x373xbf16, #tpu.memory_space<vmem>>, %arg6: memref<50x125xbf16, #tpu.memory_space<vmem>>, %arg7: memref<50x1xf32, #tpu.memory_space<vmem>>, %arg8: memref<50x1xf32, #tpu.memory_space<vmem>>, %arg9: memref<368x184xbf16, #tpu.memory_space<vmem>>, %arg10: memref<100x250xbf16, #tpu.memory_space<vmem>>, %arg11: memref<100x1xf32, #tpu.memory_space<vmem>>, %arg12: memref<100x1xf32, #tpu.memory_space<vmem>>, %arg13: memref<179x90xbf16, #tpu.memory_space<vmem>>, %arg14: memref<200x500xbf16, #tpu.memory_space<vmem>>, %arg15: memref<200x1xf32, #tpu.memory_space<vmem>>, %arg16: memref<200x1xf32, #tpu.memory_space<vmem>>, %arg17: memref<85x43xbf16, #tpu.memory_space<vmem>>, %arg18: memref<2x200x43xf32, #tpu.memory_space<vmem>>, %arg19: memref<1x2xf32, #tpu.memory_space<vmem>>, %arg20: memref<1x1x2xf32, #tpu.memory_space<vmem>>) attributes {dimension_semantics = [#tpu.dimension_semantics<parallel>], iteration_bounds = array<i64: 2>, scalar_prefetch = 0 : i64, scratch_operands = 0 : i64, tpu.core_type = #tpu.core_type<tc>, window_params = [{transform_indices = @transform_0, window_bounds = array<i64: 1, 10, 746>}, {pipeline_mode = #tpu.pipeline_mode<synchronous>, transform_indices = @transform_1, window_bounds = array<i64: 25, 10>}, {pipeline_mode = #tpu.pipeline_mode<synchronous>, transform_indices = @transform_2, window_bounds = array<i64: 25, 1>}, {pipeline_mode = #tpu.pipeline_mode<synchronous>, transform_indices = @transform_3, window_bounds = array<i64: 25, 1>}, {pipeline_mode = #tpu.pipeline_mode<synchronous>, transform_indices = @transform_4, window_bounds = array<i64: 745, 373>}, {pipeline_mode = #tpu.pipeline_mode<synchronous>, transform_indices = @transform_5, window_bounds = array<i64: 50, 125>}, {pipeline_mode = #tpu.pipeline_mode<synchronous>, transform_indices = @transform_6, window_bounds = array<i64: 50, 1>}, {pipeline_mode = #tpu.pipeline_mode<synchronous>, transform_indices = @transform_7, window_bounds = array<i64: 50, 1>}, {pipeline_mode = #tpu.pipeline_mode<synchronous>, transform_indices = @transform_8, window_bounds = array<i64: 368, 184>}, {pipeline_mode = #tpu.pipeline_mode<synchronous>, transform_indices = @transform_9, window_bounds = array<i64: 100, 250>}, {pipeline_mode = #tpu.pipeline_mode<synchronous>, transform_indices = @transform_10, window_bounds = array<i64: 100, 1>}, {pipeline_mode = #tpu.pipeline_mode<synchronous>, transform_indices = @transform_11, window_bounds = array<i64: 100, 1>}, {pipeline_mode = #tpu.pipeline_mode<synchronous>, transform_indices = @transform_12, window_bounds = array<i64: 179, 90>}, {pipeline_mode = #tpu.pipeline_mode<synchronous>, transform_indices = @transform_13, window_bounds = array<i64: 200, 500>}, {pipeline_mode = #tpu.pipeline_mode<synchronous>, transform_indices = @transform_14, window_bounds = array<i64: 200, 1>}, {pipeline_mode = #tpu.pipeline_mode<synchronous>, transform_indices = @transform_15, window_bounds = array<i64: 200, 1>}, {pipeline_mode = #tpu.pipeline_mode<synchronous>, transform_indices = @transform_16, window_bounds = array<i64: 85, 43>}, {pipeline_mode = #tpu.pipeline_mode<synchronous>, transform_indices = @transform_17, window_bounds = array<i64: 2, 200, 43>}, {pipeline_mode = #tpu.pipeline_mode<synchronous>, transform_indices = @transform_18, window_bounds = array<i64: 1, 2>}, {transform_indices = @transform_19, window_bounds = array<i64: 1, 1, 2>}]} {
    %c0 = arith.constant 0 : index
    %c0_0 = arith.constant 0 : index
    %0 = vector.load %arg2[%c0, %c0_0] : memref<25x10xbf16, #tpu.memory_space<vmem>>, vector<25x10xbf16>
    %c0_1 = arith.constant 0 : index
    %c0_2 = arith.constant 0 : index
    %c0_3 = arith.constant 0 : index
    %1 = vector.load %arg1[%c0_1, %c0_2, %c0_3] : memref<1x10x746xbf16, #tpu.memory_space<vmem>>, vector<1x10x746xbf16>
    %2 = vector.shape_cast %1 : vector<1x10x746xbf16> to vector<10x746xbf16>
    %cst = arith.constant dense<0.000000e+00> : vector<25x746xf32>
    %3 = tpu.matmul %0, %2, %cst {dimension_numbers = #tpu.dot_dimension_numbers<[1], [0], [0], [1], [0, 0, 1, 1], [], []>} : vector<25x10xbf16>, vector<10x746xbf16>, vector<25x746xf32> -> vector<25x746xf32>
    %c0_4 = arith.constant 0 : index
    %c0_5 = arith.constant 0 : index
    %4 = vector.load %arg3[%c0_4, %c0_5] : memref<25x1xf32, #tpu.memory_space<vmem>>, vector<25x1xf32>
    %5 = vector.broadcast %4 : vector<25x1xf32> to vector<25x746xf32>
    %6 = arith.mulf %3, %5 : vector<25x746xf32>
    %c0_6 = arith.constant 0 : index
    %c0_7 = arith.constant 0 : index
    %7 = vector.load %arg4[%c0_6, %c0_7] : memref<25x1xf32, #tpu.memory_space<vmem>>, vector<25x1xf32>
    %8 = vector.broadcast %7 : vector<25x1xf32> to vector<25x746xf32>
    %9 = arith.addf %6, %8 : vector<25x746xf32>
    %cst_8 = arith.constant 0.000000e+00 : f32
    %10 = vector.broadcast %cst_8 : f32 to vector<25x746xf32>
    %11 = arith.maximumf %9, %10 : vector<25x746xf32>
    %12 = vector.extract_strided_slice %11 {offsets = [0, 0], sizes = [25, 745], strides = [1, 1]} : vector<25x746xf32> to vector<25x745xf32>
    %13 = vector.extract_strided_slice %11 {offsets = [0, 1], sizes = [25, 745], strides = [1, 1]} : vector<25x746xf32> to vector<25x745xf32>
    %14 = arith.maximumf %12, %13 : vector<25x745xf32>
    %15 = arith.truncf %14 : vector<25x745xf32> to vector<25x745xbf16>
    %c0_9 = arith.constant 0 : index
    %c0_10 = arith.constant 0 : index
    %16 = vector.load %arg5[%c0_9, %c0_10] : memref<745x373xbf16, #tpu.memory_space<vmem>>, vector<745x373xbf16>
    %cst_11 = arith.constant dense<0.000000e+00> : vector<25x373xf32>
    %17 = tpu.matmul %15, %16, %cst_11 {dimension_numbers = #tpu.dot_dimension_numbers<[1], [0], [0], [1], [0, 0, 1, 1], [], []>} : vector<25x745xbf16>, vector<745x373xbf16>, vector<25x373xf32> -> vector<25x373xf32>
    %18 = arith.truncf %17 : vector<25x373xf32> to vector<25x373xbf16>
    %19 = vector.extract_strided_slice %18 {offsets = [0, 0], sizes = [25, 369], strides = [1, 1]} : vector<25x373xbf16> to vector<25x369xbf16>
    %20 = vector.extract_strided_slice %18 {offsets = [0, 1], sizes = [25, 369], strides = [1, 1]} : vector<25x373xbf16> to vector<25x369xbf16>
    %21 = vector.extract_strided_slice %18 {offsets = [0, 2], sizes = [25, 369], strides = [1, 1]} : vector<25x373xbf16> to vector<25x369xbf16>
    %22 = vector.extract_strided_slice %18 {offsets = [0, 3], sizes = [25, 369], strides = [1, 1]} : vector<25x373xbf16> to vector<25x369xbf16>
    %23 = vector.extract_strided_slice %18 {offsets = [0, 4], sizes = [25, 369], strides = [1, 1]} : vector<25x373xbf16> to vector<25x369xbf16>
    %24 = tpu.concatenate %19, %20, %21, %22, %23 in 0 : vector<25x369xbf16>, vector<25x369xbf16>, vector<25x369xbf16>, vector<25x369xbf16>, vector<25x369xbf16> -> vector<125x369xbf16>
    %c0_12 = arith.constant 0 : index
    %c0_13 = arith.constant 0 : index
    %25 = vector.load %arg6[%c0_12, %c0_13] : memref<50x125xbf16, #tpu.memory_space<vmem>>, vector<50x125xbf16>
    %cst_14 = arith.constant dense<0.000000e+00> : vector<50x369xf32>
    %26 = tpu.matmul %25, %24, %cst_14 {dimension_numbers = #tpu.dot_dimension_numbers<[1], [0], [0], [1], [0, 0, 1, 1], [], []>} : vector<50x125xbf16>, vector<125x369xbf16>, vector<50x369xf32> -> vector<50x369xf32>
    %c0_15 = arith.constant 0 : index
    %c0_16 = arith.constant 0 : index
    %27 = vector.load %arg7[%c0_15, %c0_16] : memref<50x1xf32, #tpu.memory_space<vmem>>, vector<50x1xf32>
    %28 = vector.broadcast %27 : vector<50x1xf32> to vector<50x369xf32>
    %29 = arith.mulf %26, %28 : vector<50x369xf32>
    %c0_17 = arith.constant 0 : index
    %c0_18 = arith.constant 0 : index
    %30 = vector.load %arg8[%c0_17, %c0_18] : memref<50x1xf32, #tpu.memory_space<vmem>>, vector<50x1xf32>
    %31 = vector.broadcast %30 : vector<50x1xf32> to vector<50x369xf32>
    %32 = arith.addf %29, %31 : vector<50x369xf32>
    %cst_19 = arith.constant 0.000000e+00 : f32
    %33 = vector.broadcast %cst_19 : f32 to vector<50x369xf32>
    %34 = arith.maximumf %32, %33 : vector<50x369xf32>
    %35 = vector.extract_strided_slice %34 {offsets = [0, 0], sizes = [50, 368], strides = [1, 1]} : vector<50x369xf32> to vector<50x368xf32>
    %36 = vector.extract_strided_slice %34 {offsets = [0, 1], sizes = [50, 368], strides = [1, 1]} : vector<50x369xf32> to vector<50x368xf32>
    %37 = arith.maximumf %35, %36 : vector<50x368xf32>
    %38 = arith.truncf %37 : vector<50x368xf32> to vector<50x368xbf16>
    %c0_20 = arith.constant 0 : index
    %c0_21 = arith.constant 0 : index
    %39 = vector.load %arg9[%c0_20, %c0_21] : memref<368x184xbf16, #tpu.memory_space<vmem>>, vector<368x184xbf16>
    %cst_22 = arith.constant dense<0.000000e+00> : vector<50x184xf32>
    %40 = tpu.matmul %38, %39, %cst_22 {dimension_numbers = #tpu.dot_dimension_numbers<[1], [0], [0], [1], [0, 0, 1, 1], [], []>} : vector<50x368xbf16>, vector<368x184xbf16>, vector<50x184xf32> -> vector<50x184xf32>
    %41 = arith.truncf %40 : vector<50x184xf32> to vector<50x184xbf16>
    %42 = vector.extract_strided_slice %41 {offsets = [0, 0], sizes = [50, 180], strides = [1, 1]} : vector<50x184xbf16> to vector<50x180xbf16>
    %43 = vector.extract_strided_slice %41 {offsets = [0, 1], sizes = [50, 180], strides = [1, 1]} : vector<50x184xbf16> to vector<50x180xbf16>
    %44 = vector.extract_strided_slice %41 {offsets = [0, 2], sizes = [50, 180], strides = [1, 1]} : vector<50x184xbf16> to vector<50x180xbf16>
    %45 = vector.extract_strided_slice %41 {offsets = [0, 3], sizes = [50, 180], strides = [1, 1]} : vector<50x184xbf16> to vector<50x180xbf16>
    %46 = vector.extract_strided_slice %41 {offsets = [0, 4], sizes = [50, 180], strides = [1, 1]} : vector<50x184xbf16> to vector<50x180xbf16>
    %47 = tpu.concatenate %42, %43, %44, %45, %46 in 0 : vector<50x180xbf16>, vector<50x180xbf16>, vector<50x180xbf16>, vector<50x180xbf16>, vector<50x180xbf16> -> vector<250x180xbf16>
    %c0_23 = arith.constant 0 : index
    %c0_24 = arith.constant 0 : index
    %48 = vector.load %arg10[%c0_23, %c0_24] : memref<100x250xbf16, #tpu.memory_space<vmem>>, vector<100x250xbf16>
    %cst_25 = arith.constant dense<0.000000e+00> : vector<100x180xf32>
    %49 = tpu.matmul %48, %47, %cst_25 {dimension_numbers = #tpu.dot_dimension_numbers<[1], [0], [0], [1], [0, 0, 1, 1], [], []>} : vector<100x250xbf16>, vector<250x180xbf16>, vector<100x180xf32> -> vector<100x180xf32>
    %c0_26 = arith.constant 0 : index
    %c0_27 = arith.constant 0 : index
    %50 = vector.load %arg11[%c0_26, %c0_27] : memref<100x1xf32, #tpu.memory_space<vmem>>, vector<100x1xf32>
    %51 = vector.broadcast %50 : vector<100x1xf32> to vector<100x180xf32>
    %52 = arith.mulf %49, %51 : vector<100x180xf32>
    %c0_28 = arith.constant 0 : index
    %c0_29 = arith.constant 0 : index
    %53 = vector.load %arg12[%c0_28, %c0_29] : memref<100x1xf32, #tpu.memory_space<vmem>>, vector<100x1xf32>
    %54 = vector.broadcast %53 : vector<100x1xf32> to vector<100x180xf32>
    %55 = arith.addf %52, %54 : vector<100x180xf32>
    %cst_30 = arith.constant 0.000000e+00 : f32
    %56 = vector.broadcast %cst_30 : f32 to vector<100x180xf32>
    %57 = arith.maximumf %55, %56 : vector<100x180xf32>
    %58 = vector.extract_strided_slice %57 {offsets = [0, 0], sizes = [100, 179], strides = [1, 1]} : vector<100x180xf32> to vector<100x179xf32>
    %59 = vector.extract_strided_slice %57 {offsets = [0, 1], sizes = [100, 179], strides = [1, 1]} : vector<100x180xf32> to vector<100x179xf32>
    %60 = arith.maximumf %58, %59 : vector<100x179xf32>
    %61 = arith.truncf %60 : vector<100x179xf32> to vector<100x179xbf16>
    %c0_31 = arith.constant 0 : index
    %c0_32 = arith.constant 0 : index
    %62 = vector.load %arg13[%c0_31, %c0_32] : memref<179x90xbf16, #tpu.memory_space<vmem>>, vector<179x90xbf16>
    %cst_33 = arith.constant dense<0.000000e+00> : vector<100x90xf32>
    %63 = tpu.matmul %61, %62, %cst_33 {dimension_numbers = #tpu.dot_dimension_numbers<[1], [0], [0], [1], [0, 0, 1, 1], [], []>} : vector<100x179xbf16>, vector<179x90xbf16>, vector<100x90xf32> -> vector<100x90xf32>
    %64 = arith.truncf %63 : vector<100x90xf32> to vector<100x90xbf16>
    %65 = vector.extract_strided_slice %64 {offsets = [0, 0], sizes = [100, 86], strides = [1, 1]} : vector<100x90xbf16> to vector<100x86xbf16>
    %66 = vector.extract_strided_slice %64 {offsets = [0, 1], sizes = [100, 86], strides = [1, 1]} : vector<100x90xbf16> to vector<100x86xbf16>
    %67 = vector.extract_strided_slice %64 {offsets = [0, 2], sizes = [100, 86], strides = [1, 1]} : vector<100x90xbf16> to vector<100x86xbf16>
    %68 = vector.extract_strided_slice %64 {offsets = [0, 3], sizes = [100, 86], strides = [1, 1]} : vector<100x90xbf16> to vector<100x86xbf16>
    %69 = vector.extract_strided_slice %64 {offsets = [0, 4], sizes = [100, 86], strides = [1, 1]} : vector<100x90xbf16> to vector<100x86xbf16>
    %70 = tpu.concatenate %65, %66, %67, %68, %69 in 0 : vector<100x86xbf16>, vector<100x86xbf16>, vector<100x86xbf16>, vector<100x86xbf16>, vector<100x86xbf16> -> vector<500x86xbf16>
    %c0_34 = arith.constant 0 : index
    %c0_35 = arith.constant 0 : index
    %71 = vector.load %arg14[%c0_34, %c0_35] : memref<200x500xbf16, #tpu.memory_space<vmem>>, vector<200x500xbf16>
    %cst_36 = arith.constant dense<0.000000e+00> : vector<200x86xf32>
    %72 = tpu.matmul %71, %70, %cst_36 {dimension_numbers = #tpu.dot_dimension_numbers<[1], [0], [0], [1], [0, 0, 1, 1], [], []>} : vector<200x500xbf16>, vector<500x86xbf16>, vector<200x86xf32> -> vector<200x86xf32>
    %c0_37 = arith.constant 0 : index
    %c0_38 = arith.constant 0 : index
    %73 = vector.load %arg15[%c0_37, %c0_38] : memref<200x1xf32, #tpu.memory_space<vmem>>, vector<200x1xf32>
    %74 = vector.broadcast %73 : vector<200x1xf32> to vector<200x86xf32>
    %75 = arith.mulf %72, %74 : vector<200x86xf32>
    %c0_39 = arith.constant 0 : index
    %c0_40 = arith.constant 0 : index
    %76 = vector.load %arg16[%c0_39, %c0_40] : memref<200x1xf32, #tpu.memory_space<vmem>>, vector<200x1xf32>
    %77 = vector.broadcast %76 : vector<200x1xf32> to vector<200x86xf32>
    %78 = arith.addf %75, %77 : vector<200x86xf32>
    %cst_41 = arith.constant 0.000000e+00 : f32
    %79 = vector.broadcast %cst_41 : f32 to vector<200x86xf32>
    %80 = arith.maximumf %78, %79 : vector<200x86xf32>
    %81 = vector.extract_strided_slice %80 {offsets = [0, 0], sizes = [200, 85], strides = [1, 1]} : vector<200x86xf32> to vector<200x85xf32>
    %82 = vector.extract_strided_slice %80 {offsets = [0, 1], sizes = [200, 85], strides = [1, 1]} : vector<200x86xf32> to vector<200x85xf32>
    %83 = arith.maximumf %81, %82 : vector<200x85xf32>
    %84 = arith.truncf %83 : vector<200x85xf32> to vector<200x85xbf16>
    %c0_42 = arith.constant 0 : index
    %c0_43 = arith.constant 0 : index
    %85 = vector.load %arg17[%c0_42, %c0_43] : memref<85x43xbf16, #tpu.memory_space<vmem>>, vector<85x43xbf16>
    %cst_44 = arith.constant dense<0.000000e+00> : vector<200x43xf32>
    %86 = tpu.matmul %84, %85, %cst_44 {dimension_numbers = #tpu.dot_dimension_numbers<[1], [0], [0], [1], [0, 0, 1, 1], [], []>} : vector<200x85xbf16>, vector<85x43xbf16>, vector<200x43xf32> -> vector<200x43xf32>
    %87 = vector.shape_cast %86 : vector<200x43xf32> to vector<1x1x200x43xf32>
    %c0_45 = arith.constant 0 : index
    %c0_46 = arith.constant 0 : index
    %c0_47 = arith.constant 0 : index
    %88 = vector.load %arg18[%c0_45, %c0_46, %c0_47] : memref<2x200x43xf32, #tpu.memory_space<vmem>>, vector<2x200x43xf32>
    %89 = vector.shape_cast %88 : vector<2x200x43xf32> to vector<1x2x200x43xf32>
    %90 = vector.broadcast %87 : vector<1x1x200x43xf32> to vector<1x2x200x43xf32>
    %91 = arith.mulf %90, %89 : vector<1x2x200x43xf32>
    %cst_48 = arith.constant dense<0.000000e+00> : vector<1x2x200xf32>
    %92 = vector.multi_reduction <add>, %91, %cst_48 [3] : vector<1x2x200x43xf32> to vector<1x2x200xf32>
    %cst_49 = arith.constant dense<0.000000e+00> : vector<1x2xf32>
    %93 = vector.multi_reduction <add>, %92, %cst_49 [2] : vector<1x2x200xf32> to vector<1x2xf32>
    %c0_50 = arith.constant 0 : index
    %c0_51 = arith.constant 0 : index
    %94 = vector.load %arg19[%c0_50, %c0_51] : memref<1x2xf32, #tpu.memory_space<vmem>>, vector<1x2xf32>
    %95 = arith.addf %93, %94 : vector<1x2xf32>
    %c0_52 = arith.constant 0 : index
    %c0_53 = arith.constant 0 : index
    %c0_54 = arith.constant 0 : index
    %96 = vector.load %arg20[%c0_52, %c0_53, %c0_54] : memref<1x1x2xf32, #tpu.memory_space<vmem>>, vector<1x1x2xf32>
    %97 = vector.shape_cast %96 : vector<1x1x2xf32> to vector<1x2xf32>
    %98 = vector.shape_cast %95 : vector<1x2xf32> to vector<1x1x2xf32>
    tpu.vector_store %arg20[%c0_52, %c0_53, %c0_54], %98 {strides = array<i32>} : memref<1x1x2xf32, #tpu.memory_space<vmem>>, vector<1x1x2xf32>,
    return
  }
  func.func @transform_0(%arg0: i32) -> (i32, i32, i32) {
    %c0_i32 = arith.constant 0 : i32
    %c0_i32_0 = arith.constant 0 : i32
    %c0_i32_1 = arith.constant 0 : i32
    return %arg0, %c0_i32, %c0_i32_0 : i32, i32, i32
  }
  func.func @transform_1(%arg0: i32) -> (i32, i32) {
    %c0_i32 = arith.constant 0 : i32
    %c0_i32_0 = arith.constant 0 : i32
    %c0_i32_1 = arith.constant 0 : i32
    return %c0_i32, %c0_i32_0 : i32, i32
  }
  func.func @transform_2(%arg0: i32) -> (i32, i32) {
    %c0_i32 = arith.constant 0 : i32
    %c0_i32_0 = arith.constant 0 : i32
    %c0_i32_1 = arith.constant 0 : i32
    return %c0_i32, %c0_i32_0 : i32, i32
  }
  func.func @transform_3(%arg0: i32) -> (i32, i32) {
    %c0_i32 = arith.constant 0 : i32
    %c0_i32_0 = arith.constant 0 : i32
    %c0_i32_1 = arith.constant 0 : i32
    return %c0_i32, %c0_i32_0 : i32, i32
  }
  func.func @transform_4(%arg0: i32) -> (i32, i32) {
    %c0_i32 = arith.constant 0 : i32
    %c0_i32_0 = arith.constant 0 : i32
    %c0_i32_1 = arith.constant 0 : i32
    return %c0_i32, %c0_i32_0 : i32, i32
  }
  func.func @transform_5(%arg0: i32) -> (i32, i32) {
    %c0_i32 = arith.constant 0 : i32
    %c0_i32_0 = arith.constant 0 : i32
    %c0_i32_1 = arith.constant 0 : i32
    return %c0_i32, %c0_i32_0 : i32, i32
  }
  func.func @transform_6(%arg0: i32) -> (i32, i32) {
    %c0_i32 = arith.constant 0 : i32
    %c0_i32_0 = arith.constant 0 : i32
    %c0_i32_1 = arith.constant 0 : i32
    return %c0_i32, %c0_i32_0 : i32, i32
  }
  func.func @transform_7(%arg0: i32) -> (i32, i32) {
    %c0_i32 = arith.constant 0 : i32
    %c0_i32_0 = arith.constant 0 : i32
    %c0_i32_1 = arith.constant 0 : i32
    return %c0_i32, %c0_i32_0 : i32, i32
  }
  func.func @transform_8(%arg0: i32) -> (i32, i32) {
    %c0_i32 = arith.constant 0 : i32
    %c0_i32_0 = arith.constant 0 : i32
    %c0_i32_1 = arith.constant 0 : i32
    return %c0_i32, %c0_i32_0 : i32, i32
  }
  func.func @transform_9(%arg0: i32) -> (i32, i32) {
    %c0_i32 = arith.constant 0 : i32
    %c0_i32_0 = arith.constant 0 : i32
    %c0_i32_1 = arith.constant 0 : i32
    return %c0_i32, %c0_i32_0 : i32, i32
  }
  func.func @transform_10(%arg0: i32) -> (i32, i32) {
    %c0_i32 = arith.constant 0 : i32
    %c0_i32_0 = arith.constant 0 : i32
    %c0_i32_1 = arith.constant 0 : i32
    return %c0_i32, %c0_i32_0 : i32, i32
  }
  func.func @transform_11(%arg0: i32) -> (i32, i32) {
    %c0_i32 = arith.constant 0 : i32
    %c0_i32_0 = arith.constant 0 : i32
    %c0_i32_1 = arith.constant 0 : i32
    return %c0_i32, %c0_i32_0 : i32, i32
  }
  func.func @transform_12(%arg0: i32) -> (i32, i32) {
    %c0_i32 = arith.constant 0 : i32
    %c0_i32_0 = arith.constant 0 : i32
    %c0_i32_1 = arith.constant 0 : i32
    return %c0_i32, %c0_i32_0 : i32, i32
  }
  func.func @transform_13(%arg0: i32) -> (i32, i32) {
    %c0_i32 = arith.constant 0 : i32
    %c0_i32_0 = arith.constant 0 : i32
    %c0_i32_1 = arith.constant 0 : i32
    return %c0_i32, %c0_i32_0 : i32, i32
  }
  func.func @transform_14(%arg0: i32) -> (i32, i32) {
    %c0_i32 = arith.constant 0 : i32
    %c0_i32_0 = arith.constant 0 : i32
    %c0_i32_1 = arith.constant 0 : i32
    return %c0_i32, %c0_i32_0 : i32, i32
  }
  func.func @transform_15(%arg0: i32) -> (i32, i32) {
    %c0_i32 = arith.constant 0 : i32
    %c0_i32_0 = arith.constant 0 : i32
    %c0_i32_1 = arith.constant 0 : i32
    return %c0_i32, %c0_i32_0 : i32, i32
  }
  func.func @transform_16(%arg0: i32) -> (i32, i32) {
    %c0_i32 = arith.constant 0 : i32
    %c0_i32_0 = arith.constant 0 : i32
    %c0_i32_1 = arith.constant 0 : i32
    return %c0_i32, %c0_i32_0 : i32, i32
  }
  func.func @transform_17(%arg0: i32) -> (i32, i32, i32) {
    %c0_i32 = arith.constant 0 : i32
    %c0_i32_0 = arith.constant 0 : i32
    %c0_i32_1 = arith.constant 0 : i32
    %c0_i32_2 = arith.constant 0 : i32
    return %c0_i32, %c0_i32_0, %c0_i32_1 : i32, i32, i32
  }
  func.func @transform_18(%arg0: i32) -> (i32, i32) {
    %c0_i32 = arith.constant 0 : i32
    %c0_i32_0 = arith.constant 0 : i32
    %c0_i32_1 = arith.constant 0 : i32
    return %c0_i32, %c0_i32_0 : i32, i32
  }
  func.func @transform_19(%arg0: i32) -> (i32, i32, i32) {
    %c0_i32 = arith.constant 0 : i32
    %c0_i32_0 = arith.constant 0 : i32
    %c0_i32_1 = arith.constant 0 : i32
    return %arg0, %c0_i32, %c0_i32_0 : i32, i32, i32
  }
}

</mosaic_0001>

<bundles_post_ra>
// kernel: deepconvnet_forward.1
= control target key start
LH: loop header
LB: loop body
LE: loop exit
PB: predicated region body
PF: predicated region fallthrough
CT: control target
= control target key end

     0   :  { %s11577_s0 = inlined_call_operand.vmem [shape: bf16[2,10,746], index: 0, kind: input, shape index: {}]   ;;  %s11578_s1 = inlined_call_operand.vmem [shape: bf16[25,10], index: 1, kind: input, shape index: {}]   ;;  %s11579_s2 = inlined_call_operand.vmem [shape: f32[25,1], index: 2, kind: input, shape index: {}]   ;;  %s11580_s3 = inlined_call_operand.vmem [shape: f32[25,1], index: 3, kind: input, shape index: {}]   ;;  %s11581_s4 = inlined_call_operand.vmem [shape: bf16[745,373], index: 4, kind: input, shape index: {}]   ;;  %s11582_s5 = inlined_call_operand.vmem [shape: bf16[50,125], index: 5, kind: input, shape index: {}]   ;;  %s11583_s6 = inlined_call_operand.vmem [shape: f32[50,1], index: 6, kind: input, shape index: {}]   ;;  %s11584_s7 = inlined_call_operand.vmem [shape: f32[50,1], index: 7, kind: input, shape index: {}]   ;;  %s11585_s8 = inlined_call_operand.vmem [shape: bf16[368,184], index: 8, kind: input, shape index: {}]   ;;  %s11586_s9 = inlined_call_operand.vmem [shape: bf16[100,250], index: 9, kind: input, shape index: {}]   ;;  %s11587_s10 = inlined_call_operand.vmem [shape: f32[100,1], index: 10, kind: input, shape index: {}]   ;;  %s11588_s11 = inlined_call_operand.vmem [shape: f32[100,1], index: 11, kind: input, shape index: {}]   ;;  %s11589_s12 = inlined_call_operand.vmem [shape: bf16[179,90], index: 12, kind: input, shape index: {}]   ;;  %s11590_s13 = inlined_call_operand.vmem [shape: bf16[200,500], index: 13, kind: input, shape index: {}]   ;;  %s11591_s14 = inlined_call_operand.vmem [shape: f32[200,1], index: 14, kind: input, shape index: {}]   ;;  %s11592_s15 = inlined_call_operand.vmem [shape: f32[200,1], index: 15, kind: input, shape index: {}]   ;;  %s11593_s16 = inlined_call_operand.vmem [shape: bf16[85,43], index: 16, kind: input, shape index: {}]   ;;  %s11594_s17 = inlined_call_operand.vmem [shape: f32[2,200,43], index: 17, kind: input, shape index: {}]   ;;  %s11595_s18 = inlined_call_operand.vmem [shape: f32[1,2], index: 18, kind: input, shape index: {}]   ;;  %s11596_s19 = inlined_call_operand.hbm [shape: f32[2,1,2], index: 19, kind: output, shape index: {}]  }
   0x1   :  { %11622 = sst [smem:[#allocation17_spill]] %s11577_s0 }
   0x2   :  { %11623 = sst [smem:[#allocation18_spill]] %s11578_s1 }
   0x3   :  { %11624 = sst [smem:[#allocation19_spill]] %s11579_s2 }
   0x4   :  { %11625 = sst [smem:[#allocation20_spill]] %s11580_s3 }
   0x5   :  { %11626 = sst [smem:[#allocation21_spill]] %s11581_s4 }
   0x6   :  { %11627 = sst [smem:[#allocation22_spill]] %s11582_s5 }
   0x7   :  { %11628 = sst [smem:[#allocation23_spill]] %s11583_s6 }
   0x8   :  { %11629 = sst [smem:[#allocation24_spill]] %s11596_s19 }
   0x9   :  { %24 = vsyncpa [#allocation3], 0 }
   0xa   :  { %26 = vsyncpa [#allocation3 + $0x1], 0  ;;  %s8251_s0 = smov 0   ;;  %s8253_s30 = smov 0  }
   0xb   :  { %s8255_s20 = smov 0   ;;  %s8257_s21 = smov 0  }
   0xc LB: > { %11630 = sst [smem:[#allocation5_spill]] %s8128_s0  ;;  %s8272_s1 = sadd.s32 4294967295, %s8140_s21   ;;  %s8140_s21 = sphi %s8257_s21, %s11674_s21   ;;  %s8136_s20 = sphi %s8255_s20, %s11677_s20   ;;  %s8132_s30 = sphi %s8253_s30, %s11676_s30   ;;  %s8128_s0 = sphi %s8251_s0, %s11675_s0  }
   0xd   : > { %11631 = sst [smem:[#allocation6_spill]] %s8132_s30  ;;  %s6671_s22 = sadd.s32 4294967294, %s8140_s21  }
   0xe   : > { %11632 = sst [smem:[#allocation7_spill]] %s8136_s20  ;;  %s8276_s2 = sadd.s32 1, %s8140_s21  }
   0xf   : > { %11633 = sst [smem:[#allocation8_spill]] %s8140_s21  ;;  %s443_s23 = sadd.s32 1, %s8136_s20 }
  0x10   : > { %11634 = sst [smem:[#allocation9_spill]] %s8272_s1  ;;  %s440_s24 = ssub.s32 %s8140_s21, %s8276_s2 }
  0x11   : > { %11635 = sst [smem:[#allocation10_spill]] %s8276_s2  ;;  %p453_p0 = scmp.ne.s32.totalorder %s8136_s20, %s8132_s30 }
  0x12   : > { %p441_p1 = scmp.eq.s32.totalorder %s440_s24, 0  ;;  %p454_p2 = scmp.eq.s32.totalorder %s8272_s1, 1 }
  0x13   : > { %p459_p3 = scmp.ne.s32.totalorder %s8132_s30, %s8128_s0  ;;  %p460_p4 = scmp.eq.s32.totalorder %s6671_s22, 1 }
  0x14   : > { %s8287_s25 = scalar_select %p441_p1, %s8136_s20, %s443_s23  }
  0x15   : > { %p8289_p5 = por %p454_p2, %p453_p0  ;;  %p8293_p6 = por %p460_p4, %p459_p3 }
  0x16   : > { %11636 = sst [smem:[#allocation11_spill]] %s8287_s25  ;;  %p6674_p7 = scmp.ge.s32.totalorder %s8140_s21, 1 }
  0x17   : > { %s11637_s3 = scalar_select %p8289_p5, 1, 0 }
  0x18   : > { %s11639_s26 = scalar_select %p8293_p6, 1, 0 }
  0x19   : > { %11638 = sst [smem:[#allocation12_spill]] %s11637_s3  ;;  %p540_p8 = scmp.lt.s32.totalorder %s8140_s21, 3 }
  0x1a   : > { %11640 = sst [smem:[#allocation13_spill]] %s11639_s26 }
  0x1b   : > { %p541_p9 = pnand %p6674_p7, %p540_p8 }
  0x1d   : > { %544 = sbr.rel (%p541_p9) target bundleno = 3525 (0xdc5), region = 96 }
  0x22   : > { %p595_p10 = scmp.lt.s32.totalorder %s8272_s1, 1  ;;  %v8142_v0 = vmov 0   ;;  %s11641_s29 = sld [smem:[#allocation19_spill]]  ;;  %vm652_vm0 = vcmask 1044480   ;;  %vm645_vm1 = vcmask 80896   ;;  %vm1022_vm2 = vcmask 1039360  }
  0x23   : > { %703 = vmatprep.mubr.bf16.mxu0 %v8142_v0  ;;  %756 = vmatprep.mubr.bf16.mxu1 %v8142_v0  ;;  %s11642_s25 = sld [smem:[#allocation20_spill]]  ;;  %s8143_s23 = smov 127   ;;  %vm2040_vm3 = vcmask 859136   ;;  %vm2047_vm4 = vcmask 1043456   ;;  %vm2543_vm5 = vcmask 1041408   ;;  %vm2460_vm6 = vcmask 1040384  }
  0x24   : > { %s596_s22 = scalar_select %p595_p10, %s8272_s1, 1  ;;  %7457 = vset.pattern.permute.xlu0 %v8142_v0  ;;  %7458 = vset.pattern.permute.xlu1 %v8142_v0  ;;  %vm2490_vm7 = vsmask.f32 5376  ;;  %vm2371_vm8 = vsmask.f32 4352  ;;  %vm2588_vm9 = vcmask 1045504  }
  0x25   : > { %s11643_s19 = sld [smem:[#allocation17_spill]]  ;;  %s11615_s2 = smov 124   ;;  %vm2645_vm10 = vcmask 1046528   ;;  %vm2565_vm11 = vcmask 1014784   ;;  %vm2530_vm12 = vcmask 1022976   ;;  %vm2482_vm13 = vcmask 1031168   ;;  %vm9344_vm14 = vmand %vm2588_vm9, %vm2490_vm7 }
  0x26   : > { %s7409_s20 = smul.u32 48, %s596_s22  ;;  %s11645_s4 = sld [smem:[#allocation21_spill]]  ;;  %vm9364_vm15 = vmand %vm652_vm0, %vm2371_vm8 }
  0x27   : > { %s11613_s26 = smov 125   ;;  %s11648_s6 = sld [smem:[#allocation23_spill]] }
  0x28   : > { %v830_v1 = vld [vmem:[%s11641_s29] sm:$0xff]  ;;  %v831_v3 = vld [vmem:[%s11641_s29 + $0x8] sm:$0xff]  ;;  %v832_v5 = vld [vmem:[%s11641_s29 + $0x10] sm:$0xff]  ;;  %s11653_s5 = sld [smem:[#allocation22_spill]]  ;;  %s11654_s1 = smov 125  }
  0x29   : > { %v878_v2 = vld [vmem:[%s11642_s25] sm:$0xff]  ;;  %836 = vperm.xlu0 %7457, %v830_v1   ;;  %v879_v4 = vld [vmem:[%s11642_s25 + $0x8] sm:$0xff]  ;;  %v833_v6 = vld [vmem:[%s11641_s29 + $0x18] sm:$0x1]  ;;  %s11657_s24 = smov 124   ;;  %s11667_s22 = sld [smem:[#allocation9_spill]] }
  0x2a   : > { %884 = vperm.xlu1 %7458, %v878_v2   ;;  %v880_v16 = vld [vmem:[%s11642_s25 + $0x10] sm:$0xff]  ;;  %v881_v17 = vld [vmem:[%s11642_s25 + $0x18] sm:$0x1]  ;;  %s11669_s21 = sld [smem:[#allocation24_spill]] }
  0x2b   : > { %s599_s3 = scalar_lea.vmem %s11643_s19, %s7409_s20  ;;  %s11644_s19 = sld [smem:[#allocation18_spill]] }
  0x2c   : > { %v7694_v7 = vld [vmem:[%s599_s3 + $0x4] ss:$24 sps:$4 sm:$0x1f]   ;;  %v7698_v9 = vld [vmem:[%s599_s3] ss:$24 sps:$4 sm:$0x1f]  }
  0x2d   : > { %841 = vperm.xlu0 %7457, %v831_v3   ;;  %v7696_v8 = vld [vmem:[%s599_s3 + $0xc] ss:$24 sps:$4 sm:$0x1f]   ;;  %6684 = vmatprep.subr.msk.bf16.mxu0 %vm652_vm0, %v7694_v7  ;;  %v7699_v10 = vld [vmem:[%s599_s3 + $0x8] ss:$24 sps:$4 sm:$0x1f]  }
  0x2e   : > { %889 = vperm.xlu1 %7458, %v879_v4   ;;  %6687 = vmatprep.subr.msk.bf16.mxu1 %vm652_vm0, %v7696_v8  ;;  %v7702_v12 = vld [vmem:[%s599_s3 + $0x14] ss:$24 sps:$4 sm:$0x1f]   ;;  %v654_v13 = vsel %vm652_vm0, %v7698_v9, 0  ;;  %v660_v14 = vsel %vm652_vm0, %v7699_v10, 0 }
  0x2f   : > { %v7704_v15 = vld [vmem:[%s599_s3 + $0x10] ss:$24 sps:$4 sm:$0x1f]   ;;  %686 = vmatpush1.bf16.msra.mxu0 %v654_v13  ;;  %739 = vmatpush1.bf16.msra.mxu1 %v660_v14  ;;  %v7707_v21 = vld [vmem:[%s11645_s4 + $0xac] ss:$12 sps:$4 sm:$0xff]   ;;  %s8146_s3 = smov 126  }
  0x30   : > { %6690 = vmatprep.subr.msk.bf16.mxu0 %vm652_vm0, %v7702_v12  ;;  %v666_v18 = vsel %vm652_vm0, %v7704_v15, 0  ;;  %v7705_v20 = vld [vmem:[%s11645_s4 + $0xa8] ss:$12 sps:$4 sm:$0xff]   ;;  %2059 = vmatprep.subr.bf16.mxu1 %v7707_v21  ;;  %v7708_v24 = vld [vmem:[%s11645_s4 + $0x90] ss:$12 sps:$4 sm:$0xff]   ;;  %s7026_s27 = sshll.u32 %s11667_s22, 4 }
  0x31   : > { %v7700_v11 = vld [vmem:[%s11644_s19] sm:$0xff]   ;;  %846 = vperm.xlu0 %7457, %v832_v5   ;;  %v7701_v19 = vld [vmem:[%s11644_s19 + $0x8] sm:$0x1f]   ;;  %v7723_v28 = vld [vmem:[%s11645_s4 + $0x210] ss:$12 sps:$4 sm:$0xff]   ;;  %s6614_s30 = scalar_lea.hbm %s11669_s21, %s7026_s27 }
  0x32   : > { %851 = vperm.xlu1 %7458, %v833_v6   ;;  %6685 = vmatmul.mubr.msk.bf16.vlgmr.msra.gmra.mxu0 %vm645_vm1, %v7700_v11  ;;  %v7710_v22 = vld [vmem:[%s11645_s4 + $0x94] ss:$12 sps:$4 sm:$0xff]   ;;  %v7719_v25 = vld [vmem:[%s11645_s4 + $0x22c] ss:$12 sps:$4 sm:$0xff]   ;;  %v7713_v26 = vld [vmem:[%s11645_s4 + $0x7c] ss:$12 sps:$4 sm:$0xff]  }
  0x33   : > { %6688 = vmatmul.mubr.msk.bf16.vlgmr.msra.gmra.mxu1 %vm645_vm1, %v7700_v11  ;;  %713 = vmatprep.mubr.bf16.mxu0 %v8142_v0  ;;  %v7717_v23 = vld [vmem:[%s11645_s4 + $0x228] ss:$12 sps:$4 sm:$0xff]   ;;  %v7711_v29 = vld [vmem:[%s11645_s4 + $0x78] ss:$12 sps:$4 sm:$0xff]   ;;  %v7714_v33 = vld [vmem:[%s11645_s4 + $0x60] ss:$12 sps:$4 sm:$0xff]  }
  0x34   : > { %766 = vmatprep.mubr.bf16.mxu1 %v8142_v0  ;;  %792 = vmatpush1.bf16.msra.mxu0 %v666_v18  ;;  %v7725_v27 = vld [vmem:[%s11645_s4 + $0x214] ss:$12 sps:$4 sm:$0xff]   ;;  %v7731_v30 = vld [vmem:[%s11645_s4 + $0x1fc] ss:$12 sps:$4 sm:$0xff]   ;;  %v7716_v31 = vld [vmem:[%s11645_s4 + $0x64] ss:$12 sps:$4 sm:$0xff]  }
  0x35   : > { %894 = vperm.xlu0 %7457, %v880_v16   ;;  %2060 = vmatpush1.bf16.msra.mxu1 %v7705_v20  ;;  %v7729_v32 = vld [vmem:[%s11645_s4 + $0x1f8] ss:$12 sps:$4 sm:$0xff]   ;;  %v7735_v36 = vld [vmem:[%s11645_s4 + $0x1e0] ss:$12 sps:$4 sm:$0xff]   ;;  %v7720_v37 = vld [vmem:[%s11645_s4 + $0x48] ss:$12 sps:$4 sm:$0xff]  }
  0x36   : > { %899 = vperm.xlu1 %7458, %v881_v17   ;;  %2061 = vmatprep.subr.bf16.mxu1 %v7710_v22  ;;  %v7737_v34 = vld [vmem:[%s11645_s4 + $0x1e4] ss:$12 sps:$4 sm:$0xff]   ;;  %v7722_v35 = vld [vmem:[%s11645_s4 + $0x4c] ss:$12 sps:$4 sm:$0xff]   ;;  %v7728_v38 = vld [vmem:[%s11645_s4 + $0x34] ss:$12 sps:$4 sm:$0xff]  }
  0x37   : > { %2112 = vmatprep.subr.bf16.mxu0 %v7719_v25  ;;  %v7743_v39 = vld [vmem:[%s11645_s4 + $0x1cc] ss:$12 sps:$4 sm:$0xff]   ;;  %v7741_v40 = vld [vmem:[%s11645_s4 + $0x1c8] ss:$12 sps:$4 sm:$0xff]   ;;  %v7726_v41 = vld [vmem:[%s11645_s4 + $0x30] ss:$12 sps:$4 sm:$0xff]  }
  0x38   : > { %v7749_v42 = vld [vmem:[%s11645_s4 + $0x1b4] ss:$12 sps:$4 sm:$0xff]   ;;  %v7734_v43 = vld [vmem:[%s11645_s4 + $0x1c] ss:$12 sps:$4 sm:$0xff]   ;;  %v7732_v45 = vld [vmem:[%s11645_s4 + $0x18] ss:$12 sps:$4 sm:$0xff]  }
  0x39   : > { %2062 = vmatpush1.bf16.msra.mxu1 %v7708_v24  ;;  %v7747_v44 = vld [vmem:[%s11645_s4 + $0x1b0] ss:$12 sps:$4 sm:$0xff]   ;;  %v7753_v48 = vld [vmem:[%s11645_s4 + $0x198] ss:$12 sps:$4 sm:$0xff]   ;;  %v7738_v49 = vld [vmem:[%s11645_s4] ss:$12 sps:$4 sm:$0xff]  }
  0x3a   : > { %6686 = vmatmul.mubr.msk.bf16.gmra.mxu0 %vm645_vm1, %v7701_v19  ;;  %2063 = vmatprep.subr.bf16.mxu1 %v7713_v26  ;;  %v7755_v46 = vld [vmem:[%s11645_s4 + $0x19c] ss:$12 sps:$4 sm:$0xff]   ;;  %v7740_v47 = vld [vmem:[%s11645_s4 + $0x4] ss:$12 sps:$4 sm:$0xff]   ;;  %v7746_v51 = vld [vmem:[%s11645_s4 + $0x16c] ss:$12 sps:$4 sm:$0xff]  }
  0x3b   : > { %6689 = vmatmul.mubr.msk.bf16.gmra.mxu1 %vm645_vm1, %v7701_v19  ;;  %809 = vmatprep.mubr.bf16.mxu0 %v8142_v0  ;;  %v7761_v50 = vld [vmem:[%s11645_s4 + $0x184] ss:$12 sps:$4 sm:$0xff]   ;;  %v7759_v52 = vld [vmem:[%s11645_s4 + $0x180] ss:$12 sps:$4 sm:$0xff]   ;;  %v7744_v53 = vld [vmem:[%s11645_s4 + $0x168] ss:$12 sps:$4 sm:$0xff]  }
  0x3c   : > { %v7767_v54 = vld [vmem:[%s11645_s4 + $0x2ec] ss:$12 sps:$4 sm:$0xff]   ;;  %v7752_v55 = vld [vmem:[%s11645_s4 + $0x154] ss:$12 sps:$4 sm:$0xff]   ;;  %v7750_v57 = vld [vmem:[%s11645_s4 + $0x150] ss:$12 sps:$4 sm:$0xff]  }
  0x3d   : > { %2064 = vmatpush1.bf16.msra.mxu1 %v7711_v29  ;;  %v7765_v56 = vld [vmem:[%s11645_s4 + $0x2e8] ss:$12 sps:$4 sm:$0xff]   ;;  %v7771_v60 = vld [vmem:[%s11645_s4 + $0x2d0] ss:$12 sps:$4 sm:$0xff]   ;;  %v7756_v61 = vld [vmem:[%s11645_s4 + $0x138] ss:$12 sps:$4 sm:$0xff]  }
  0x3e   : > { %2065 = vmatprep.subr.bf16.mxu1 %v7716_v31  ;;  %v7773_v58 = vld [vmem:[%s11645_s4 + $0x2d4] ss:$12 sps:$4 sm:$0xff]   ;;  %v7758_v59 = vld [vmem:[%s11645_s4 + $0x13c] ss:$12 sps:$4 sm:$0xff]   ;;  %v7764_v62 = vld [vmem:[%s11645_s4 + $0x124] ss:$12 sps:$4 sm:$0xff]  }
  0x3f   : > { %v7762_v63 = vld [vmem:[%s11645_s4 + $0x120] ss:$12 sps:$4 sm:$0xff]   ;;  %v7768_v2 = vld [vmem:[%s11645_s4 + $0x108] ss:$12 sps:$4 sm:$0xff]   ;;  %v7774_v4 = vld [vmem:[%s11645_s4 + $0xf0] ss:$12 sps:$4 sm:$0xff]  }
  0x40   : > { %v7770_v1 = vld [vmem:[%s11645_s4 + $0x10c] ss:$12 sps:$4 sm:$0xff]   ;;  %v7776_v3 = vld [vmem:[%s11645_s4 + $0xf4] ss:$12 sps:$4 sm:$0xff]   ;;  %v7779_v6 = vld [vmem:[%s11645_s4 + $0x2bc] ss:$12 sps:$4 sm:$0xff]  }
  0x41   : > { %2066 = vmatpush1.bf16.msra.mxu1 %v7714_v33  ;;  %v7777_v8 = vld [vmem:[%s11645_s4 + $0x2b8] ss:$12 sps:$4 sm:$0xff]   ;;  %v7782_v10 = vld [vmem:[%s11645_s4 + $0xdc] ss:$12 sps:$4 sm:$0xff]   ;;  %v7783_v20 = vld [vmem:[%s11645_s4 + $0x2a0] ss:$12 sps:$4 sm:$0xff]  }
  0x42   : > { %6691 = vmatmul.mubr.msk.bf16.vlgmr.msra.gmra.mxu0 %vm645_vm1, %v7700_v11  ;;  %2067 = vmatprep.subr.bf16.mxu1 %v7722_v35  ;;  %v7780_v9 = vld [vmem:[%s11645_s4 + $0xd8] ss:$12 sps:$4 sm:$0xff]  }
  0x43   : > { %819 = vmatprep.mubr.bf16.mxu0 %v8142_v0  ;;  %2113 = vmatpush1.bf16.msra.mxu0 %v7717_v23  ;;  %v7785_v17 = vld [vmem:[%s11645_s4 + $0x2a4] ss:$12 sps:$4 sm:$0xff]   ;;  %v7791_v33 = vld [vmem:[%s11645_s4 + $0x28c] ss:$12 sps:$4 sm:$0xff]  }
  0x44   : > { %2114 = vmatprep.subr.bf16.mxu0 %v7725_v27  ;;  %v7788_v24 = vld [vmem:[%s11645_s4 + $0xc4] ss:$12 sps:$4 sm:$0xff]   ;;  %v7786_v27 = vld [vmem:[%s11645_s4 + $0xc0] ss:$12 sps:$4 sm:$0xff]  }
  0x45   : > { %2068 = vmatpush1.bf16.msra.mxu1 %v7720_v37  ;;  %v7789_v37 = vld [vmem:[%s11645_s4 + $0x288] ss:$12 sps:$4 sm:$0xff]  }
  0x46   : > { %2069 = vmatprep.subr.bf16.mxu1 %v7728_v38 }
  0x47   : > { %2115 = vmatpush1.bf16.msra.mxu0 %v7723_v28 }
  0x48   : > { %2116 = vmatprep.subr.bf16.mxu0 %v7731_v30 }
  0x49   : > { %2070 = vmatpush1.bf16.msra.mxu1 %v7726_v41 }
  0x4a   : > { %6692 = vmatmul.mubr.msk.bf16.gmra.mxu0 %vm645_vm1, %v7701_v19  ;;  %2071 = vmatprep.subr.bf16.mxu1 %v7734_v43  ;;  %v7794_v43 = vld [vmem:[%s11645_s4 + $0x3ac] ss:$12 sps:$4 sm:$0xff]   ;;  %vm3346_vm1 = vcmask 916480  }
  0x4b   : > { %2117 = vmatpush1.bf16.msra.mxu0 %v7729_v32 }
  0x4c   : > { %2118 = vmatprep.subr.bf16.mxu0 %v7737_v34 }
  0x4d   : > { %2072 = vmatpush1.bf16.msra.mxu1 %v7732_v45 }
  0x4e   : > { %2073 = vmatprep.subr.bf16.mxu1 %v7740_v47 }
  0x4f   : > { %2119 = vmatpush1.bf16.msra.mxu0 %v7735_v36 }
  0x50   : > { %2120 = vmatprep.subr.bf16.mxu0 %v7743_v39 }
  0x51   : > { %2074 = vmatpush1.bf16.msra.mxu1 %v7738_v49 }
  0x52   : > { %2075 = vmatprep.subr.bf16.mxu1 %v7746_v51  ;;  %v7797_v51 = vld [vmem:[%s11645_s4 + $0x274] ss:$12 sps:$4 sm:$0xff]  }
  0x53   : > { %2121 = vmatpush1.bf16.msra.mxu0 %v7741_v40 }
  0x54   : > { %2122 = vmatprep.subr.bf16.mxu0 %v7749_v42 }
  0x55   : > { %2076 = vmatpush2.bf16.msra.mxu1 %v7744_v53 }
  0x56   : > { %2077 = vmatprep.subr.bf16.mxu1 %v7752_v55 }
  0x57   : > { %2123 = vmatpush1.bf16.msra.mxu0 %v7747_v44 }
  0x58   : > { %2124 = vmatprep.subr.bf16.mxu0 %v7755_v46 }
  0x59   : > { %2078 = vmatpush2.bf16.msra.mxu1 %v7750_v57  ;;  %v7795_v57 = vld [vmem:[%s11645_s4 + $0x270] ss:$12 sps:$4 sm:$0xff]  }
  0x5a   : > { %2079 = vmatprep.subr.bf16.mxu1 %v7758_v59 }
  0x5b   : > { %2125 = vmatpush1.bf16.msra.mxu0 %v7753_v48 }
  0x5c   : > { %2126 = vmatprep.subr.bf16.mxu0 %v7761_v50 }
  0x5d   : > { %2080 = vmatpush2.bf16.msra.mxu1 %v7756_v61 }
  0x5e   : > { %2081 = vmatprep.subr.bf16.mxu1 %v7764_v62 }
  0x5f   : > { %2127 = vmatpush1.bf16.msra.mxu0 %v7759_v52 }
  0x60   : > { %2128 = vmatprep.subr.bf16.mxu0 %v7767_v54 }
  0x61   : > { %2082 = vmatpush2.bf16.msra.mxu1 %v7762_v63 }
  0x62   : > { %2083 = vmatprep.subr.bf16.mxu1 %v7770_v1 }
  0x63   : > { %2129 = vmatpush2.bf16.msra.mxu0 %v7765_v56 }
  0x64   : > { %2130 = vmatprep.subr.bf16.mxu0 %v7773_v58 }
  0x65   : > { %2084 = vmatpush2.bf16.msra.mxu1 %v7768_v2  ;;  %v7803_v2 = vld [vmem:[%s11645_s4 + $0x25c] ss:$12 sps:$4 sm:$0xff]  }
  0x66   : > { %2085 = vmatprep.subr.bf16.mxu1 %v7776_v3 }
  0x67   : > { %2131 = vmatpush2.bf16.msra.mxu0 %v7771_v60 }
  0x68   : > { %2132 = vmatprep.subr.bf16.mxu0 %v7779_v6 }
  0x69   : > { %2086 = vmatpush2.bf16.msra.mxu1 %v7774_v4 }
  0x6a   : > { %2087 = vmatprep.subr.bf16.mxu1 %v7782_v10  ;;  %v7801_v10 = vld [vmem:[%s11645_s4 + $0x258] ss:$12 sps:$4 sm:$0xff]  }
  0x6b   : > { %2133 = vmatpush2.bf16.msra.mxu0 %v7777_v8 }
  0x6c   : > { %2134 = vmatprep.subr.bf16.mxu0 %v7785_v17 }
  0x6d   : > { %2088 = vmatpush2.bf16.msra.mxu1 %v7780_v9 }
  0x6e   : > { %2089 = vmatprep.subr.bf16.mxu1 %v7788_v24 }
  0x6f   : > { %2135 = vmatpush2.bf16.msra.mxu0 %v7783_v20 }
  0x70   : > { %2136 = vmatprep.subr.bf16.mxu0 %v7791_v33 }
  0x71   : > { %2090 = vmatpush2.bf16.msra.mxu1 %v7786_v27 }
  0x72   : > { %2165 = vmatprep.subr.bf16.mxu1 %v7794_v43 }
  0x73   : > { %2137 = vmatpush2.bf16.msra.mxu0 %v7789_v37 }
  0x74   : > { %2138 = vmatprep.subr.bf16.mxu0 %v7797_v51 }
  0x77   : > { %2139 = vmatpush2.bf16.msra.mxu0 %v7795_v57 }
  0x78   : > { %2140 = vmatprep.subr.bf16.mxu0 %v7803_v2 }
  0x7b   : > { %2141 = vmatpush2.bf16.msra.mxu0 %v7801_v10 }
  0xa4   : > { %v8498_v5 = vpop.permute.xlu0 %836 }
  0xa5   : > { %v8514_v13 = vpop.permute.xlu1 %884 }
  0xa8   : > { %v8503_v7 = vpop.permute.xlu0 %841 }
  0xa9   : > { %v8545_v34 = vpop.permute.xlu1 %889 }
  0xac   : > { %v8531_v25 = vpop.permute.xlu0 %846 }
  0xad   : > { %v8589_v58 = vpop.permute.xlu1 %851 }
  0xb0   : > { %v8573_v49 = vpop.permute.xlu0 %894 }
  0xb1   : > { %v900_v20 = vpop.permute.xlu1 %899 }
  0xf2   : > { %v705_v11 = vpop.f32.mrf.mxu0 }
  0xf3   : > { %v758_v12 = vpop.f32.mrf.mxu1  ;;  %v854_v21 = vmul.f32 %v8498_v5, %v705_v11 }
  0xf4   : > { %v856_v14 = vmul.f32 %v8498_v5, %v758_v12  ;;  %v707_v15 = vpop.f32.mrf.mxu0 }
  0xf5   : > { %v760_v16 = vpop.f32.mrf.mxu1  ;;  %v855_v19 = vmul.f32 %v8498_v5, %v707_v15  ;;  %v8553_v38 = vadd.f32 %v8514_v13, %v854_v21  ;;  %v7809_v21 = vld [vmem:[%s11645_s4 + $0x244] ss:$12 sps:$4 sm:$0xff]  }
  0xf6   : > { %v8521_v18 = vadd.f32 %v8514_v13, %v856_v14  ;;  %v709_v22 = vpop.f32.mrf.mxu0  ;;  %v857_v59 = vmul.f32 %v8498_v5, %v760_v16  ;;  %2142 = vmatprep.subr.bf16.mxu0 %v7809_v21 }
  0xf7   : > { %v762_v23 = vpop.f32.mrf.mxu1  ;;  %v8534_v26 = vadd.f32 %v8514_v13, %v855_v19  ;;  %v860_v29 = vmul.f32 %v8503_v7, %v709_v22  ;;  %v926_v52 = vmax.f32 %v8553_v38, 0.0  ;;  %v7792_v38 = vld [vmem:[%s11645_s4 + $0x3a8] ss:$12 sps:$4 sm:$0xff]  }
  0xf8   : > { %v928_v28 = vmax.f32 %v8521_v18, 0.0  ;;  %v862_v30 = vmul.f32 %v8503_v7, %v762_v23  ;;  %v711_v31 = vpop.f32.mrf.mxu0  ;;  %v8616_v11 = vadd.f32 %v8514_v13, %v857_v59 }
  0xf9   : > { %v764_v32 = vpop.f32.mrf.mxu1  ;;  %v927_v35 = vmax.f32 %v8534_v26, 0.0  ;;  %v861_v36 = vmul.f32 %v8503_v7, %v711_v31  ;;  %v8556_v39 = vadd.f32 %v8545_v34, %v860_v29 }
  0xfa   : > { %v8559_v40 = vadd.f32 %v8545_v34, %v862_v30  ;;  %v715_v41 = vpop.f32.mrf.mxu0  ;;  %v863_v3 = vmul.f32 %v8503_v7, %v764_v32  ;;  %v7807_v30 = vld [vmem:[%s11645_s4 + $0x240] ss:$12 sps:$4 sm:$0xff]   ;;  %v929_v33 = vmax.f32 %v8616_v11, 0.0 }
  0xfb   : > { %v768_v42 = vpop.f32.mrf.mxu1  ;;  %v8565_v44 = vadd.f32 %v8545_v34, %v861_v36  ;;  %v932_v46 = vmax.f32 %v8556_v39, 0.0  ;;  %v7459_v48 = vpack.i.bf16 %v928_v28, %v927_v35  ;;  %v866_v14 = vmul.f32 %v8531_v25, %v715_v41  ;;  %2143 = vmatpush2.bf16.msra.mxu0 %v7807_v30  ;;  %v7800_v39 = vld [vmem:[%s11645_s4 + $0x394] ss:$12 sps:$4 sm:$0xff]  }
  0xfc   : > { %v868_v45 = vmul.f32 %v8531_v25, %v768_v42  ;;  %v717_v47 = vpop.f32.mrf.mxu0  ;;  %v934_v53 = vmax.f32 %v8559_v40, 0.0  ;;  %v8629_v22 = vadd.f32 %v8545_v34, %v863_v3  ;;  %v7810_v40 = vld [vmem:[%s11645_s4 + $0x360] ss:$12 sps:$4 sm:$0xff]  }
  0xfd   : > { %v933_v50 = vmax.f32 %v8565_v44, 0.0  ;;  %v867_v55 = vmul.f32 %v8531_v25, %v717_v47  ;;  %7460 = vrot.lane.b32.xlu0 %v7459_v48, %s8143_s23  ;;  %v770_v60 = vpop.f32.mrf.mxu1  ;;  %v7469_v63 = vpack.i.bf16 %v932_v46, %v926_v52  ;;  %v8645_v36 = vadd.f32 %v8573_v49, %v866_v14  ;;  %v7813_v47 = vld [vmem:[%s11645_s4 + $0x170] ss:$12 sps:$4 sm:$0xff]  }
  0xfe   : > { %v8582_v54 = vadd.f32 %v8573_v49, %v868_v45  ;;  %v719_v56 = vpop.f32.mrf.mxu0  ;;  %v869_v31 = vmul.f32 %v8531_v25, %v770_v60  ;;  %v935_v48 = vmax.f32 %v8629_v22, 0.0  ;;  %7029 = vmatprep.subr.bf16.mxu0 %v7813_v47  ;;  %v7814_v22 = vld [vmem:[%s11645_s4 + $0xb0] ss:$12 sps:$4 sm:$0xff]  }
  0xff   : > { %v8593_v61 = vadd.f32 %v8573_v49, %v867_v55  ;;  %v7464_v1 = vpack.i.bf16 %v934_v53, %v933_v50  ;;  %v872_v8 = vmul.f32 %v8589_v58, %v719_v56  ;;  %v772_v12 = vpop.f32.mrf.mxu1 }
 0x100   : > { %v721_v62 = vpop.f32.mrf.mxu0  ;;  %v940_v4 = vmax.f32 %v8582_v54, 0.0  ;;  %v874_v24 = vmul.f32 %v8589_v58, %v772_v12  ;;  %v8666_v59 = vadd.f32 %v8573_v49, %v869_v31  ;;  %v7832_v54 = vld [vmem:[%s11645_s4 + $0x304] ss:$12 sps:$4 sm:$0xff]  }
 0x101   : > { %v939_v6 = vmax.f32 %v8593_v61, 0.0  ;;  %7470 = vrot.lane.b32.xlu0 %v7469_v63, %s8143_s23  ;;  %7465 = vrot.lane.b32.xlu1 %v7464_v1, %s8143_s23  ;;  %v873_v15 = vmul.f32 %v8589_v58, %v721_v62  ;;  %v8631_v23 = vadd.f32 %v900_v20, %v872_v8  ;;  %v938_v1 = vmax.f32 %v8645_v36, 0.0 }
 0x102   : > { %v811_v9 = vpop.f32.mrf.mxu0  ;;  %v8659_v55 = vadd.f32 %v900_v20, %v874_v24 }
 0x103   : > { %v858_v16 = vmul.f32 %v8498_v5, %v811_v9  ;;  %v7474_v19 = vpack.i.bf16 %v940_v4, %v939_v6  ;;  %v8647_v37 = vadd.f32 %v900_v20, %v873_v15  ;;  %v944_v51 = vmax.f32 %v8631_v23, 0.0  ;;  %v7819_v23 = vld [vmem:[%s11645_s4 + $0x98] ss:$12 sps:$4 sm:$0xff]  }
 0x104   : > { %v813_v17 = vpop.f32.mrf.mxu0  ;;  %v946_v12 = vmax.f32 %v8659_v55, 0.0  ;;  %v7833_v55 = vld [vmem:[%s11645_s4 + $0x110] ss:$12 sps:$4 sm:$0xff]  }
 0x105   : > { %v8635_v27 = vadd.f32 %v8514_v13, %v858_v16  ;;  %7475 = vrot.lane.b32.xlu1 %v7474_v19, %s8143_s23  ;;  %v859_v60 = vmul.f32 %v8498_v5, %v813_v17  ;;  %v945_v2 = vmax.f32 %v8647_v37, 0.0  ;;  %v941_v16 = vmax.f32 %v8666_v59, 0.0 }
 0x106   : > { %v815_v29 = vpop.f32.mrf.mxu0 }
 0x107   : > { %v864_v32 = vmul.f32 %v8503_v7, %v815_v29  ;;  %v930_v41 = vmax.f32 %v8635_v27, 0.0  ;;  %v8693_v17 = vadd.f32 %v8514_v13, %v859_v60  ;;  %v7489_v29 = vpack.i.bf16 %v946_v12, %v945_v2  ;;  %v7871_v27 = vld [vmem:[%s11645_s4 + $0x290] ss:$12 sps:$4 sm:$0xff]  }
 0x108   : > { %v817_v42 = vpop.f32.mrf.mxu0 }
 0x109   : > { %v8651_v43 = vadd.f32 %v8545_v34, %v864_v32  ;;  %v865_v45 = vmul.f32 %v8503_v7, %v817_v42  ;;  %v7479_v57 = vpack.i.bf16 %v930_v41, %v929_v33  ;;  %v774_v7 = vpop.f32.mrf.mxu1 }
 0x10a   : > { %v821_v56 = vpop.f32.mrf.mxu0  ;;  %v875_v14 = vmul.f32 %v8589_v58, %v774_v7 }
 0x10b   : > { %v936_v62 = vmax.f32 %v8651_v43, 0.0  ;;  %v870_v63 = vmul.f32 %v8531_v25, %v821_v56  ;;  %v8674_v3 = vadd.f32 %v8545_v34, %v865_v45  ;;  %7480 = vrot.lane.b32.xlu1 %v7479_v57, %s8143_s23  ;;  %v7494_v34 = vpack.i.bf16 %v944_v51, %v938_v1 }
 0x10c   : > { %v823_v8 = vpop.f32.mrf.mxu0  ;;  %v8714_v42 = vadd.f32 %v900_v20, %v875_v14  ;;  %v931_v45 = vmax.f32 %v8693_v17, 0.0 }
 0x10d   : > { %v8678_v9 = vadd.f32 %v8573_v49, %v870_v63  ;;  %v871_v5 = vmul.f32 %v8531_v25, %v823_v8  ;;  %v7484_v10 = vpack.i.bf16 %v936_v62, %v935_v48  ;;  %v937_v21 = vmax.f32 %v8674_v3, 0.0  ;;  %v7823_v3 = vld [vmem:[%s11645_s4 + $0x140] ss:$12 sps:$4 sm:$0xff]  }
 0x10e   : > { %v825_v15 = vpop.f32.mrf.mxu0  ;;  %v947_v7 = vmax.f32 %v8714_v42, 0.0  ;;  %v7830_v42 = vld [vmem:[%s11645_s4 + $0x300] ss:$12 sps:$4 sm:$0xff]  }
 0x10f   : > { %v11611_v25 = vmax.f32 %v8678_v9, 0.0  ;;  %v876_v19 = vmul.f32 %v8589_v58, %v825_v15  ;;  %7485 = vrot.lane.b32.xlu0 %v7484_v10, %s8143_s23  ;;  %7495 = vrot.lane.b32.xlu1 %v7494_v34, %s8143_s23  ;;  %v8705_v30 = vadd.f32 %v8573_v49, %v871_v5  ;;  %v7499_v57 = vpack.i.bf16 %v937_v21, %v931_v45 }
 0x110   : > { %v827_v24 = vpop.f32.mrf.mxu0 }
 0x111   : > { %v8707_v13 = vadd.f32 %v900_v20, %v876_v19  ;;  %v877_v31 = vmul.f32 %v8589_v58, %v827_v24  ;;  %v7504_v32 = vpack.i.bf16 %v11611_v25, %v941_v16  ;;  %v943_v49 = vmax.f32 %v8705_v30, 0.0 }
 0x113   : > { %v8717_v47 = vadd.f32 %v900_v20, %v877_v31  ;;  %7490 = vrot.lane.b32.xlu0 %v7489_v29, %s8143_s23  ;;  %7505 = vrot.lane.b32.xlu1 %v7504_v32, %s8143_s23  ;;  %v11612_v56 = vmax.f32 %v8707_v13, 0.0 }
 0x115   : > { %v949_v58 = vmax.f32 %v8717_v47, 0.0  ;;  %v7509_v60 = vpack.i.bf16 %v11612_v56, %v947_v7  ;;  %v7874_v47 = vld [vmem:[%s11645_s4 + $0x278] ss:$12 sps:$4 sm:$0xff]  }
 0x117   : > { %7500 = vrot.lane.b32.xlu0 %v7499_v57, %s8143_s23  ;;  %v7514_v20 = vpack.i.bf16 %v949_v58, %v943_v49 }
 0x119   : > { %7515 = vrot.lane.b32.xlu1 %v7514_v20, %s8143_s23 }
 0x11b   : > { %7510 = vrot.lane.b32.xlu0 %v7509_v60, %s8143_s23 }
 0x16f   : > { %v7461_v63 = vpop.permute.xlu0 %7460 }
 0x170   : > { %v7463_v8 = vunpack.i.h.bf16 %v7461_v63  ;;  %v7462_v5 = vunpack.i.l.bf16 %v7461_v63 }
 0x172   : > { %v1024_v15 = vsel %vm1022_vm2, %v7462_v5, %v7463_v8 }
 0x173   : > { %v7471_v10 = vpop.permute.xlu0 %7470  ;;  %v7466_v14 = vpop.permute.xlu1 %7465  ;;  %v1068_v63 = vmax.f32 %v927_v35, %v1024_v15  ;;  %v7798_v35 = vld [vmem:[%s11645_s4 + $0x390] ss:$12 sps:$4 sm:$0xff]  }
 0x174   : > { %v7473_v34 = vunpack.i.h.bf16 %v7471_v10  ;;  %v7472_v19 = vunpack.i.l.bf16 %v7471_v10  ;;  %v7468_v24 = vunpack.i.h.bf16 %v7466_v14  ;;  %v7467_v29 = vunpack.i.l.bf16 %v7466_v14 }
 0x176   : > { %v1023_v31 = vsel %vm1022_vm2, %v7472_v19, %v7462_v5  ;;  %v1028_v32 = vsel %vm1022_vm2, %v7473_v34, %v7467_v29  ;;  %v1029_v57 = vsel %vm1022_vm2, %v7467_v29, %v7468_v24 }
 0x177   : > { %v1067_v20 = vmax.f32 %v926_v52, %v1023_v31  ;;  %v1073_v60 = vmax.f32 %v932_v46, %v1028_v32  ;;  %v1074_v10 = vmax.f32 %v933_v50, %v1029_v57  ;;  %v8754_v14 = vpop.permute.xlu1 %7475  ;;  %v7806_v50 = vld [vmem:[%s11645_s4 + $0x37c] ss:$12 sps:$4 sm:$0xff]   ;;  %v7804_v57 = vld [vmem:[%s11645_s4 + $0x378] ss:$12 sps:$4 sm:$0xff]  }
 0x178   : > { %v7478_v52 = vunpack.i.h.bf16 %v8754_v14  ;;  %v7477_v15 = vunpack.i.l.bf16 %v8754_v14 }
 0x179   : > { %v8752_v25 = vpack.c.bf16 %v1073_v60, %v1067_v20  ;;  %v8756_v5 = vpack.c.bf16 %v1074_v10, %v1068_v63 }
 0x17b   : > { %2091 = vmatprep.mubr.bf16.mxu1 %v8756_v5 }
 0x17c   : > { %2092 = vmatmul.mubr.bf16.vlgmr.msra.gmra.mxu1 %v8752_v25 }
 0x17d   : > { %2166 = vmatpush1.bf16.msra.mxu1 %v7792_v38  ;;  %v8766_v26 = vpop.permute.xlu1 %7480 }
 0x17e   : > { %v7483_v44 = vunpack.i.h.bf16 %v8766_v26  ;;  %v7482_v46 = vunpack.i.l.bf16 %v8766_v26  ;;  %2167 = vmatprep.subr.bf16.mxu1 %v7800_v39  ;;  %v1034_v39 = vsel %vm1022_vm2, %v7477_v15, %v7478_v52  ;;  %v7865_v26 = vld [vmem:[%s11645_s4 + $0x3c0] ss:$12 sps:$4 sm:$0xff]  }
 0x180   : > { %v1025_v34 = vsel %vm1022_vm2, %v7463_v8, %v7482_v46  ;;  %v1026_v20 = vsel %vm1022_vm2, %v7482_v46, %v7483_v44  ;;  %v7812_v8 = vld [vmem:[%s11645_s4 + $0x364] ss:$12 sps:$4 sm:$0xff]  }
 0x181   : > { %v8779_v19 = vpop.permute.xlu0 %7485  ;;  %2168 = vmatpush1.bf16.msra.mxu1 %v7798_v35  ;;  %v7496_v29 = vpop.permute.xlu1 %7495  ;;  %v1069_v63 = vmax.f32 %v928_v28, %v1025_v34 }
 0x182   : > { %v7488_v31 = vunpack.i.h.bf16 %v8779_v19  ;;  %v7487_v32 = vunpack.i.l.bf16 %v8779_v19  ;;  %v7497_v60 = vunpack.i.l.bf16 %v7496_v29  ;;  %2169 = vmatprep.subr.bf16.mxu1 %v7806_v50  ;;  %v1070_v50 = vmax.f32 %v929_v33, %v1026_v20  ;;  %v7817_v33 = vld [vmem:[%s11645_s4 + $0x34c] ss:$12 sps:$4 sm:$0xff]  }
 0x184   : > { %v1030_v10 = vsel %vm1022_vm2, %v7468_v24, %v7487_v32  ;;  %v1031_v38 = vsel %vm1022_vm2, %v7487_v32, %v7488_v31  ;;  %v1033_v28 = vsel %vm1022_vm2, %v7497_v60, %v7477_v15  ;;  %v7498_v24 = vunpack.i.h.bf16 %v7496_v29  ;;  %v7818_v29 = vld [vmem:[%s11645_s4 + $0x158] ss:$12 sps:$4 sm:$0xff]  }
 0x185   : > { %v1075_v35 = vmax.f32 %v934_v53, %v1030_v10  ;;  %v7491_v46 = vpop.permute.xlu0 %7490  ;;  %v1076_v18 = vmax.f32 %v935_v48, %v1031_v38  ;;  %2170 = vmatpush1.bf16.msra.mxu1 %v7804_v57  ;;  %v8808_v56 = vpop.permute.xlu1 %7505  ;;  %v1080_v15 = vmax.f32 %v939_v6, %v1034_v39  ;;  %v1079_v20 = vmax.f32 %v938_v1, %v1033_v28  ;;  %v7815_v1 = vld [vmem:[%s11645_s4 + $0x348] ss:$12 sps:$4 sm:$0xff]   ;;  %v7824_v28 = vld [vmem:[%s11645_s4 + $0x80] ss:$12 sps:$4 sm:$0xff]  }
 0x186   : > { %v7493_v34 = vunpack.i.h.bf16 %v7491_v46  ;;  %v7492_v32 = vunpack.i.l.bf16 %v7491_v46  ;;  %2171 = vmatprep.subr.bf16.mxu1 %v7812_v8  ;;  %v7508_v60 = vunpack.i.h.bf16 %v8808_v56  ;;  %v7507_v8 = vunpack.i.l.bf16 %v8808_v56  ;;  %v7822_v39 = vld [vmem:[%s11645_s4 + $0x334] ss:$12 sps:$4 sm:$0xff]   ;;  %v7820_v46 = vld [vmem:[%s11645_s4 + $0x330] ss:$12 sps:$4 sm:$0xff]  }
 0x187   : > { %v8813_v53 = vpack.c.bf16 %v1075_v35, %v1069_v63  ;;  %v8815_v11 = vpack.c.bf16 %v1076_v18, %v1070_v50 }
 0x188   : > { %v1039_v48 = vsel %vm1022_vm2, %v7492_v32, %v7493_v34  ;;  %v1038_v57 = vsel %vm1022_vm2, %v7498_v24, %v7492_v32  ;;  %v1035_v18 = vsel %vm1022_vm2, %v7478_v52, %v7507_v8  ;;  %v7827_v24 = vld [vmem:[%s11645_s4 + $0x31c] ss:$12 sps:$4 sm:$0xff]  }
 0x189   : > { %2144 = vmatprep.mubr.bf16.mxu0 %v8815_v11  ;;  %v8835_v63 = vpop.permute.xlu0 %7500  ;;  %v1086_v61 = vmax.f32 %v945_v2, %v1039_v48  ;;  %v1085_v6 = vmax.f32 %v944_v51, %v1038_v57  ;;  %2172 = vmatpush1.bf16.msra.mxu1 %v7810_v40  ;;  %v7828_v52 = vld [vmem:[%s11645_s4 + $0x128] ss:$12 sps:$4 sm:$0xff]   ;;  %v11617_v40 = vmov 65535  }
 0x18a   : > { %v7503_v10 = vunpack.i.h.bf16 %v8835_v63  ;;  %v7502_v36 = vunpack.i.l.bf16 %v8835_v63  ;;  %2145 = vmatmul.mubr.bf16.vlgmr.msra.gmra.mxu0 %v8813_v53  ;;  %2173 = vmatprep.subr.bf16.mxu1 %v7817_v33  ;;  %v7829_v57 = vld [vmem:[%s11645_s4 + $0x68] ss:$12 sps:$4 sm:$0xff]  }
 0x18b   : > { %7030 = vmatpush3.bf16.msra.mxu0 %v7814_v22  ;;  %v8847_v38 = vpack.c.bf16 %v1086_v61, %v1080_v15  ;;  %v8849_v37 = vpack.c.bf16 %v1085_v6, %v1079_v20  ;;  %v2048_v22 = vsel %vm2047_vm4, 4294967295, %v11617_v40  ;;  %v1081_v15 = vmax.f32 %v940_v4, %v1035_v18  ;;  %v7837_v4 = vld [vmem:[%s11645_s4 + $0x454] ss:$12 sps:$4 sm:$0x1f]   ;;  %v7834_v20 = vld [vmem:[%s11645_s4 + $0x50] ss:$12 sps:$4 sm:$0xff]  }
 0x18c   : > { %v1078_v51 = vmax.f32 %v937_v21, %v7503_v10  ;;  %v1072_v2 = vmax.f32 %v931_v45, %v7502_v36  ;;  %7031 = vmatprep.subr.bf16.mxu0 %v7818_v29  ;;  %v1036_v21 = vsel %vm1022_vm2, %v7507_v8, %v7508_v60  ;;  %v7838_v61 = vld [vmem:[%s11645_s4 + $0xf8] ss:$12 sps:$4 sm:$0xff]   ;;  %v7853_v18 = vld [vmem:[%s11645_s4 + $0x2f0] ss:$12 sps:$4 sm:$0xff]  }
 0x18d   : > { %2101 = vmatprep.mubr.bf16.mxu1 %v8847_v38  ;;  %v8866_v35 = vpop.permute.xlu0 %7510  ;;  %2174 = vmatpush1.bf16.msra.mxu1 %v7815_v1  ;;  %v1082_v33 = vmax.f32 %v941_v16, %v1036_v21  ;;  %v7839_v1 = vld [vmem:[%s11645_s4 + $0x38] ss:$12 sps:$4 sm:$0xff]   ;;  %v7845_v21 = vld [vmem:[%s11645_s4 + $0x420] ss:$12 sps:$4 sm:$0xff]  }
 0x18e   : > { %v7513_v17 = vunpack.i.h.bf16 %v8866_v35  ;;  %v7512_v45 = vunpack.i.l.bf16 %v8866_v35  ;;  %v8879_v50 = vpack.c.bf16 %v1078_v51, %v1072_v2  ;;  %2102 = vmatmul.mubr.bf16.gmra.mxu1 %v8849_v37  ;;  %2175 = vmatprep.subr.bf16.mxu1 %v7822_v39  ;;  %v7840_v51 = vld [vmem:[%s11645_s4 + $0x438] ss:$12 sps:$4 sm:$0xff]   ;;  %v7844_v2 = vld [vmem:[%s11645_s4 + $0x20] ss:$12 sps:$4 sm:$0xff]  }
 0x18f   : > { %7032 = vmatpush3.bf16.msra.mxu0 %v7819_v23  ;;  %v7842_v23 = vld [vmem:[%s11645_s4 + $0x43c] ss:$12 sps:$4 sm:$0xff]   ;;  %v7847_v39 = vld [vmem:[%s11645_s4 + $0x424] ss:$12 sps:$4 sm:$0xff]  }
 0x190   : > { %6834 = vmatprep.mubr.msk.bf16.mxu1 %vm2040_vm3, %v8879_v50  ;;  %v1041_v14 = vsel %vm1022_vm2, %v7512_v45, %v7513_v17  ;;  %v1040_v32 = vsel %vm1022_vm2, %v7493_v34, %v7512_v45  ;;  %7033 = vmatprep.subr.bf16.mxu0 %v7823_v3  ;;  %v7825_v34 = vld [vmem:[%s11645_s4 + $0x318] ss:$12 sps:$4 sm:$0xff]   ;;  %v7848_v3 = vld [vmem:[%s11645_s4 + $0xc8] ss:$12 sps:$4 sm:$0xff]  }
 0x191   : > { %v1088_v48 = vmax.f32 %v947_v7, %v1041_v14  ;;  %v1087_v29 = vmax.f32 %v946_v12, %v1040_v32  ;;  %2176 = vmatpush1.bf16.msra.mxu1 %v7820_v46  ;;  %v8930_v12 = vsel %vm652_vm0, %v2048_v22, 0  ;;  %v7835_v7 = vld [vmem:[%s11645_s4 + $0x450] ss:$12 sps:$4 sm:$0x1f]   ;;  %v7849_v45 = vld [vmem:[%s11645_s4 + $0x8] ss:$12 sps:$4 sm:$0xff]  }
 0x192   : > { %2177 = vmatprep.subr.bf16.mxu1 %v7827_v24  ;;  %v2054_v8 = vand.u32 %v7837_v4, %v8930_v12  ;;  %v2051_v6 = vand.u32 %v7835_v7, %v8930_v12  ;;  %v7852_v46 = vld [vmem:[%s11645_s4 + $0x40c] ss:$12 sps:$4 sm:$0xff]   ;;  %v7854_v24 = vld [vmem:[%s11645_s4 + $0x230] ss:$12 sps:$4 sm:$0xff]   ;;  %v7857_v14 = vld [vmem:[%s11645_s4 + $0x3f4] ss:$12 sps:$4 sm:$0xff]  }
 0x193   : > { %7034 = vmatpush3.bf16.msra.mxu0 %v7824_v28  ;;  %v8916_v59 = vpack.c.bf16 %v1088_v48, %v1082_v33  ;;  %v8918_v16 = vpack.c.bf16 %v1087_v29, %v1081_v15  ;;  %v7850_v28 = vld [vmem:[%s11645_s4 + $0x408] ss:$12 sps:$4 sm:$0xff]   ;;  %v7855_v32 = vld [vmem:[%s11645_s4 + $0x3f0] ss:$12 sps:$4 sm:$0xff]   ;;  %v7859_v22 = vld [vmem:[%s11645_s4 + $0x218] ss:$12 sps:$4 sm:$0xff]   ;;  %v7516_v48 = vpop.permute.xlu1 %7515  ;;  %v1032_v29 = vsel %vm1022_vm2, %v7488_v31, %v7503_v10 }
 0x194   : > { %7035 = vmatprep.subr.bf16.mxu0 %v7828_v52  ;;  %v7858_v52 = vld [vmem:[%s11645_s4 + $0x2d8] ss:$12 sps:$4 sm:$0xff]   ;;  %v7862_v33 = vld [vmem:[%s11645_s4 + $0x3dc] ss:$12 sps:$4 sm:$0xff]   ;;  %v7864_v15 = vld [vmem:[%s11645_s4 + $0x200] ss:$12 sps:$4 sm:$0xff]  }
 0x195   : > { %2154 = vmatprep.mubr.bf16.mxu0 %v8916_v59  ;;  %2178 = vmatpush1.bf16.msra.mxu1 %v7825_v34  ;;  %v1027_v34 = vsel %vm1022_vm2, %v7483_v44, %v7502_v36  ;;  %v7867_v4 = vld [vmem:[%s11645_s4 + $0x3c4] ss:$12 sps:$4 sm:$0xff]   ;;  %v1077_v44 = vmax.f32 %v936_v62, %v1032_v29  ;;  %v7869_v31 = vld [vmem:[%s11645_s4 + $0x1e8] ss:$12 sps:$4 sm:$0xff]  }
 0x196   : > { %2155 = vmatmul.mubr.bf16.gmra.mxu0 %v8918_v16  ;;  %2179 = vmatprep.subr.bf16.mxu1 %v7832_v54  ;;  %v7517_v54 = vunpack.i.l.bf16 %v7516_v48  ;;  %v1071_v19 = vmax.f32 %v930_v41, %v1027_v34  ;;  %v7870_v41 = vld [vmem:[%s11645_s4 + $0x3b0] ss:$12 sps:$4 sm:$0xff]   ;;  %v7875_v36 = vld [vmem:[%s11645_s4 + $0x1b8] ss:$12 sps:$4 sm:$0xff]  }
 0x197   : > { %7036 = vmatpush3.bf16.msra.mxu0 %v7829_v57  ;;  %2250 = vmatprep.mubr.bf16.mxu0 %v8756_v5  ;;  %v7843_v5 = vld [vmem:[%s11645_s4 + $0xe0] ss:$12 sps:$4 sm:$0xff]   ;;  %v7518_v57 = vunpack.i.h.bf16 %v7516_v48  ;;  %v7872_v62 = vld [vmem:[%s11645_s4 + $0x1d0] ss:$12 sps:$4 sm:$0xff]  }
 0x198   : > { %7037 = vmatprep.subr.bf16.mxu0 %v7833_v55  ;;  %v7868_v55 = vld [vmem:[%s11645_s4 + $0x2a8] ss:$12 sps:$4 sm:$0xff]   ;;  %v1084_v10 = vmax.f32 %v943_v49, %v7517_v54  ;;  %v9052_v43 = vpack.c.bf16 %v1077_v44, %v1071_v19 }
 0x199   : > { %2180 = vmatpush1.bf16.msra.mxu1 %v7830_v42  ;;  %v1090_v63 = vmax.f32 %v949_v58, %v7518_v57  ;;  %v1042_v49 = vsel %vm1022_vm2, %v7513_v17, %v7518_v57  ;;  %v7873_v58 = vld [vmem:[%s11645_s4 + $0x398] ss:$12 sps:$4 sm:$0xff]   ;;  %v7877_v17 = vld [vmem:[%s11645_s4 + $0x260] ss:$12 sps:$4 sm:$0xff]   ;;  %v11647_v42 = vmax.f32 %v8678_v9, 0.0 }
 0x19a   : > { %2183 = vmatprep.subr.bf16.mxu1 %v2054_v8  ;;  %v7879_v9 = vld [vmem:[%s11645_s4 + $0x368] ss:$12 sps:$4 sm:$0xff]  }
 0x19b   : > { %7038 = vmatpush3.bf16.msra.mxu0 %v7834_v20  ;;  %v9058_v30 = vpack.c.bf16 %v1090_v63, %v1084_v10  ;;  %v7880_v20 = vld [vmem:[%s11645_s4 + $0x248] ss:$12 sps:$4 sm:$0xff]  }
 0x19c   : > { %7039 = vmatprep.subr.bf16.mxu0 %v7838_v61  ;;  %v7881_v8 = vld [vmem:[%s11645_s4 + $0x188] ss:$12 sps:$4 sm:$0xff]   ;;  %v7882_v61 = vld [vmem:[%s11645_s4 + $0x350] ss:$12 sps:$4 sm:$0xff]  }
 0x19d   : > { %2184 = vmatpush2.bf16.msra.mxu1 %v2051_v6  ;;  %v7884_v6 = vld [vmem:[%s11645_s4 + $0x320] ss:$12 sps:$4 sm:$0xff]  }
 0x19e   : > { %2185 = vmatprep.subr.bf16.mxu1 %v7842_v23  ;;  %v7888_v23 = vld [vmem:[%s11645_s4 + $0x428] ss:$12 sps:$4 sm:$0xff]  }
 0x19f   : > { %7040 = vmatpush3.bf16.msra.mxu0 %v7839_v1 }
 0x1a0   : > { %7041 = vmatprep.subr.bf16.mxu0 %v7843_v5  ;;  %v7890_v5 = vld [vmem:[%s11645_s4 + $0x3f8] ss:$12 sps:$4 sm:$0xff]  }
 0x1a1   : > { %2186 = vmatpush2.bf16.msra.mxu1 %v7840_v51  ;;  %v7891_v51 = vld [vmem:[%s11645_s4 + $0x3e0] ss:$12 sps:$4 sm:$0xff]  }
 0x1a2   : > { %2187 = vmatprep.subr.bf16.mxu1 %v7847_v39 }
 0x1a3   : > { %7042 = vmatpush3.bf16.msra.mxu0 %v7844_v2  ;;  %v7892_v2 = vld [vmem:[%s11645_s4 + $0x3c8] ss:$12 sps:$4 sm:$0xff]  }
 0x1a4   : > { %7043 = vmatprep.subr.bf16.mxu0 %v7848_v3 }
 0x1a5   : > { %2188 = vmatpush2.bf16.msra.mxu1 %v7845_v21 }
 0x1a6   : > { %2189 = vmatprep.subr.bf16.mxu1 %v7852_v46 }
 0x1a7   : > { %7044 = vmatpush3.bf16.msra.mxu0 %v7849_v45 }
 0x1a8   : > { %7057 = vmatprep.subr.bf16.mxu0 %v7853_v18 }
 0x1a9   : > { %2190 = vmatpush2.bf16.msra.mxu1 %v7850_v28 }
 0x1aa   : > { %2251 = vmatmul.mubr.bf16.vlgmr.msra.gmra.mxu0 %v8752_v25  ;;  %2191 = vmatprep.subr.bf16.mxu1 %v7857_v14  ;;  %v7863_v25 = vld [vmem:[%s11645_s4 + $0x2c0] ss:$12 sps:$4 sm:$0xff]  }
 0x1ab   : > { %2258 = vmatprep.mubr.bf16.mxu0 %v8847_v38  ;;  %7058 = vmatpush3.bf16.msra.mxu0 %v7854_v24  ;;  %v7860_v38 = vld [vmem:[%s11645_s4 + $0x3d8] ss:$12 sps:$4 sm:$0xff]  }
 0x1ac   : > { %7059 = vmatprep.subr.bf16.mxu0 %v7858_v52 }
 0x1ad   : > { %2192 = vmatpush2.bf16.msra.mxu1 %v7855_v32 }
 0x1ae   : > { %2193 = vmatprep.subr.bf16.mxu1 %v7862_v33 }
 0x1af   : > { %7060 = vmatpush3.bf16.msra.mxu0 %v7859_v22 }
 0x1b0   : > { %7061 = vmatprep.subr.bf16.mxu0 %v7863_v25 }
 0x1b1   : > { %2194 = vmatpush2.bf16.msra.mxu1 %v7860_v38 }
 0x1b2   : > { %2259 = vmatmul.mubr.bf16.gmra.mxu0 %v8849_v37  ;;  %2195 = vmatprep.subr.bf16.mxu1 %v7867_v4  ;;  %v11646_v37 = vmax.f32 %v8707_v13, 0.0  ;;  %v7878_v13 = vld [vmem:[%s11645_s4 + $0x1a0] ss:$12 sps:$4 sm:$0xff]  }
 0x1b3   : > { %7062 = vmatpush3.bf16.msra.mxu0 %v7864_v15  ;;  %2299 = vmatprep.mubr.bf16.mxu0 %v8815_v11  ;;  %v1037_v11 = vsel %vm1022_vm2, %v7508_v60, %v7517_v54  ;;  %v7876_v60 = vld [vmem:[%s11645_s4 + $0x380] ss:$12 sps:$4 sm:$0xff]  }
 0x1b4   : > { %7063 = vmatprep.subr.bf16.mxu0 %v7868_v55  ;;  %v1089_v35 = vmax.f32 %v11646_v37, %v1042_v49  ;;  %v1083_v56 = vmax.f32 %v11647_v42, %v1037_v11 }
 0x1b5   : > { %2196 = vmatpush2.bf16.msra.mxu1 %v7865_v26 }
 0x1b6   : > { %2316 = vmatprep.subr.bf16.mxu1 %v8142_v0  ;;  %v1101_v7 = vpack.c.bf16 %v1089_v35, %v1083_v56 }
 0x1b7   : > { %7064 = vmatpush3.bf16.msra.mxu0 %v7869_v31 }
 0x1b8   : > { %7065 = vmatprep.subr.bf16.mxu0 %v7871_v27  ;;  %2198 = vmatmul.mubr.bf16.vlgmr.msra.gmra.mxu1 %v9052_v43 }
 0x1b9   : > { %6835 = vmatprep.mubr.msk.bf16.mxu1 %vm2040_vm3, %v9058_v30  ;;  %2317 = vmatpush1.bf16.msra.mxu1 %v7870_v41 }
 0x1ba   : > { %2318 = vmatprep.subr.bf16.mxu1 %v8142_v0 }
 0x1bb   : > { %7066 = vmatpush3.bf16.msra.mxu0 %v7872_v62 }
 0x1bc   : > { %7067 = vmatprep.subr.bf16.mxu0 %v7874_v47 }
 0x1bd   : > { %2319 = vmatpush1.bf16.msra.mxu1 %v7873_v58 }
 0x1be   : > { %2320 = vmatprep.subr.bf16.mxu1 %v8142_v0 }
 0x1bf   : > { %7068 = vmatpush3.bf16.msra.mxu0 %v7875_v36 }
 0x1c0   : > { %7069 = vmatprep.subr.bf16.mxu0 %v7877_v17  ;;  %2208 = vmatmul.mubr.bf16.gmra.mxu1 %v1101_v7 }
 0x1c1   : > { %2321 = vmatpush1.bf16.msra.mxu1 %v7876_v60  ;;  %6836 = vmatprep.mubr.msk.bf16.mxu1 %vm2040_vm3, %v8879_v50  ;;  %v7883_v50 = vld [vmem:[%s11645_s4 + $0x338] ss:$12 sps:$4 sm:$0xff]  }
 0x1c2   : > { %2322 = vmatprep.subr.bf16.mxu1 %v8142_v0 }
 0x1c3   : > { %7070 = vmatpush3.bf16.msra.mxu0 %v7878_v13 }
 0x1c4   : > { %7071 = vmatprep.subr.bf16.mxu0 %v7880_v20 }
 0x1c5   : > { %2323 = vmatpush1.bf16.msra.mxu1 %v7879_v9 }
 0x1c6   : > { %2324 = vmatprep.subr.bf16.mxu1 %v8142_v0 }
 0x1c7   : > { %7072 = vmatpush3.bf16.msra.mxu0 %v7881_v8 }
 0x1c9   : > { %2325 = vmatpush1.bf16.msra.mxu1 %v7882_v61 }
 0x1ca   : > { %2300 = vmatmul.mubr.bf16.vlgmr.msra.gmra.mxu0 %v8813_v53  ;;  %2326 = vmatprep.subr.bf16.mxu1 %v8142_v0  ;;  %v7885_v53 = vld [vmem:[%s11645_s4 + $0x308] ss:$12 sps:$4 sm:$0xff]  }
 0x1cb   : > { %2307 = vmatprep.mubr.bf16.mxu0 %v8916_v59  ;;  %v7886_v59 = vld [vmem:[%s11645_s4 + $0x458] ss:$12 sps:$4 sm:$0x1f]  }
 0x1cc   : > { %v2057_v1 = vand.u32 %v7886_v59, %v8930_v12  ;;  %v7889_v12 = vld [vmem:[%s11645_s4 + $0x410] ss:$12 sps:$4 sm:$0xff]  }
 0x1cd   : > { %2327 = vmatpush1.bf16.msra.mxu1 %v7883_v50 }
 0x1ce   : > { %2328 = vmatprep.subr.bf16.mxu1 %v8142_v0 }
 0x1d1   : > { %2329 = vmatpush1.bf16.msra.mxu1 %v7884_v6 }
 0x1d2   : > { %2308 = vmatmul.mubr.bf16.gmra.mxu0 %v8918_v16  ;;  %2330 = vmatprep.subr.bf16.mxu1 %v8142_v0  ;;  %v7887_v16 = vld [vmem:[%s11645_s4 + $0x440] ss:$12 sps:$4 sm:$0xff]  }
 0x1d3   : > { %2689 = vmatprep.mubr.bf16.mxu0 %v8142_v0 }
 0x1d5   : > { %2331 = vmatpush1.bf16.msra.mxu1 %v7885_v53 }
 0x1d6   : > { %2334 = vmatprep.subr.bf16.mxu1 %v8142_v0 }
 0x1d9   : > { %2335 = vmatpush2.bf16.msra.mxu1 %v2057_v1 }
 0x1da   : > { %2336 = vmatprep.subr.bf16.mxu1 %v8142_v0 }
 0x1dd   : > { %2337 = vmatpush2.bf16.msra.mxu1 %v7887_v16 }
 0x1de   : > { %2338 = vmatprep.subr.bf16.mxu1 %v8142_v0 }
 0x1e1   : > { %2339 = vmatpush2.bf16.msra.mxu1 %v7888_v23 }
 0x1e2   : > { %2340 = vmatprep.subr.bf16.mxu1 %v8142_v0 }
 0x1e5   : > { %2341 = vmatpush2.bf16.msra.mxu1 %v7889_v12 }
 0x1e6   : > { %2342 = vmatprep.subr.bf16.mxu1 %v8142_v0 }
 0x1e9   : > { %2343 = vmatpush2.bf16.msra.mxu1 %v7890_v5 }
 0x1ea   : > { %2344 = vmatprep.subr.bf16.mxu1 %v8142_v0 }
 0x1ed   : > { %2345 = vmatpush2.bf16.msra.mxu1 %v7891_v51 }
 0x1ee   : > { %2346 = vmatprep.subr.bf16.mxu1 %v8142_v0 }
 0x1f1   : > { %2347 = vmatpush2.bf16.msra.mxu1 %v7892_v2 }
 0x1f4   : > { %2349 = vmatmul.mubr.bf16.vlgmr.msra.gmra.mxu1 %v9052_v43 }
 0x1f5   : > { %6837 = vmatprep.mubr.msk.bf16.mxu1 %vm2040_vm3, %v9058_v30  ;;  %vm3593_vm3 = vcmask 1042432  }
 0x1fc   : > { %2357 = vmatmul.mubr.bf16.gmra.mxu1 %v1101_v7 }
 0x23c   : > { %v2093_v39 = vpop.f32.mrf.mxu1 }
 0x23e   : > { %v2095_v3 = vpop.f32.mrf.mxu1 }
 0x240   : > { %v2097_v45 = vpop.f32.mrf.mxu1 }
 0x242   : > { %v2099_v18 = vpop.f32.mrf.mxu1 }
 0x24a   : > { %v2146_v21 = vpop.f32.mrf.mxu0 }
 0x24b   : > { %v2147_v29 = vadd.f32 %v2146_v21, %v2093_v39 }
 0x24c   : > { %v2148_v46 = vpop.f32.mrf.mxu0 }
 0x24d   : > { %v2149_v4 = vadd.f32 %v2148_v46, %v2095_v3 }
 0x24e   : > { %v2103_v28 = vpop.f32.mrf.mxu1  ;;  %v2150_v24 = vpop.f32.mrf.mxu0 }
 0x24f   : > { %v2151_v34 = vadd.f32 %v2150_v24, %v2097_v45 }
 0x250   : > { %v2105_v14 = vpop.f32.mrf.mxu1  ;;  %v2152_v52 = vpop.f32.mrf.mxu0 }
 0x251   : > { %v2153_v55 = vadd.f32 %v2152_v52, %v2099_v18 }
 0x252   : > { %v2107_v22 = vpop.f32.mrf.mxu1 }
 0x254   : > { %v2109_v25 = vpop.f32.mrf.mxu1 }
 0x256   : > { %v2156_v32 = vpop.f32.mrf.mxu0 }
 0x257   : > { %v2157_v43 = vadd.f32 %v2156_v32, %v2103_v28 }
 0x258   : > { %v2158_v33 = vpop.f32.mrf.mxu0 }
 0x259   : > { %v2159_v49 = vadd.f32 %v2158_v33, %v2105_v14 }
 0x25a   : > { %v2160_v48 = vpop.f32.mrf.mxu0 }
 0x25b   : > { %v2161_v58 = vadd.f32 %v2160_v48, %v2107_v22 }
 0x25c   : > { %v2162_v57 = vpop.f32.mrf.mxu0 }
 0x25d   : > { %v2163_v35 = vadd.f32 %v2162_v57, %v2109_v25 }
 0x26a   : > { %v9157_v19 = vpop.f32.mrf.mxu0 }
 0x26c   : > { %v9165_v11 = vpop.f32.mrf.mxu0 }
 0x26e   : > { %v9176_v53 = vpop.f32.mrf.mxu0 }
 0x270   : > { %v7049_v18 = vpop.f32.mrf.mxu0 }
 0x272   : > { %v7051_v48 = vpop.f32.mrf.mxu0 }
 0x278   : > { %v2199_v38 = vpop.f32.mrf.mxu1 }
 0x279   : > { %v2200_v26 = vadd.f32 %v2199_v38, %v2147_v29 }
 0x27a   : > { %v2201_v15 = vpop.f32.mrf.mxu1 }
 0x27b   : > { %v2202_v63 = vadd.f32 %v2201_v15, %v2149_v4 }
 0x27c   : > { %v2203_v54 = vpop.f32.mrf.mxu1 }
 0x27d   : > { %v2204_v44 = vadd.f32 %v2203_v54, %v2151_v34 }
 0x27e   : > { %v2205_v31 = vpop.f32.mrf.mxu1 }
 0x27f   : > { %v9159_v10 = vpack.c.bf16 %v2204_v44, %v2200_v26  ;;  %v2206_v27 = vadd.f32 %v2205_v31, %v2153_v55  ;;  %v7052_v55 = vpop.f32.mrf.mxu0 }
 0x280   : > { %v2209_v41 = vpop.f32.mrf.mxu1 }
 0x281   : > { %v9161_v62 = vpack.c.bf16 %v2206_v27, %v2202_v63  ;;  %v2544_v30 = vrot.slane %v9159_v10, 6  ;;  %v2373_v47 = vshrl.u32 %v9159_v10, 16  ;;  %v2376_v37 = vshll.u32 %v9159_v10, 16 }
 0x282   : > { %v2211_v36 = vpop.f32.mrf.mxu1  ;;  %v2210_v17 = vadd.f32 %v2209_v41, %v2157_v43  ;;  %v2461_v34 = vrot.slane %v9159_v10, 7  ;;  %v7054_v41 = vpop.f32.mrf.mxu0 }
 0x283   : > { %2553 = vrot.lane.b32.xlu0 %v2544_v30, %s11615_s2  ;;  %v2545_v42 = vrot.slane %v9161_v62, 6  ;;  %v2491_v56 = vrot.slane %v2373_v47, 2  ;;  %v2492_v7 = vrot.slane %v2376_v37, 3  ;;  %v2381_v13 = vshrl.u32 %v9161_v62, 16 }
 0x284   : > { %v2213_v60 = vpop.f32.mrf.mxu1  ;;  %v2384_v20 = vshll.u32 %v9161_v62, 16  ;;  %v2375_v9 = vrot.slane %v2373_v47, 3  ;;  %v2212_v8 = vadd.f32 %v2211_v36, %v2159_v49  ;;  %v2462_v50 = vrot.slane %v9161_v62, 7 }
 0x285   : > { %v2214_v61 = vadd.f32 %v2213_v60, %v2161_v58  ;;  %2555 = vrot.lane.b32.xlu1 %v2545_v42, %s11615_s2  ;;  %v2378_v6 = vrot.slane %v2376_v37, 4  ;;  %v2493_v1 = vor.u32 %v2492_v7, %v2491_v56  ;;  %v2494_v16 = vrot.slane %v2381_v13, 2  ;;  %v7055_v58 = vpop.f32.mrf.mxu0 }
 0x286   : > { %v2215_v59 = vpop.f32.mrf.mxu1  ;;  %v2495_v23 = vrot.slane %v2384_v20, 3  ;;  %v2383_v12 = vrot.slane %v2381_v13, 3  ;;  %v2386_v2 = vrot.slane %v2384_v20, 4 }
 0x287   : > { %v9178_v5 = vpack.c.bf16 %v2214_v61, %v2210_v17  ;;  %v2216_v51 = vadd.f32 %v2215_v59, %v2163_v35  ;;  %2472 = vrot.lane.b32.xlu0 %v2462_v50, %s8146_s3  ;;  %v9181_v39 = vor.u32 %v2378_v6, %v2375_v9  ;;  %v7050_v6 = vadd.f32 %v7049_v18, %v9176_v53 }
 0x288   : > { %v2496_v21 = vor.u32 %v2495_v23, %v2494_v16  ;;  %v9189_v24 = vor.u32 %v2386_v2, %v2383_v12 }
 0x289   : > { %v9183_v3 = vpack.c.bf16 %v2216_v51, %v2212_v8  ;;  %2512 = vrot.lane.b32.xlu1 %v2493_v1, %s11613_s26  ;;  %v2397_v45 = vshrl.u32 %v9178_v5, 16  ;;  %v2400_v46 = vshll.u32 %v9178_v5, 16  ;;  %v2547_v28 = vrot.slane %v9178_v5, 6 }
 0x28a   : > { %v2464_v15 = vrot.slane %v9178_v5, 7  ;;  %v7073_v35 = vpop.f32.mrf.mxu0 }
 0x28b   : > { %2514 = vrot.lane.b32.xlu0 %v2496_v21, %s11613_s26  ;;  %v2500_v14 = vrot.slane %v2397_v45, 2  ;;  %v2501_v52 = vrot.slane %v2400_v46, 3  ;;  %v2406_v22 = vshrl.u32 %v9183_v3, 16  ;;  %v2409_v33 = vshll.u32 %v9183_v3, 16 }
 0x28c   : > { %v2399_v25 = vrot.slane %v2397_v45, 3  ;;  %v2548_v38 = vsel %vm2543_vm5, %v2544_v30, %v2547_v28  ;;  %v2402_v29 = vrot.slane %v2400_v46, 4  ;;  %v2465_v26 = vsel %vm2460_vm6, %v2461_v34, %v2464_v15 }
 0x28d   : > { %v2502_v32 = vor.u32 %v2501_v52, %v2500_v14  ;;  %v2504_v57 = vrot.slane %v2406_v22, 2  ;;  %v2505_v54 = vrot.slane %v2409_v33, 3  ;;  %v2549_v31 = vrot.slane %v9183_v3, 6 }
 0x28e   : > { %v9199_v4 = vor.u32 %v2402_v29, %v2399_v25  ;;  %v2466_v30 = vrot.slane %v9183_v3, 7  ;;  %v2408_v47 = vrot.slane %v2406_v22, 3  ;;  %v2411_v49 = vrot.slane %v2409_v33, 4 }
 0x28f   : > { %2559 = vrot.lane.b32.xlu0 %v2548_v38, %s11615_s2  ;;  %2524 = vrot.lane.b32.xlu1 %v2502_v32, %s11613_s26  ;;  %v2503_v44 = vsel %vm2490_vm7, %v2493_v1, %v2502_v32  ;;  %v2506_v27 = vor.u32 %v2505_v54, %v2504_v57  ;;  %v2550_v43 = vsel %vm2543_vm5, %v2545_v42, %v2549_v31  ;;  %v7074_v42 = vpop.f32.mrf.mxu0 }
 0x290   : > { %v9211_v63 = vsel %vm2371_vm8, %v9181_v39, %v9199_v4  ;;  %v2467_v36 = vsel %vm2460_vm6, %v2462_v50, %v2466_v30  ;;  %v9223_v17 = vor.u32 %v2411_v49, %v2408_v47  ;;  %v7075_v20 = vadd.f32 %v7074_v42, %v7073_v35 }
 0x291   : > { %v2507_v37 = vsel %vm2490_vm7, %v2496_v21, %v2506_v27  ;;  %v7076_v56 = vpop.f32.mrf.mxu0  ;;  %v7047_v50 = vadd.f32 %v9165_v11, %v9157_v19  ;;  %v7053_v14 = vadd.f32 %v7052_v55, %v7051_v48  ;;  %v7056_v32 = vadd.f32 %v7055_v58, %v7054_v41 }
 0x293   : > { %2476 = vrot.lane.b32.xlu0 %v2465_v26, %s8146_s3  ;;  %2518 = vrot.lane.b32.xlu1 %v2503_v44, %s11613_s26  ;;  %v7077_v60 = vpop.f32.mrf.mxu0  ;;  %v2302_v1 = vadd.f32 %v7075_v20, %v7047_v50  ;;  %v2856_v20 = vld [vmem:[%s11584_s7 + $0x8] sm:$0xff]  ;;  %v2859_v50 = vld [vmem:[%s11584_s7 + $0x20] sm:$0xff] }
 0x294   : > { %v7078_v9 = vadd.f32 %v7077_v60, %v7076_v56  ;;  %v2413_v56 = vsel %vm2371_vm8, %v9189_v24, %v9223_v17 }
 0x295   : > { %v7079_v7 = vpop.f32.mrf.mxu0 }
 0x296   : > { %v2305_v16 = vadd.f32 %v7078_v9, %v7050_v6  ;;  %v2795_v9 = vld [vmem:[%s11648_s6 + $0x18] sm:$0xff]  ;;  %v2797_v6 = vld [vmem:[%s11648_s6 + $0x28] sm:$0xff] }
 0x297   : > { %2561 = vrot.lane.b32.xlu0 %v2550_v43, %s11615_s2  ;;  %2526 = vrot.lane.b32.xlu1 %v2506_v27, %s11613_s26  ;;  %v7080_v13 = vpop.f32.mrf.mxu0 }
 0x298   : > { %v7081_v45 = vadd.f32 %v7080_v13, %v7079_v7 }
 0x299   : > { %v7082_v8 = vpop.f32.mrf.mxu0 }
 0x29a   : > { %v2310_v18 = vadd.f32 %v7081_v45, %v7053_v14 }
 0x29b   : > { %2478 = vrot.lane.b32.xlu0 %v2467_v36, %s8146_s3  ;;  %2520 = vrot.lane.b32.xlu1 %v2507_v37, %s11613_s26  ;;  %v7083_v23 = vpop.f32.mrf.mxu0 }
 0x29c   : > { %v7084_v46 = vadd.f32 %v7083_v23, %v7082_v8  ;;  %v2796_v8 = vld [vmem:[%s11648_s6 + $0x20] sm:$0xff] }
 0x29e   : > { %v2313_v33 = vadd.f32 %v7084_v46, %v7056_v32 }
 0x29f   : > { %2437 = vrot.lane.b32.xlu0 %v9223_v17, %s8143_s23  ;;  %v2792_v17 = vld [vmem:[%s11648_s6] sm:$0xff] }
 0x2b4   : > { %v2350_v61 = vpop.f32.mrf.mxu1 }
 0x2b5   : > { %v2351_v51 = vadd.f32 %v2350_v61, %v2302_v1  ;;  %v2858_v61 = vld [vmem:[%s11584_s7 + $0x18] sm:$0xff]  ;;  %v2860_v1 = vld [vmem:[%s11584_s7 + $0x28] sm:$0xff] }
 0x2b6   : > { %v2352_v59 = vpop.f32.mrf.mxu1 }
 0x2b7   : > { %v2798_v59 = vld [vmem:[%s11648_s6 + $0x30] sm:$0x3] }
 0x2b8   : > { %v2353_v12 = vpop.f32.mrf.mxu1 }
 0x2b9   : > { %v2354_v2 = vadd.f32 %v2353_v12, %v2305_v16  ;;  %v2861_v16 = vld [vmem:[%s11584_s7 + $0x30] sm:$0x3] }
 0x2ba   : > { %v2355_v21 = vpop.f32.mrf.mxu1 }
 0x2bb   : > { %v9230_v28 = vpack.c.bf16 %v2354_v2, %v2351_v51 }
 0x2bc   : > { %v2358_v52 = vpop.f32.mrf.mxu1 }
 0x2bd   : > { %v2546_v22 = vrot.slane %v9230_v28, 6  ;;  %v2389_v19 = vshrl.u32 %v9230_v28, 16  ;;  %v2392_v11 = vshll.u32 %v9230_v28, 16  ;;  %v2359_v29 = vadd.f32 %v2358_v52, %v2310_v18 }
 0x2be   : > { %v2360_v53 = vpop.f32.mrf.mxu1  ;;  %v2463_v47 = vrot.slane %v9230_v28, 7 }
 0x2bf   : > { %2557 = vrot.lane.b32.xlu0 %v2546_v22, %s11615_s2  ;;  %v2497_v25 = vrot.slane %v2389_v19, 2  ;;  %v2498_v38 = vrot.slane %v2392_v11, 3  ;;  %v2391_v60 = vrot.slane %v2389_v19, 3  ;;  %v2394_v7 = vrot.slane %v2392_v11, 4 }
 0x2c0   : > { %v2361_v15 = vpop.f32.mrf.mxu1 }
 0x2c1   : > { %v2362_v57 = vadd.f32 %v2361_v15, %v2313_v33  ;;  %v2499_v54 = vor.u32 %v2498_v38, %v2497_v25  ;;  %v2646_v33 = vsel %vm2588_vm9, 4294967295, %v11617_v40 }
 0x2c2   : > { %v2363_v48 = vpop.f32.mrf.mxu1  ;;  %v9319_v38 = vsel %vm2645_vm10, %v2646_v33, 0  ;;  %v7905_v33 = vld [vmem:[%s11585_s8 + $0x54] ss:$8 sps:$4 sm:$0xff]   ;;  %vm6310_vm10 = vcmask 195712  }
 0x2c3   : > { %v9236_v55 = vpack.c.bf16 %v2362_v57, %v2359_v29  ;;  %2516 = vrot.lane.b32.xlu1 %v2499_v54, %s11613_s26 }
 0x2c5   : > { %v2551_v26 = vrot.slane %v9236_v55, 6  ;;  %v2415_v44 = vshrl.u32 %v9236_v55, 16  ;;  %v2418_v31 = vshll.u32 %v9236_v55, 16  ;;  %v2468_v49 = vrot.slane %v9236_v55, 7 }
 0x2c7   : > { %v2552_v27 = vsel %vm2543_vm5, %v2546_v22, %v2551_v26  ;;  %v2508_v41 = vrot.slane %v2415_v44, 2  ;;  %v2509_v43 = vrot.slane %v2418_v31, 3  ;;  %v2417_v36 = vrot.slane %v2415_v44, 3 }
 0x2c8   : > { %2563 = vrot.lane.b32.xlu1 %v2552_v27, %s11615_s2  ;;  %v2420_v37 = vrot.slane %v2418_v31, 4  ;;  %v2469_v35 = vsel %vm2460_vm6, %v2463_v47, %v2468_v49 }
 0x2c9   : > { %v2510_v30 = vor.u32 %v2509_v43, %v2508_v41 }
 0x2ca   : > { %v2421_v42 = vor.u32 %v2420_v37, %v2417_v36 }
 0x2cb   : > { %2528 = vrot.lane.b32.xlu0 %v2510_v30, %s11613_s26  ;;  %v2511_v58 = vsel %vm2490_vm7, %v2499_v54, %v2510_v30  ;;  %vm3777_vm7 = vcmask 998400  }
 0x2cc   : > { %2474 = vrot.lane.b32.xlu1 %v2463_v47, %s8146_s3 }
 0x2cf   : > { %2522 = vrot.lane.b32.xlu0 %v2511_v58, %s11613_s26 }
 0x2d0   : > { %2480 = vrot.lane.b32.xlu1 %v2469_v35, %s8146_s3 }
 0x2d3   : > { %2435 = vrot.lane.b32.xlu0 %v9199_v4, %s8143_s23  ;;  %v2395_v4 = vor.u32 %v2394_v7, %v2391_v60  ;;  %v7929_v7 = vld [vmem:[%s11585_s8 + $0xe4] ss:$8 sps:$4 sm:$0xff]  }
 0x2d4   : > { %2439 = vrot.lane.b32.xlu1 %v2421_v42, %s8143_s23 }
 0x2d5   : > { %v2422_v13 = vsel %vm2371_vm8, %v2395_v4, %v2421_v42  ;;  %vm6091_vm8 = vcmask 351232  }
 0x2d7   : > { %2431 = vrot.lane.b32.xlu0 %v2413_v56, %s8143_s23 }
 0x2d8   : > { %2470 = vrot.lane.b32.xlu1 %v2461_v34, %s8146_s3  ;;  %v2855_v34 = vld [vmem:[%s11584_s7] sm:$0xff] }
 0x2db   : > { %2429 = vrot.lane.b32.xlu0 %v9211_v63, %s8143_s23  ;;  %v2794_v63 = vld [vmem:[%s11648_s6 + $0x10] sm:$0xff] }
 0x2dc   : > { %2425 = vrot.lane.b32.xlu1 %v9189_v24, %s8143_s23  ;;  %v2793_v24 = vld [vmem:[%s11648_s6 + $0x8] sm:$0xff] }
 0x2df   : > { %2427 = vrot.lane.b32.xlu0 %v2395_v4, %s8143_s23 }
 0x2e0   : > { %2433 = vrot.lane.b32.xlu1 %v2422_v13, %s8143_s23 }
 0x2e3   : > { %2801 = vperm.xlu0 %7457, %v2792_v17  }
 0x2e4   : > { %2423 = vrot.lane.b32.xlu1 %v9181_v39, %s8143_s23  ;;  %v2857_v39 = vld [vmem:[%s11584_s7 + $0x10] sm:$0xff] }
 0x2e7   : > { %2864 = vperm.xlu0 %7457, %v2855_v34  }
 0x2e8   : > { %2806 = vperm.xlu1 %7458, %v2793_v24  }
 0x2eb   : > { %2811 = vperm.xlu0 %7457, %v2794_v63  }
 0x2ec   : > { %2869 = vperm.xlu1 %7458, %v2856_v20  }
 0x2ef   : > { %2874 = vperm.xlu0 %7457, %v2857_v39  }
 0x2f0   : > { %2816 = vperm.xlu1 %7458, %v2795_v9  }
 0x2f3   : > { %2821 = vperm.xlu0 %7457, %v2796_v8  }
 0x2f4   : > { %2879 = vperm.xlu1 %7458, %v2858_v61  }
 0x2f5   : > { %v2554_v23 = vpop.permute.xlu0 %2553 }
 0x2f7   : > { %2884 = vperm.xlu0 %7457, %v2859_v50   ;;  %v2556_v51 = vpop.permute.xlu1 %2555 }
 0x2f8   : > { %2826 = vperm.xlu1 %7458, %v2797_v6   ;;  %v2566_v30 = vsel %vm2565_vm11, %v2554_v23, %v2556_v51 }
 0x2f9   : > { %v2473_v12 = vpop.permute.xlu0 %2472 }
 0x2fb   : > { %2831 = vperm.xlu0 %7457, %v2798_v59   ;;  %v2513_v21 = vpop.permute.xlu1 %2512 }
 0x2fc   : > { %2889 = vperm.xlu1 %7458, %v2860_v1  }
 0x2fd   : > { %v2515_v2 = vpop.permute.xlu0 %2514 }
 0x2fe   : > { %v2531_v34 = vsel %vm2530_vm12, %v2513_v21, %v2515_v2 }
 0x300   : > { %2894 = vperm.xlu1 %7458, %v2861_v16  }
 0x301   : > { %v2560_v45 = vpop.permute.xlu0 %2559  ;;  %v2525_v46 = vpop.permute.xlu1 %2524 }
 0x305   : > { %v2477_v14 = vpop.permute.xlu0 %2476  ;;  %v2519_v52 = vpop.permute.xlu1 %2518 }
 0x309   : > { %v2562_v32 = vpop.permute.xlu0 %2561  ;;  %v2527_v22 = vpop.permute.xlu1 %2526 }
 0x30a   : > { %v2568_v15 = vsel %vm2565_vm11, %v2560_v45, %v2562_v32  ;;  %v2535_v41 = vsel %vm2530_vm12, %v2525_v46, %v2527_v22 }
 0x30b   : > { %v2649_v48 = vand.u32 %v9319_v38, %v2568_v15  ;;  %v2596_v58 = vsel %vm2543_vm5, %v2535_v41, %v2566_v30  ;;  %v7903_v15 = vld [vmem:[%s11585_s8 + $0x50] ss:$8 sps:$4 sm:$0xff]  }
 0x30c   : > { %v7909_v41 = vld [vmem:[%s11585_s8 + $0x30] ss:$8 sps:$4 sm:$0xff]  }
 0x30d   : > { %v2479_v19 = vpop.permute.xlu0 %2478  ;;  %v2521_v11 = vpop.permute.xlu1 %2520  ;;  %v7942_v30 = vld [vmem:[%s11585_s8 + $0x130] ss:$8 sps:$4 sm:$0xff]  }
 0x30e   : > { %v2533_v60 = vsel %vm2530_vm12, %v2519_v52, %v2521_v11  ;;  %v2485_v4 = vsel %vm2482_vm13, %v2477_v14, %v2479_v19 }
 0x30f   : > { %v2590_v39 = vsel %vm9344_vm14, %v2485_v4, %v2531_v34  ;;  %v7927_v4 = vld [vmem:[%s11585_s8 + $0xe0] ss:$8 sps:$4 sm:$0xff]   ;;  %v7941_v34 = vld [vmem:[%s11585_s8 + $0xc4] ss:$8 sps:$4 sm:$0xff]  }
 0x311   : > { %v2438_v53 = vpop.permute.xlu0 %2437 }
 0x331   : > { %v9317_v25 = vpop.permute.xlu0 %2557 }
 0x332   : > { %v2567_v44 = vsel %vm2565_vm11, %v2556_v51, %v9317_v25 }
 0x335   : > { %v9313_v18 = vpop.permute.xlu1 %2516 }
 0x336   : > { %v2532_v42 = vsel %vm2530_vm12, %v2515_v2, %v9313_v18 }
 0x33a   : > { %v2564_v29 = vpop.permute.xlu1 %2563 }
 0x33b   : > { %v2569_v57 = vsel %vm2565_vm11, %v2562_v32, %v2564_v29  ;;  %v2655_v52 = vand.u32 %v9319_v38, %v2564_v29  ;;  %v7893_v32 = vld [vmem:[%s11653_s5] sm:$0xff]   ;;  %v7932_v29 = vld [vmem:[%s11585_s8 + $0x154] ss:$8 sps:$4 sm:$0xff]  }
 0x33c   : > { %v2652_v54 = vand.u32 %v9319_v38, %v2569_v57  ;;  %v7926_v38 = vld [vmem:[%s11585_s8 + $0x164] ss:$8 sps:$4 sm:$0xff]  }
 0x33d   : > { %v9325_v26 = vpop.permute.xlu0 %2528  ;;  %v7908_v57 = vld [vmem:[%s11585_s8 + $0x44] ss:$8 sps:$4 sm:$0xff]  }
 0x33e   : > { %v2536_v31 = vsel %vm2530_vm12, %v2527_v22, %v9325_v26  ;;  %2657 = vmatprep.subr.bf16.mxu0 %v2652_v54  ;;  %v9331_v27 = vpop.permute.xlu1 %2474  ;;  %v7930_v54 = vld [vmem:[%s11585_s8 + $0x150] ss:$8 sps:$4 sm:$0xff]  }
 0x33f   : > { %2658 = vmatpush1.bf16.msra.mxu0 %v2649_v48  ;;  %v2600_v43 = vsel %vm2543_vm5, %v2536_v31, %v2567_v44  ;;  %v2484_v63 = vsel %vm2482_vm13, %v2473_v12, %v9331_v27  ;;  %v7938_v48 = vld [vmem:[%s11585_s8 + $0x144] ss:$8 sps:$4 sm:$0xff]   ;;  %v7911_v44 = vld [vmem:[%s11585_s8 + $0x34] ss:$8 sps:$4 sm:$0xff]   ;;  %v7936_v31 = vld [vmem:[%s11585_s8 + $0x140] ss:$8 sps:$4 sm:$0xff]  }
 0x340   : > { %2659 = vmatprep.subr.bf16.mxu0 %v2600_v43  ;;  %v7914_v43 = vld [vmem:[%s11585_s8 + $0x24] ss:$8 sps:$4 sm:$0xff]  }
 0x341   : > { %v2523_v47 = vpop.permute.xlu0 %2522 }
 0x342   : > { %v2481_v49 = vpop.permute.xlu1 %2480  ;;  %v2534_v36 = vsel %vm2530_vm12, %v2521_v11, %v2523_v47 }
 0x343   : > { %2660 = vmatpush1.bf16.msra.mxu0 %v2596_v58  ;;  %v2486_v37 = vsel %vm2482_vm13, %v2479_v19, %v2481_v49  ;;  %v7896_v19 = vld [vmem:[%s11653_s5 + $0x18] ss:$0 sps:$4 sm:$0x11]   ;;  %v7917_v58 = vld [vmem:[%s11585_s8 + $0x14] ss:$8 sps:$4 sm:$0xff]  }
 0x344   : > { %2661 = vmatprep.subr.bf16.mxu0 %v2534_v36  ;;  %v2591_v13 = vsel %vm9344_vm14, %v2486_v37, %v2532_v42  ;;  %v7948_v36 = vld [vmem:[%s11585_s8 + $0x120] ss:$8 sps:$4 sm:$0xff]   ;;  %v7915_v37 = vld [vmem:[%s11585_s8 + $0x10] ss:$8 sps:$4 sm:$0xff]  }
 0x345   : > { %v2436_v35 = vpop.permute.xlu0 %2435  ;;  %v7918_v42 = vld [vmem:[%s11585_s8] ss:$8 sps:$4 sm:$0xff]  }
 0x346   : > { %v2440_v56 = vpop.permute.xlu1 %2439  ;;  %v2446_v61 = vsel %vm1022_vm2, %v2436_v35, %v2438_v53  ;;  %v7920_v35 = vld [vmem:[%s11585_s8 + $0x4] ss:$8 sps:$4 sm:$0xff]  }
 0x347   : > { %2662 = vmatpush1.bf16.msra.mxu0 %v2533_v60  ;;  %v2447_v17 = vsel %vm1022_vm2, %v2438_v53, %v2440_v56  ;;  %v2586_v22 = vsel %vm2460_vm6, %v2440_v56, %v9331_v27  ;;  %v7899_v53 = vld [vmem:[%s11585_s8 + $0x74] ss:$8 sps:$4 sm:$0xff]   ;;  %v7921_v60 = vld [vmem:[%s11585_s8 + $0xf0] ss:$8 sps:$4 sm:$0xff]  }
 0x348   : > { %2663 = vmatprep.subr.bf16.mxu0 %v2591_v13  ;;  %v2582_v8 = vsel %vm2460_vm6, %v2447_v17, %v2484_v63  ;;  %3359 = vmatprep.subr.bf16.mxu1 %v7899_v53  ;;  %v7944_v27 = vld [vmem:[%s11585_s8 + $0x134] ss:$8 sps:$4 sm:$0xff]   ;;  %v7933_v17 = vld [vmem:[%s11585_s8 + $0xd0] ss:$8 sps:$4 sm:$0xff]  }
 0x349   : > { %v2432_v24 = vpop.permute.xlu0 %2431  ;;  %v7923_v56 = vld [vmem:[%s11585_s8 + $0xf4] ss:$8 sps:$4 sm:$0xff]   ;;  %v7954_v53 = vld [vmem:[%s11585_s8 + $0x110] ss:$8 sps:$4 sm:$0xff]  }
 0x34a   : > { %v2471_v20 = vpop.permute.xlu1 %2470  ;;  %v7935_v13 = vld [vmem:[%s11585_s8 + $0xd4] ss:$8 sps:$4 sm:$0xff]  }
 0x34b   : > { %v2483_v9 = vsel %vm2482_vm13, %v2471_v20, %v2473_v12  ;;  %2664 = vmatpush1.bf16.msra.mxu0 %v2590_v39  ;;  %v7947_v63 = vld [vmem:[%s11585_s8 + $0xb4] ss:$8 sps:$4 sm:$0xff]   ;;  %v7945_v20 = vld [vmem:[%s11585_s8 + $0xb0] ss:$8 sps:$4 sm:$0xff]  }
 0x34c   : > { %2665 = vmatprep.subr.bf16.mxu0 %v2582_v8  ;;  %v2578_v59 = vsel %vm2460_vm6, %v2446_v61, %v2483_v9 }
 0x34d   : > { %v2430_v50 = vpop.permute.xlu0 %2429 }
 0x34e   : > { %v2426_v6 = vpop.permute.xlu1 %2425  ;;  %v2444_v2 = vsel %vm1022_vm2, %v2430_v50, %v2432_v24 }
 0x34f   : > { %2666 = vmatpush1.bf16.msra.mxu0 %v2578_v59 }
 0x351   : > { %v2428_v1 = vpop.permute.xlu0 %2427 }
 0x352   : > { %v2443_v16 = vsel %vm1022_vm2, %v2426_v6, %v2428_v1  ;;  %v2434_v23 = vpop.permute.xlu1 %2433  ;;  %v2574_v11 = vsel %vm9364_vm15, %v9236_v55, %v2428_v1  ;;  %v7897_v55 = vld [vmem:[%s11585_s8 + $0x70] ss:$8 sps:$4 sm:$0xff]  }
 0x353   : > { %v2445_v12 = vsel %vm1022_vm2, %v2432_v24, %v2434_v23  ;;  %v2573_v21 = vsel %vm9364_vm15, %v9183_v3, %v2443_v16  ;;  %v2604_v3 = vsel %vm2543_vm5, %v9325_v26, %v9317_v25  ;;  %3360 = vmatpush1.bf16.msra.mxu1 %v7897_v55  ;;  %v7924_v25 = vld [vmem:[%s11585_s8 + $0x160] ss:$8 sps:$4 sm:$0xff]   ;;  %v7953_v55 = vld [vmem:[%s11585_s8 + $0xa4] ss:$8 sps:$4 sm:$0xff]  }
 0x354   : > { %2667 = vmatprep.subr.bf16.mxu0 %v2445_v12  ;;  %v7906_v26 = vld [vmem:[%s11585_s8 + $0x40] ss:$8 sps:$4 sm:$0xff]  }
 0x355   : > { %2668 = vmatpush1.bf16.msra.mxu0 %v2444_v2  ;;  %v7939_v24 = vld [vmem:[%s11585_s8 + $0xc0] ss:$8 sps:$4 sm:$0xff]  }
 0x356   : > { %v2424_v45 = vpop.permute.xlu1 %2423  ;;  %2669 = vmatprep.subr.bf16.mxu0 %v2573_v21 }
 0x357   : > { %v2442_v46 = vsel %vm1022_vm2, %v2424_v45, %v2426_v6 }
 0x358   : > { %v2572_v14 = vsel %vm9364_vm15, %v9178_v5, %v2442_v46  ;;  %v7895_v5 = vld [vmem:[%s11653_s5 + $0x10] sm:$0xff]   ;;  %vm6345_vm15 = vcmask 523712  }
 0x359   : > { %2670 = vmatpush1.bf16.msra.mxu0 %v2572_v14 }
 0x35a   : > { %2671 = vmatprep.subr.bf16.mxu0 %v9161_v62  ;;  %v7894_v62 = vld [vmem:[%s11653_s5 + $0x8] sm:$0xff]  }
 0x35d   : > { %2672 = vmatpush1.bf16.msra.mxu0 %v9159_v10  ;;  %v2592_v10 = vsel %vm9344_vm14, %v2481_v49, %v9313_v18  ;;  %v7900_v18 = vld [vmem:[%s11585_s8 + $0x60] ss:$8 sps:$4 sm:$0xff]   ;;  %vm6338_vm14 = vcmask 458112  }
 0x35e   : > { %7304 = vmatprep.subr.bf16.mxu0 %v2655_v52  ;;  %v7912_v49 = vld [vmem:[%s11585_s8 + $0x20] ss:$8 sps:$4 sm:$0xff]   ;;  %v2802_v59 = vpop.permute.xlu0 %2801 }
 0x360   : > { %6842 = vmatmul.mubr.msk.bf16.vlgmr.msra.gmra.mxu0 %vm2530_vm12, %v7893_v32 }
 0x361   : > { %7305 = vmatpush3.bf16.msra.mxu0 %v2655_v52  ;;  %2699 = vmatprep.mubr.bf16.mxu0 %v8142_v0 }
 0x362   : > { %7306 = vmatprep.subr.bf16.mxu0 %v2604_v3  ;;  %v2865_v12 = vpop.permute.xlu0 %2864 }
 0x365   : > { %7307 = vmatpush3.bf16.msra.mxu0 %v2604_v3 }
 0x366   : > { %7308 = vmatprep.subr.bf16.mxu0 %v2523_v47  ;;  %v2812_v14 = vpop.permute.xlu0 %2811 }
 0x368   : > { %6843 = vmatmul.mubr.msk.bf16.gmra.mxu0 %vm2530_vm12, %v7894_v62 }
 0x369   : > { %7309 = vmatpush3.bf16.msra.mxu0 %v2523_v47  ;;  %2709 = vmatprep.mubr.bf16.mxu0 %v8142_v0  ;;  %v7950_v47 = vld [vmem:[%s11585_s8 + $0x124] ss:$8 sps:$4 sm:$0xff]  }
 0x36a   : > { %7310 = vmatprep.subr.bf16.mxu0 %v2592_v10 }
 0x36d   : > { %7311 = vmatpush3.bf16.msra.mxu0 %v2592_v10  ;;  %v9539_v10 = vpop.permute.xlu0 %2874 }
 0x36e   : > { %7312 = vmatprep.subr.bf16.mxu0 %v2586_v22 }
 0x370   : > { %6844 = vmatmul.mubr.msk.bf16.gmra.mxu0 %vm2530_vm12, %v7895_v5 }
 0x371   : > { %7313 = vmatpush3.bf16.msra.mxu0 %v2586_v22  ;;  %2719 = vmatprep.mubr.bf16.mxu0 %v8142_v0 }
 0x372   : > { %7314 = vmatprep.subr.bf16.mxu0 %v2434_v23 }
 0x375   : > { %7315 = vmatpush3.bf16.msra.mxu0 %v2434_v23  ;;  %v2807_v23 = vpop.permute.xlu1 %2806 }
 0x376   : > { %7316 = vmatprep.subr.bf16.mxu0 %v2574_v11 }
 0x378   : > { %6845 = vmatmul.mubr.msk.bf16.gmra.mxu0 %vm2530_vm12, %v7896_v19 }
 0x379   : > { %7317 = vmatpush3.bf16.msra.mxu0 %v2574_v11  ;;  %7320 = vmatprep.mubr.msk.bf16.mxu0 %vm2530_vm12, %v7893_v32  ;;  %v2870_v45 = vpop.permute.xlu1 %2869  ;;  %v7951_v11 = vld [vmem:[%s11585_s8 + $0xa0] ss:$8 sps:$4 sm:$0xff]  }
 0x37a   : > { %7318 = vmatprep.subr.bf16.mxu0 %v9230_v28 }
 0x37d   : > { %7319 = vmatpush3.bf16.msra.mxu0 %v9230_v28  ;;  %v7902_v28 = vld [vmem:[%s11585_s8 + $0x64] ss:$8 sps:$4 sm:$0xff]   ;;  %v2817_v3 = vpop.permute.xlu1 %2816 }
 0x37e   : > { %3361 = vmatprep.subr.bf16.mxu1 %v7902_v28  ;;  %3432 = vmatprep.subr.bf16.mxu0 %v7926_v38 }
 0x37f   : > { %3362 = vmatpush1.bf16.msra.mxu1 %v7900_v18  ;;  %v7956_v18 = vld [vmem:[%s11585_s8 + $0x114] ss:$8 sps:$4 sm:$0xff]  }
 0x380   : > { %7321 = vmatmul.mubr.msk.bf16.vlgmr.msra.gmra.mxu0 %vm2530_vm12, %v7894_v62  ;;  %3363 = vmatprep.subr.bf16.mxu1 %v7905_v33 }
 0x381   : > { %7324 = vmatprep.mubr.msk.bf16.mxu0 %vm2530_vm12, %v7895_v5  ;;  %3433 = vmatpush1.bf16.msra.mxu0 %v7924_v25  ;;  %v2880_v33 = vpop.permute.xlu1 %2879 }
 0x382   : > { %3434 = vmatprep.subr.bf16.mxu0 %v7932_v29 }
 0x383   : > { %3364 = vmatpush1.bf16.msra.mxu1 %v7903_v15 }
 0x384   : > { %3365 = vmatprep.subr.bf16.mxu1 %v7908_v57 }
 0x385   : > { %3435 = vmatpush1.bf16.msra.mxu0 %v7930_v54  ;;  %v2822_v54 = vpop.permute.xlu0 %2821 }
 0x386   : > { %3436 = vmatprep.subr.bf16.mxu0 %v7938_v48 }
 0x387   : > { %3366 = vmatpush1.bf16.msra.mxu1 %v7906_v26 }
 0x388   : > { %7325 = vmatmul.mubr.msk.bf16.gmra.mxu0 %vm2530_vm12, %v7896_v19  ;;  %3367 = vmatprep.subr.bf16.mxu1 %v7911_v44  ;;  %v7959_v44 = vld [vmem:[%s11585_s8 + $0x94] ss:$8 sps:$4 sm:$0xff]  }
 0x389   : > { %3462 = vmatprep.mubr.bf16.mxu0 %v8142_v0  ;;  %3437 = vmatpush1.bf16.msra.mxu0 %v7936_v31 }
 0x38a   : > { %3438 = vmatprep.subr.bf16.mxu0 %v7944_v27 }
 0x38b   : > { %3368 = vmatpush1.bf16.msra.mxu1 %v7909_v41 }
 0x38c   : > { %3369 = vmatprep.subr.bf16.mxu1 %v7914_v43  ;;  %v7957_v43 = vld [vmem:[%s11585_s8 + $0x90] ss:$8 sps:$4 sm:$0xff]  }
 0x38d   : > { %3439 = vmatpush1.bf16.msra.mxu0 %v7942_v30 }
 0x38e   : > { %3440 = vmatprep.subr.bf16.mxu0 %v7950_v47 }
 0x38f   : > { %3370 = vmatpush1.bf16.msra.mxu1 %v7912_v49 }
 0x390   : > { %3371 = vmatprep.subr.bf16.mxu1 %v7917_v58 }
 0x391   : > { %3441 = vmatpush1.bf16.msra.mxu0 %v7948_v36  ;;  %v7962_v36 = vld [vmem:[%s11585_s8 + $0x104] ss:$8 sps:$4 sm:$0xff]  }
 0x392   : > { %3442 = vmatprep.subr.bf16.mxu0 %v7956_v18 }
 0x393   : > { %3372 = vmatpush1.bf16.msra.mxu1 %v7915_v37 }
 0x394   : > { %3373 = vmatprep.subr.bf16.mxu1 %v7920_v35 }
 0x395   : > { %3443 = vmatpush1.bf16.msra.mxu0 %v7954_v53 }
 0x396   : > { %3444 = vmatprep.subr.bf16.mxu0 %v7962_v36 }
 0x397   : > { %3374 = vmatpush1.bf16.msra.mxu1 %v7918_v42 }
 0x398   : > { %3375 = vmatprep.subr.bf16.mxu1 %v7923_v56 }
 0x39b   : > { %3376 = vmatpush2.bf16.msra.mxu1 %v7921_v60  ;;  %v7960_v60 = vld [vmem:[%s11585_s8 + $0x100] ss:$8 sps:$4 sm:$0xff]  }
 0x39c   : > { %3377 = vmatprep.subr.bf16.mxu1 %v7929_v7  ;;  %v2827_v7 = vpop.permute.xlu1 %2826  ;;  %3445 = vmatpush1.bf16.msra.mxu0 %v7960_v60 }
 0x39f   : > { %3378 = vmatpush2.bf16.msra.mxu1 %v7927_v4 }
 0x3a0   : > { %3379 = vmatprep.subr.bf16.mxu1 %v7935_v13 }
 0x3a3   : > { %3380 = vmatpush2.bf16.msra.mxu1 %v7933_v17 }
 0x3a4   : > { %3381 = vmatprep.subr.bf16.mxu1 %v7941_v34  ;;  %v7963_v34 = vld [vmem:[%s11585_s8 + $0x80] ss:$8 sps:$4 sm:$0xff]  }
 0x3a7   : > { %3382 = vmatpush2.bf16.msra.mxu1 %v7939_v24  ;;  %v7965_v24 = vld [vmem:[%s11585_s8 + $0x84] ss:$8 sps:$4 sm:$0xff]  }
 0x3a8   : > { %3383 = vmatprep.subr.bf16.mxu1 %v7947_v63 }
 0x3ab   : > { %3384 = vmatpush2.bf16.msra.mxu1 %v7945_v20 }
 0x3ac   : > { %3385 = vmatprep.subr.bf16.mxu1 %v7953_v55 }
 0x3af   : > { %3386 = vmatpush2.bf16.msra.mxu1 %v7951_v11 }
 0x3b0   : > { %3387 = vmatprep.subr.bf16.mxu1 %v7959_v44 }
 0x3b3   : > { %3388 = vmatpush2.bf16.msra.mxu1 %v7957_v43 }
 0x3b4   : > { %3389 = vmatprep.subr.bf16.mxu1 %v7965_v24 }
 0x3b7   : > { %3390 = vmatpush2.bf16.msra.mxu1 %v7963_v34 }
 0x3b8   : > { %4416 = vmatprep.subr.bf16.mxu1 %v8142_v0 }
 0x420   : > { %v2691_v39 = vpop.f32.mrf.mxu0 }
 0x421   : > { %v2834_v25 = vmul.f32 %v2802_v59, %v2691_v39 }
 0x422   : > { %v2693_v9 = vpop.f32.mrf.mxu0 }
 0x423   : > { %v2835_v22 = vmul.f32 %v2802_v59, %v2693_v9  ;;  %v9565_v30 = vadd.f32 %v2865_v12, %v2834_v25 }
 0x424   : > { %v2695_v8 = vpop.f32.mrf.mxu0 }
 0x425   : > { %v2837_v28 = vmul.f32 %v2807_v23, %v2695_v8  ;;  %v9553_v29 = vadd.f32 %v2865_v12, %v2835_v22  ;;  %v2885_v8 = vpop.permute.xlu0 %2884 }
 0x426   : > { %v2697_v61 = vpop.f32.mrf.mxu0 }
 0x427   : > { %v2838_v38 = vmul.f32 %v2807_v23, %v2697_v61  ;;  %v9558_v31 = vadd.f32 %v2870_v45, %v2837_v28  ;;  %v2919_v37 = vmax.f32 %v9553_v29, 0.0  ;;  %v2918_v61 = vmax.f32 %v9565_v30, 0.0 }
 0x428   : > { %v9525_v50 = vpop.f32.mrf.mxu0 }
 0x429   : > { %v9567_v47 = vadd.f32 %v2870_v45, %v2838_v38  ;;  %v2921_v63 = vmax.f32 %v9558_v31, 0.0 }
 0x42a   : > { %v2703_v6 = vpop.f32.mrf.mxu0 }
 0x42b   : > { %v2841_v49 = vmul.f32 %v2812_v14, %v2703_v6  ;;  %v2922_v6 = vmax.f32 %v9567_v47, 0.0  ;;  %v7529_v11 = vpack.i.bf16 %v2921_v63, %v2918_v61 }
 0x42c   : > { %v2705_v1 = vpop.f32.mrf.mxu0 }
 0x42d   : > { %v2843_v4 = vmul.f32 %v2817_v3, %v2705_v1  ;;  %v9599_v1 = vadd.f32 %v9539_v10, %v2841_v49 }
 0x42e   : > { %v2707_v16 = vpop.f32.mrf.mxu0 }
 0x42f   : > { %v2844_v35 = vmul.f32 %v2817_v3, %v2707_v16  ;;  %v2925_v53 = vmax.f32 %v9599_v1, 0.0 }
 0x430   : > { %v9527_v51 = vpop.f32.mrf.mxu0 }
 0x431   : > { %v2846_v28 = vmul.f32 %v2822_v54, %v9527_v51 }
 0x432   : > { %v9529_v2 = vpop.f32.mrf.mxu0 }
 0x433   : > { %v9648_v43 = vadd.f32 %v2885_v8, %v2846_v28 }
 0x434   : > { %v9531_v21 = vpop.f32.mrf.mxu0 }
 0x435   : > { %v2930_v34 = vmax.f32 %v9648_v43, 0.0 }
 0x436   : > { %v9533_v46 = vpop.f32.mrf.mxu0 }
 0x437   : > { %v2850_v38 = vmul.f32 %v2827_v7, %v9533_v46 }
 0x438   : > { %v9535_v52 = vpop.f32.mrf.mxu0 }
 0x43a   : > { %v9537_v32 = vpop.f32.mrf.mxu0 }
 0x43c   : > { %v2725_v62 = vpop.f32.mrf.mxu0 }
 0x43d   : > { %v9606_v62 = vadd.f32 %v2880_v33, %v2843_v4 }
 0x43e   : > { %v2726_v5 = vpop.f32.mrf.mxu0 }
 0x43f   : > { %v2849_v5 = vmul.f32 %v2827_v7, %v9531_v21  ;;  %v2890_v21 = vpop.permute.xlu1 %2889 }
 0x440   : > { %v7322_v19 = vpop.f32.mrf.mxu0 }
 0x441   : > { %v2842_v48 = vmul.f32 %v7322_v19, %v2812_v14 }
 0x442   : > { %v2762_v15 = vpop.f32.mrf.mxu0 }
 0x443   : > { %v2836_v57 = vmul.f32 %v2802_v59, %v2762_v15  ;;  %v9578_v13 = vadd.f32 %v9539_v10, %v2842_v48  ;;  %v2840_v59 = vmul.f32 %v2812_v14, %v9525_v50  ;;  %v9634_v48 = vadd.f32 %v2890_v21, %v2849_v5 }
 0x444   : > { %v7323_v26 = vpop.f32.mrf.mxu0 }
 0x445   : > { %v9560_v27 = vadd.f32 %v2865_v12, %v2836_v57  ;;  %v2845_v41 = vmul.f32 %v7323_v26, %v2817_v3  ;;  %v2847_v12 = vmul.f32 %v2822_v54, %v9529_v2  ;;  %v2926_v50 = vmax.f32 %v9578_v13, 0.0  ;;  %v2832_v57 = vpop.permute.xlu0 %2831 }
 0x446   : > { %v2765_v58 = vpop.f32.mrf.mxu0  ;;  %v9623_v55 = vadd.f32 %v9539_v10, %v2840_v59  ;;  %v2927_v10 = vmax.f32 %v9606_v62, 0.0  ;;  %v2853_v36 = vmul.f32 %v2832_v57, %v9537_v32 }
 0x447   : > { %v2920_v42 = vmax.f32 %v9560_v27, 0.0  ;;  %v2839_v56 = vmul.f32 %v2807_v23, %v2765_v58  ;;  %v9587_v20 = vadd.f32 %v2880_v33, %v2845_v41  ;;  %v9601_v23 = vadd.f32 %v2880_v33, %v2844_v35  ;;  %v2895_v35 = vpop.permute.xlu1 %2894 }
 0x448   : > { %v7326_v17 = vpop.f32.mrf.mxu0  ;;  %v9628_v25 = vadd.f32 %v2885_v8, %v2847_v12  ;;  %v7534_v51 = vpack.i.bf16 %v2926_v50, %v2925_v53  ;;  %v2924_v41 = vmax.f32 %v9623_v55, 0.0  ;;  %v9651_v58 = vadd.f32 %v2890_v21, %v2850_v38 }
 0x449   : > { %v9589_v39 = vadd.f32 %v2870_v45, %v2839_v56  ;;  %v7519_v9 = vpack.i.bf16 %v2920_v42, %v2919_v37  ;;  %v2929_v22 = vmax.f32 %v9587_v20, 0.0  ;;  %v2928_v33 = vmax.f32 %v9601_v23, 0.0 }
 0x44a   : > { %v2778_v16 = vpop.f32.mrf.mxu0  ;;  %v2931_v49 = vmax.f32 %v9628_v25, 0.0  ;;  %v2933_v56 = vmax.f32 %v9634_v48, 0.0  ;;  %v7544_v60 = vpack.i.bf16 %v2927_v10, %v2924_v41  ;;  %v2934_v24 = vmax.f32 %v9651_v58, 0.0 }
 0x44b   : > { %v2923_v45 = vmax.f32 %v9589_v39, 0.0  ;;  %v2848_v3 = vmul.f32 %v2822_v54, %v2778_v16  ;;  %7520 = vrot.lane.b32.xlu0 %v7519_v9, %s8143_s23  ;;  %v2854_v54 = vmul.f32 %v7326_v17, %v2832_v57  ;;  %v7539_v46 = vpack.i.bf16 %v2929_v22, %v2928_v33 }
 0x44c   : > { %v7327_v14 = vpop.f32.mrf.mxu0  ;;  %v9671_v9 = vadd.f32 %v2895_v35, %v2853_v36  ;;  %v7559_v16 = vpack.i.bf16 %v2933_v56, %v2930_v34 }
 0x44d   : > { %v9612_v19 = vadd.f32 %v2885_v8, %v2848_v3  ;;  %v7524_v2 = vpack.i.bf16 %v2923_v45, %v2922_v6  ;;  %v9662_v4 = vadd.f32 %v2895_v35, %v2854_v54 }
 0x44e   : > { %v2781_v18 = vpop.f32.mrf.mxu0  ;;  %v2937_v12 = vmax.f32 %v9671_v9, 0.0 }
 0x44f   : > { %v2851_v15 = vmul.f32 %v2827_v7, %v2781_v18  ;;  %7525 = vrot.lane.b32.xlu1 %v7524_v2, %s8143_s23  ;;  %7530 = vrot.lane.b32.xlu0 %v7529_v11, %s8143_s23  ;;  %v2932_v26 = vmax.f32 %v9612_v19, 0.0  ;;  %v2852_v7 = vmul.f32 %v2832_v57, %v9535_v52  ;;  %v2938_v8 = vmax.f32 %v9662_v4, 0.0 }
 0x451   : > { %v9641_v44 = vadd.f32 %v2890_v21, %v2851_v15  ;;  %v7549_v32 = vpack.i.bf16 %v2932_v26, %v2931_v49  ;;  %v9675_v52 = vadd.f32 %v2895_v35, %v2852_v7  ;;  %v7564_v5 = vpack.i.bf16 %v2938_v8, %v2937_v12 }
 0x453   : > { %7540 = vrot.lane.b32.xlu0 %v7539_v46, %s8143_s23  ;;  %7535 = vrot.lane.b32.xlu1 %v7534_v51, %s8143_s23  ;;  %v2935_v17 = vmax.f32 %v9641_v44, 0.0  ;;  %v2936_v3 = vmax.f32 %v9675_v52, 0.0 }
 0x455   : > { %v7554_v59 = vpack.i.bf16 %v2935_v17, %v2934_v24 }
 0x457   : > { %7545 = vrot.lane.b32.xlu1 %v7544_v60, %s8143_s23  ;;  %7550 = vrot.lane.b32.xlu0 %v7549_v32, %s8143_s23 }
 0x45b   : > { %7555 = vrot.lane.b32.xlu1 %v7554_v59, %s8143_s23  ;;  %7560 = vrot.lane.b32.xlu0 %v7559_v16, %s8143_s23 }
 0x45f   : > { %7565 = vrot.lane.b32.xlu1 %v7564_v5, %s8143_s23  ;;  %2996 = vrot.lane.b32.xlu0 %v2936_v3, %s8143_s23 }
 0x4bd   : > { %v7521_v14 = vpop.permute.xlu0 %7520 }
 0x4be   : > { %v7523_v2 = vunpack.i.h.bf16 %v7521_v14  ;;  %v7522_v11 = vunpack.i.l.bf16 %v7521_v14 }
 0x4c0   : > { %v3003_v18 = vsel %vm1022_vm2, %v7522_v11, %v7523_v2  ;;  %v3039_v54 = vmax.f32 %v2920_v42, %v7523_v2 }
 0x4c1   : > { %v7526_v21 = vpop.permute.xlu1 %7525  ;;  %v7531_v28 = vpop.permute.xlu0 %7530  ;;  %v3038_v27 = vmax.f32 %v2919_v37, %v3003_v18 }
 0x4c2   : > { %v7528_v38 = vunpack.i.h.bf16 %v7526_v21  ;;  %v7527_v15 = vunpack.i.l.bf16 %v7526_v21  ;;  %v7533_v57 = vunpack.i.h.bf16 %v7531_v28  ;;  %v7532_v51 = vunpack.i.l.bf16 %v7531_v28 }
 0x4c4   : > { %v3042_v46 = vmax.f32 %v2923_v45, %v7528_v38  ;;  %v3004_v36 = vsel %vm1022_vm2, %v7533_v57, %v7527_v15  ;;  %v3002_v35 = vsel %vm1022_vm2, %v7532_v51, %v7522_v11  ;;  %v3005_v60 = vsel %vm1022_vm2, %v7527_v15, %v7528_v38 }
 0x4c5   : > { %v3040_v7 = vmax.f32 %v2921_v63, %v3004_v36  ;;  %v3037_v32 = vmax.f32 %v2918_v61, %v3002_v35  ;;  %v7536_v59 = vpop.permute.xlu1 %7535  ;;  %v7541_v16 = vpop.permute.xlu0 %7540  ;;  %v3041_v42 = vmax.f32 %v2922_v6, %v3005_v60 }
 0x4c6   : > { %v3060_v39 = vpack.c.bf16 %v3042_v46, %v3039_v54  ;;  %v7538_v45 = vunpack.i.h.bf16 %v7536_v59  ;;  %v7537_v5 = vunpack.i.l.bf16 %v7536_v59  ;;  %v7543_v14 = vunpack.i.h.bf16 %v7541_v16 }
 0x4c7   : > { %v3058_v2 = vpack.c.bf16 %v3040_v7, %v3037_v32  ;;  %v7542_v11 = vunpack.i.l.bf16 %v7541_v16  ;;  %v3059_v21 = vpack.c.bf16 %v3041_v42, %v3038_v27 }
 0x4c8   : > { %v3045_v31 = vmax.f32 %v2926_v50, %v7538_v45  ;;  %v3048_v30 = vmax.f32 %v2929_v22, %v7543_v14  ;;  %6896 = vmatmul.mubr.msk.bf16.vlgmr.msra.gmra.mxu0 %vm3346_vm1, %v3060_v39  ;;  %v3007_v29 = vsel %vm1022_vm2, %v7537_v5, %v7538_v45 }
 0x4c9   : > { %v7546_v37 = vpop.permute.xlu1 %7545  ;;  %v7551_v47 = vpop.permute.xlu0 %7550  ;;  %3391 = vmatprep.mubr.bf16.mxu1 %v3059_v21  ;;  %v3009_v63 = vsel %vm1022_vm2, %v7542_v11, %v7543_v14  ;;  %v3044_v61 = vmax.f32 %v2925_v53, %v3007_v29  ;;  %3472 = vmatprep.mubr.bf16.mxu0 %v8142_v0 }
 0x4ca   : > { %v7548_v6 = vunpack.i.h.bf16 %v7546_v37  ;;  %v7547_v13 = vunpack.i.l.bf16 %v7546_v37  ;;  %v7553_v50 = vunpack.i.h.bf16 %v7551_v47  ;;  %v7552_v28 = vunpack.i.l.bf16 %v7551_v47  ;;  %3392 = vmatmul.mubr.bf16.vlgmr.msra.gmra.mxu1 %v3058_v2 }
 0x4cb   : > { %v3047_v20 = vmax.f32 %v2928_v33, %v3009_v63  ;;  %v3063_v22 = vpack.c.bf16 %v3048_v30, %v3045_v31 }
 0x4cc   : > { %v3006_v18 = vsel %vm1022_vm2, %v7547_v13, %v7537_v5  ;;  %v3008_v38 = vsel %vm1022_vm2, %v7548_v6, %v7542_v11  ;;  %v3011_v54 = vsel %vm1022_vm2, %v7552_v28, %v7553_v50  ;;  %v3051_v25 = vmax.f32 %v2932_v26, %v7553_v50 }
 0x4cd   : > { %v7556_v15 = vpop.permute.xlu1 %7555  ;;  %v7561_v57 = vpop.permute.xlu0 %7560  ;;  %v3062_v51 = vpack.c.bf16 %v3047_v20, %v3044_v61  ;;  %v3043_v1 = vmax.f32 %v2924_v41, %v3006_v18  ;;  %v3046_v53 = vmax.f32 %v2927_v10, %v3008_v38  ;;  %v3050_v55 = vmax.f32 %v2931_v49, %v3011_v54 }
 0x4ce   : > { %v7558_v46 = vunpack.i.h.bf16 %v7556_v15  ;;  %v7557_v36 = vunpack.i.l.bf16 %v7556_v15  ;;  %v7563_v23 = vunpack.i.h.bf16 %v7561_v57  ;;  %v7562_v33 = vunpack.i.l.bf16 %v7561_v57 }
 0x4cf   : > { %3401 = vmatprep.mubr.bf16.mxu1 %v3062_v51  ;;  %v3061_v35 = vpack.c.bf16 %v3046_v53, %v3043_v1 }
 0x4d0   : > { %6897 = vmatmul.mubr.msk.bf16.gmra.mxu0 %vm3346_vm1, %v3063_v22  ;;  %v3013_v60 = vsel %vm1022_vm2, %v7557_v36, %v7558_v46  ;;  %v3010_v10 = vsel %vm1022_vm2, %v7562_v33, %v7552_v28  ;;  %v3012_v41 = vsel %vm1022_vm2, %v7563_v23, %v7557_v36  ;;  %v3054_v32 = vmax.f32 %v2935_v17, %v7558_v46 }
 0x4d1   : > { %v7566_v7 = vpop.permute.xlu1 %7565  ;;  %v3053_v62 = vmax.f32 %v2934_v24, %v3013_v60  ;;  %3482 = vmatprep.mubr.bf16.mxu0 %v8142_v0  ;;  %v3049_v49 = vmax.f32 %v2930_v34, %v3010_v10  ;;  %v3052_v58 = vmax.f32 %v2933_v56, %v3012_v41  ;;  %v2997_v42 = vpop.permute.xlu0 %2996 }
 0x4d2   : > { %v7568_v59 = vunpack.i.h.bf16 %v7566_v7  ;;  %v7567_v16 = vunpack.i.l.bf16 %v7566_v7  ;;  %3402 = vmatmul.mubr.bf16.gmra.mxu1 %v3061_v35  ;;  %v3066_v17 = vpack.c.bf16 %v3054_v32, %v3051_v25 }
 0x4d3   : > { %v3065_v27 = vpack.c.bf16 %v3053_v62, %v3050_v55  ;;  %v3064_v39 = vpack.c.bf16 %v3052_v58, %v3049_v49 }
 0x4d4   : > { %v3015_v24 = vsel %vm1022_vm2, %v7567_v16, %v7568_v59  ;;  %v3014_v19 = vsel %vm1022_vm2, %v2997_v42, %v7567_v16  ;;  %v3057_v48 = vmax.f32 %v2938_v8, %v7568_v59 }
 0x4d5   : > { %3411 = vmatprep.mubr.bf16.mxu1 %v3065_v27  ;;  %v3056_v44 = vmax.f32 %v2937_v12, %v3015_v24  ;;  %v3055_v43 = vmax.f32 %v2936_v3, %v3014_v19 }
 0x4d6   : > { %v3069_v56 = vpack.c.bf16 %v3057_v48, %v3057_v48 }
 0x4d7   : > { %v3068_v26 = vpack.c.bf16 %v3056_v44, %v3056_v44  ;;  %v3067_v34 = vpack.c.bf16 %v3055_v43, %v3055_v43 }
 0x4d8   : > { %6898 = vmatmul.mubr.msk.bf16.gmra.mxu0 %vm3346_vm1, %v3066_v17 }
 0x4d9   : > { %3492 = vmatprep.mubr.bf16.mxu0 %v8142_v0 }
 0x4da   : > { %3412 = vmatmul.mubr.bf16.gmra.mxu1 %v3064_v39 }
 0x4db   : > { %3421 = vmatprep.mubr.bf16.mxu1 %v3068_v26 }
 0x4e0   : > { %6899 = vmatmul.mubr.msk.bf16.gmra.mxu0 %vm3346_vm1, %v3069_v56  ;;  %vm6352_vm1 = vcmask 589312  }
 0x4e2   : > { %3422 = vmatmul.mubr.bf16.gmra.mxu1 %v3067_v34 }
 0x588   : > { %v3464_v9 = vpop.f32.mrf.mxu0 }
 0x58a   : > { %v3393_v12 = vpop.f32.mrf.mxu1  ;;  %v3466_v45 = vpop.f32.mrf.mxu0 }
 0x58b   : > { %v3465_v21 = vadd.f32 %v3464_v9, %v3393_v12 }
 0x58c   : > { %v3395_v5 = vpop.f32.mrf.mxu1  ;;  %v3468_v14 = vpop.f32.mrf.mxu0 }
 0x58d   : > { %v3467_v30 = vadd.f32 %v3466_v45, %v3395_v5 }
 0x58e   : > { %v3397_v2 = vpop.f32.mrf.mxu1  ;;  %v3470_v11 = vpop.f32.mrf.mxu0 }
 0x58f   : > { %v3469_v4 = vadd.f32 %v3468_v14, %v3397_v2 }
 0x590   : > { %v3399_v8 = vpop.f32.mrf.mxu1  ;;  %v3474_v31 = vpop.f32.mrf.mxu0 }
 0x591   : > { %v9761_v29 = vpack.c.bf16 %v3469_v4, %v3465_v21  ;;  %v3471_v52 = vadd.f32 %v3470_v11, %v3399_v8 }
 0x592   : > { %v3403_v3 = vpop.f32.mrf.mxu1  ;;  %v3476_v37 = vpop.f32.mrf.mxu0 }
 0x593   : > { %v9763_v47 = vpack.c.bf16 %v3471_v52, %v3467_v30  ;;  %v3555_v63 = vrot.slane %v9761_v29, 6  ;;  %v3475_v20 = vadd.f32 %v3474_v31, %v3403_v3  ;;  %v3517_v4 = vrot.slane %v9761_v29, 7 }
 0x594   : > { %v3405_v61 = vpop.f32.mrf.mxu1  ;;  %v3478_v6 = vpop.f32.mrf.mxu0 }
 0x595   : > { %3569 = vrot.lane.b32.xlu1 %v3555_v63, %s8146_s3  ;;  %v3556_v13 = vrot.slane %v9763_v47, 6  ;;  %v3477_v15 = vadd.f32 %v3476_v37, %v3405_v61  ;;  %v3518_v31 = vrot.slane %v9763_v47, 7 }
 0x596   : > { %v3407_v50 = vpop.f32.mrf.mxu1  ;;  %v3480_v28 = vpop.f32.mrf.mxu0 }
 0x597   : > { %v3479_v22 = vadd.f32 %v3478_v6, %v3407_v50  ;;  %3571 = vrot.lane.b32.xlu0 %v3556_v13, %s8146_s3 }
 0x598   : > { %v3409_v18 = vpop.f32.mrf.mxu1  ;;  %v3484_v38 = vpop.f32.mrf.mxu0 }
 0x599   : > { %v9769_v57 = vpack.c.bf16 %v3479_v22, %v3475_v20  ;;  %v3481_v51 = vadd.f32 %v3480_v28, %v3409_v18  ;;  %v3634_v28 = vrot.slane %v9763_v47, 4  ;;  %v3633_v22 = vrot.slane %v9761_v29, 4 }
 0x59a   : > { %v3413_v1 = vpop.f32.mrf.mxu1  ;;  %v3486_v53 = vpop.f32.mrf.mxu0 }
 0x59b   : > { %v9771_v54 = vpack.c.bf16 %v3481_v51, %v3477_v15  ;;  %v3557_v46 = vrot.slane %v9769_v57, 6  ;;  %v3485_v32 = vadd.f32 %v3484_v38, %v3413_v1  ;;  %v3519_v14 = vrot.slane %v9769_v57, 7 }
 0x59c   : > { %v3415_v36 = vpop.f32.mrf.mxu1  ;;  %v3488_v23 = vpop.f32.mrf.mxu0 }
 0x59d   : > { %v3558_v33 = vsel %vm2543_vm5, %v3555_v63, %v3557_v46  ;;  %v3559_v35 = vrot.slane %v9771_v54, 6  ;;  %v3487_v25 = vadd.f32 %v3486_v53, %v3415_v36  ;;  %v3521_v11 = vrot.slane %v9771_v54, 7 }
 0x59e   : > { %v3490_v60 = vpop.f32.mrf.mxu0  ;;  %3573 = vrot.lane.b32.xlu1 %v3558_v33, %s8146_s3  ;;  %v3417_v7 = vpop.f32.mrf.mxu1  ;;  %v3520_v8 = vsel %vm2460_vm6, %v3517_v4, %v3519_v14  ;;  %v3637_v61 = vrot.slane %v9771_v54, 4 }
 0x59f   : > { %v3489_v55 = vadd.f32 %v3488_v23, %v3417_v7  ;;  %v3560_v62 = vsel %vm2543_vm5, %v3556_v13, %v3559_v35  ;;  %v3522_v30 = vsel %vm2460_vm6, %v3518_v31, %v3521_v11  ;;  %v3635_v13 = vrot.slane %v9769_v57, 4 }
 0x5a0   : > { %v3494_v10 = vpop.f32.mrf.mxu0  ;;  %3575 = vrot.lane.b32.xlu0 %v3560_v62, %s8146_s3  ;;  %v3419_v41 = vpop.f32.mrf.mxu1  ;;  %v3638_v20 = vsel %vm2047_vm4, %v3634_v28, %v3637_v61  ;;  %v3598_v23 = vrot.slane %v9771_v54, 5 }
 0x5a1   : > { %v3491_v59 = vadd.f32 %v3490_v60, %v3419_v41  ;;  %v9783_v49 = vpack.c.bf16 %v3489_v55, %v3485_v32  ;;  %v3636_v38 = vsel %vm2047_vm4, %v3633_v22, %v3635_v13  ;;  %v3596_v60 = vrot.slane %v9769_v57, 5 }
 0x5a2   : > { %v3423_v16 = vpop.f32.mrf.mxu1  ;;  %v3496_v27 = vpop.f32.mrf.mxu0  ;;  %v3595_v32 = vrot.slane %v9763_v47, 5 }
 0x5a3   : > { %v3495_v58 = vadd.f32 %v3494_v10, %v3423_v16  ;;  %v9785_v17 = vpack.c.bf16 %v3491_v59, %v3487_v25  ;;  %v3523_v43 = vrot.slane %v9783_v49, 7  ;;  %v3639_v3 = vrot.slane %v9783_v49, 4 }
 0x5a4   : > { %v3425_v24 = vpop.f32.mrf.mxu1  ;;  %v3498_v44 = vpop.f32.mrf.mxu0  ;;  %v3600_v1 = vrot.slane %v9783_v49, 5  ;;  %v3594_v10 = vrot.slane %v9761_v29, 5  ;;  %v3599_v16 = vsel %vm3593_vm3, %v3595_v32, %v3598_v23 }
 0x5a5   : > { %v9787_v42 = vpack.c.bf16 %v3495_v58, %v3495_v58  ;;  %v3497_v39 = vadd.f32 %v3496_v27, %v3425_v24  ;;  %v3525_v12 = vrot.slane %v9785_v17, 7  ;;  %v3524_v2 = vsel %vm2460_vm6, %v3519_v14, %v3523_v43  ;;  %v3911_v14 = vld [vmem:[%s11587_s10 + $0x28] sm:$0xff] }
 0x5a6   : > { %v3427_v19 = vpop.f32.mrf.mxu1  ;;  %v3499_v26 = vpop.f32.mrf.mxu0  ;;  %v3641_v37 = vrot.slane %v9785_v17, 4  ;;  %v3640_v50 = vsel %vm2047_vm4, %v3635_v13, %v3639_v3  ;;  %v3602_v36 = vrot.slane %v9785_v17, 5  ;;  %v3601_v55 = vsel %vm3593_vm3, %v3596_v60, %v3600_v1  ;;  %v4021_v13 = vld [vmem:[%s11588_s11 + $0x58] sm:$0xff] }
 0x5a7   : > { %v9789_v48 = vpack.c.bf16 %v3497_v39, %v3497_v39  ;;  %v3527_v56 = vrot.slane %v9787_v42, 7  ;;  %v3526_v21 = vsel %vm2460_vm6, %v3521_v11, %v3525_v12  ;;  %v3643_v52 = vrot.slane %v9787_v42, 4  ;;  %v7968_v39 = vld [vmem:[%s11586_s9 + $0x4] ss:$8 sps:$4 sm:$0xff]  }
 0x5a8   : > { %v3428_v34 = vpop.f32.mrf.mxu1  ;;  %v3642_v6 = vsel %vm2047_vm4, %v3637_v61, %v3641_v37  ;;  %v3604_v15 = vrot.slane %v9787_v42, 5  ;;  %v3603_v33 = vsel %vm3593_vm3, %v3598_v23, %v3602_v36  ;;  %v3597_v41 = vsel %vm3593_vm3, %v3594_v10, %v3596_v60  ;;  %6915 = vmatprep.mubr.msk.bf16.mxu0 %vm3777_vm7, %v7968_v39  ;;  %v4015_v11 = vld [vmem:[%s11588_s11 + $0x28] sm:$0xff]  ;;  %v3917_v61 = vld [vmem:[%s11587_s10 + $0x58] sm:$0xff] }
 0x5a9   : > { %v3528_v9 = vsel %vm2460_vm6, %v3523_v43, %v3527_v56  ;;  %v3529_v45 = vrot.slane %v9789_v48, 7  ;;  %v3644_v63 = vsel %vm2047_vm4, %v3639_v3, %v3643_v52  ;;  %v3645_v18 = vrot.slane %v9789_v48, 4  ;;  %v3906_v43 = vld [vmem:[%s11587_s10] sm:$0xff]  ;;  %v3907_v56 = vld [vmem:[%s11587_s10 + $0x8] sm:$0xff]  ;;  %v3908_v34 = vld [vmem:[%s11587_s10 + $0x10] sm:$0xff] }
 0x5aa   : > { %3543 = vrot.lane.b32.xlu1 %v3528_v9, %s8143_s23  ;;  %v3605_v53 = vsel %vm3593_vm3, %v3600_v1, %v3604_v15  ;;  %v3606_v7 = vrot.slane %v9789_v48, 5  ;;  %v3565_v59 = vrot.slane %v9787_v42, 6  ;;  %v3561_v27 = vrot.slane %v9783_v49, 6  ;;  %v3909_v9 = vld [vmem:[%s11587_s10 + $0x18] sm:$0xff]  ;;  %v3915_v52 = vld [vmem:[%s11587_s10 + $0x48] sm:$0xff]  ;;  %v4018_v3 = vld [vmem:[%s11588_s11 + $0x40] sm:$0xff] }
 0x5ab   : > { %v3530_v5 = vsel %vm2460_vm6, %v3525_v12, %v3529_v45  ;;  %v3646_v51 = vsel %vm2047_vm4, %v3641_v37, %v3645_v18  ;;  %v3567_v25 = vrot.slane %v9789_v48, 6  ;;  %v3563_v24 = vrot.slane %v9785_v17, 6  ;;  %v4012_v12 = vld [vmem:[%s11588_s11 + $0x10] sm:$0xff]  ;;  %v4013_v45 = vld [vmem:[%s11588_s11 + $0x18] sm:$0xff]  ;;  %v4019_v37 = vld [vmem:[%s11588_s11 + $0x48] sm:$0xff] }
 0x5ac   : > { %3545 = vrot.lane.b32.xlu0 %v3530_v5, %s8143_s23  ;;  %v3607_v62 = vsel %vm3593_vm3, %v3602_v36, %v3606_v7  ;;  %v3566_v58 = vsel %vm2543_vm5, %v3561_v27, %v3565_v59  ;;  %v3562_v19 = vsel %vm2543_vm5, %v3557_v46, %v3561_v27  ;;  %v4010_v46 = vld [vmem:[%s11588_s11] sm:$0xff] }
 0x5ad   : > { %v3568_v44 = vsel %vm2543_vm5, %v3563_v24, %v3567_v25  ;;  %v3564_v26 = vsel %vm2543_vm5, %v3559_v35, %v3563_v24  ;;  %v4011_v35 = vld [vmem:[%s11588_s11 + $0x8] sm:$0xff]  ;;  %v3910_v5 = vld [vmem:[%s11587_s10 + $0x20] sm:$0xff] }
 0x5ae   : > { %3539 = vrot.lane.b32.xlu1 %v3524_v2, %s8143_s23  ;;  %v4014_v2 = vld [vmem:[%s11588_s11 + $0x20] sm:$0xff] }
 0x5b0   : > { %3541 = vrot.lane.b32.xlu0 %v3526_v21, %s8143_s23  ;;  %v3912_v21 = vld [vmem:[%s11587_s10 + $0x30] sm:$0xff] }
 0x5b2   : > { %3535 = vrot.lane.b32.xlu1 %v3520_v8, %s8143_s23  ;;  %v4016_v8 = vld [vmem:[%s11588_s11 + $0x30] sm:$0xff] }
 0x5b4   : > { %3537 = vrot.lane.b32.xlu0 %v3522_v30, %s8143_s23  ;;  %v3914_v30 = vld [vmem:[%s11587_s10 + $0x40] sm:$0xff] }
 0x5b6   : > { %3531 = vrot.lane.b32.xlu1 %v3517_v4, %s8143_s23  ;;  %v3913_v4 = vld [vmem:[%s11587_s10 + $0x38] sm:$0xff] }
 0x5b8   : > { %3533 = vrot.lane.b32.xlu0 %v3518_v31, %s8143_s23  ;;  %v4017_v31 = vld [vmem:[%s11588_s11 + $0x38] sm:$0xff] }
 0x5ba   : > { %3659 = vrot.lane.b32.xlu1 %v3644_v63, %s11615_s2  ;;  %v3916_v63 = vld [vmem:[%s11587_s10 + $0x50] sm:$0xff] }
 0x5bc   : > { %3657 = vrot.lane.b32.xlu0 %v3642_v6, %s11615_s2  ;;  %v4020_v6 = vld [vmem:[%s11588_s11 + $0x50] sm:$0xff] }
 0x5be   : > { %3655 = vrot.lane.b32.xlu1 %v3640_v50, %s11615_s2 }
 0x5c0   : > { %3653 = vrot.lane.b32.xlu0 %v3638_v20, %s11615_s2  ;;  %v3918_v20 = vld [vmem:[%s11587_s10 + $0x60] sm:$0xf] }
 0x5c2   : > { %3651 = vrot.lane.b32.xlu1 %v3636_v38, %s11615_s2 }
 0x5c4   : > { %3661 = vrot.lane.b32.xlu0 %v3646_v51, %s11615_s2 }
 0x5c6   : > { %3620 = vrot.lane.b32.xlu1 %v3605_v53, %s11654_s1 }
 0x5c8   : > { %3649 = vrot.lane.b32.xlu0 %v3634_v28, %s11615_s2 }
 0x5ca   : > { %3647 = vrot.lane.b32.xlu1 %v3633_v22, %s11615_s2  ;;  %v4022_v22 = vld [vmem:[%s11588_s11 + $0x60] sm:$0xf] }
 0x5cc   : > { %3618 = vrot.lane.b32.xlu0 %v3603_v33, %s11654_s1 }
 0x5ce   : > { %3616 = vrot.lane.b32.xlu1 %v3601_v55, %s11654_s1 }
 0x5d0   : > { %3622 = vrot.lane.b32.xlu0 %v3607_v62, %s11654_s1 }
 0x5d2   : > { %3612 = vrot.lane.b32.xlu1 %v3597_v41, %s11654_s1 }
 0x5d4   : > { %3614 = vrot.lane.b32.xlu0 %v3599_v16, %s11654_s1 }
 0x5d6   : > { %3581 = vrot.lane.b32.xlu1 %v3566_v58, %s8146_s3 }
 0x5d8   : > { %3583 = vrot.lane.b32.xlu0 %v3568_v44, %s8146_s3 }
 0x5da   : > { %3608 = vrot.lane.b32.xlu1 %v3594_v10, %s11654_s1 }
 0x5dc   : > { %3610 = vrot.lane.b32.xlu0 %v3595_v32, %s11654_s1 }
 0x5de   : > { %3577 = vrot.lane.b32.xlu1 %v3562_v19, %s8146_s3 }
 0x5e0   : > { %3579 = vrot.lane.b32.xlu0 %v3564_v26, %s8146_s3 }
 0x5e2   : > { %3921 = vperm.xlu1 %7458, %v3906_v43  }
 0x5e4   : > { %3926 = vperm.xlu0 %7457, %v3907_v56  }
 0x5e6   : > { %4025 = vperm.xlu1 %7458, %v4010_v46  }
 0x5e8   : > { %4030 = vperm.xlu0 %7457, %v4011_v35  }
 0x5ea   : > { %3931 = vperm.xlu1 %7458, %v3908_v34  }
 0x5ec   : > { %3936 = vperm.xlu0 %7457, %v3909_v9  }
 0x5ee   : > { %4035 = vperm.xlu1 %7458, %v4012_v12  }
 0x5f0   : > { %4040 = vperm.xlu0 %7457, %v4013_v45  }
 0x5f2   : > { %3941 = vperm.xlu1 %7458, %v3910_v5  }
 0x5f4   : > { %3946 = vperm.xlu0 %7457, %v3911_v14  }
 0x5f6   : > { %4045 = vperm.xlu1 %7458, %v4014_v2  }
 0x5f8   : > { %4050 = vperm.xlu0 %7457, %v4015_v11  }
 0x5fa   : > { %3951 = vperm.xlu1 %7458, %v3912_v21  }
 0x5fc   : > { %3956 = vperm.xlu0 %7457, %v3913_v4  }
 0x5fe   : > { %4055 = vperm.xlu1 %7458, %v4016_v8  }
 0x600   : > { %4060 = vperm.xlu0 %7457, %v4017_v31  }
 0x602   : > { %3961 = vperm.xlu1 %7458, %v3914_v30  }
 0x604   : > { %3966 = vperm.xlu0 %7457, %v3915_v52  }
 0x606   : > { %4065 = vperm.xlu1 %7458, %v4018_v3  }
 0x607   : > { %v3570_v50 = vpop.permute.xlu1 %3569 }
 0x608   : > { %4070 = vperm.xlu0 %7457, %v4019_v37  }
 0x609   : > { %v3572_v28 = vpop.permute.xlu0 %3571 }
 0x60a   : > { %3971 = vperm.xlu1 %7458, %v3916_v63   ;;  %v3585_v53 = vsel %vm2482_vm13, %v3570_v50, %v3572_v28  ;;  %v7972_v50 = vld [vmem:[%s11586_s9 + $0x24] ss:$8 sps:$4 sm:$0xff]  }
 0x60c   : > { %3976 = vperm.xlu0 %7457, %v3917_v61   ;;  %v7966_v61 = vld [vmem:[%s11586_s9] ss:$8 sps:$4 sm:$0xff]  }
 0x60e   : > { %4075 = vperm.xlu1 %7458, %v4020_v6   ;;  %v7969_v6 = vld [vmem:[%s11586_s9 + $0x14] ss:$8 sps:$4 sm:$0xff]  }
 0x610   : > { %4080 = vperm.xlu0 %7457, %v4021_v13   ;;  %v3574_v18 = vpop.permute.xlu1 %3573  ;;  %v7971_v13 = vld [vmem:[%s11586_s9 + $0x10] ss:$8 sps:$4 sm:$0xff]  }
 0x612   : > { %v3576_v38 = vpop.permute.xlu0 %3575  ;;  %3981 = vperm.xlu1 %7458, %v3918_v20   ;;  %v7975_v20 = vld [vmem:[%s11586_s9 + $0x34] ss:$8 sps:$4 sm:$0xff]  }
 0x613   : > { %3805 = vmatprep.subr.bf16.mxu0 %v3576_v38  ;;  %v3586_v15 = vsel %vm2482_vm13, %v3574_v18, %v3576_v38  ;;  %v7978_v18 = vld [vmem:[%s11586_s9 + $0x44] ss:$8 sps:$4 sm:$0xff]   ;;  %v7980_v38 = vld [vmem:[%s11586_s9 + $0x40] ss:$8 sps:$4 sm:$0xff]  }
 0x614   : > { %3806 = vmatpush1.bf16.msra.mxu0 %v3586_v15  ;;  %4085 = vperm.xlu0 %7457, %v4022_v22   ;;  %v7977_v22 = vld [vmem:[%s11586_s9 + $0x30] ss:$8 sps:$4 sm:$0xff]   ;;  %v7981_v15 = vld [vmem:[%s11586_s9 + $0x54] ss:$8 sps:$4 sm:$0xff]  }
 0x61c   : > { %v3544_v51 = vpop.permute.xlu1 %3543 }
 0x61e   : > { %v3546_v1 = vpop.permute.xlu0 %3545 }
 0x61f   : > { %v3550_v36 = vsel %vm1022_vm2, %v3544_v51, %v3546_v1  ;;  %v3685_v23 = vsel %vm2543_vm5, %v3546_v1, %v3572_v28  ;;  %v7974_v28 = vld [vmem:[%s11586_s9 + $0x20] ss:$8 sps:$4 sm:$0xff]   ;;  %v7983_v1 = vld [vmem:[%s11586_s9 + $0x50] ss:$8 sps:$4 sm:$0xff]  }
 0x620   : > { %v3540_v33 = vpop.permute.xlu1 %3539  ;;  %3807 = vmatprep.subr.bf16.mxu0 %v3685_v23  ;;  %v3681_v60 = vsel %vm2543_vm5, %v3550_v36, %v3585_v53  ;;  %v3716_v51 = vld [vmem:[%s11586_s9 + $0x60] sm:$0x33]  ;;  %v7986_v23 = vld [vmem:[%s11589_s12 + $0x38] sm:$0xff]  }
 0x621   : > { %3808 = vmatpush1.bf16.msra.mxu0 %v3681_v60  ;;  %v6913_v53 = vcombine.high %v3716_v51, %v3716_v51  ;;  %v6912_v36 = vcombine.low %v3716_v51, %v3716_v51  ;;  %4417 = vmatpush1.bf16.msra.mxu1 %v7986_v23  ;;  %v7988_v60 = vld [vmem:[%s11589_s12 + $0x28] sm:$0xff]  }
 0x622   : > { %v3542_v7 = vpop.permute.xlu0 %3541  ;;  %4418 = vmatprep.subr.bf16.mxu1 %v8142_v0 }
 0x623   : > { %3809 = vmatprep.subr.bf16.mxu0 %v3542_v7  ;;  %v3549_v55 = vsel %vm1022_vm2, %v3540_v33, %v3542_v7  ;;  %v7987_v33 = vld [vmem:[%s11589_s12 + $0x30] sm:$0xff]   ;;  %v7989_v7 = vld [vmem:[%s11589_s12 + $0x20] sm:$0xff]  }
 0x624   : > { %v3536_v62 = vpop.permute.xlu1 %3535 }
 0x625   : > { %3810 = vmatpush1.bf16.msra.mxu0 %v3549_v55  ;;  %4419 = vmatpush1.bf16.msra.mxu1 %v7987_v33  ;;  %v7990_v55 = vld [vmem:[%s11589_s12 + $0x18] sm:$0xff]  }
 0x626   : > { %v3538_v10 = vpop.permute.xlu0 %3537  ;;  %4420 = vmatprep.subr.bf16.mxu1 %v8142_v0 }
 0x627   : > { %3811 = vmatprep.subr.bf16.mxu0 %v3538_v10  ;;  %v3548_v41 = vsel %vm1022_vm2, %v3536_v62, %v3538_v10  ;;  %v7991_v62 = vld [vmem:[%s11589_s12 + $0x10] sm:$0xff]   ;;  %v7992_v10 = vld [vmem:[%s11589_s12 + $0x8] sm:$0xff]  }
 0x628   : > { %v3532_v32 = vpop.permute.xlu1 %3531 }
 0x629   : > { %3812 = vmatpush1.bf16.msra.mxu0 %v3548_v41  ;;  %4421 = vmatpush1.bf16.msra.mxu1 %v7988_v60  ;;  %v4411_v41 = vsel %vm2460_vm6, 4294967295, %v11617_v40 }
 0x62a   : > { %v3534_v59 = vpop.permute.xlu0 %3533  ;;  %4422 = vmatprep.subr.bf16.mxu1 %v8142_v0 }
 0x62b   : > { %v3547_v16 = vsel %vm1022_vm2, %v3532_v32, %v3534_v59  ;;  %v3677_v27 = vsel %vm2460_vm6, %v9789_v48, %v3534_v59  ;;  %v7993_v32 = vld [vmem:[%s11589_s12] sm:$0xff]   ;;  %v7994_v59 = vld [vmem:[%s11589_s12 + $0x58] ss:$0 sps:$4 sm:$0x33]  }
 0x62c   : > { %v3660_v25 = vpop.permute.xlu1 %3659  ;;  %3813 = vmatprep.subr.bf16.mxu0 %v3677_v27  ;;  %v3673_v58 = vsel %vm2460_vm6, %v9787_v42, %v3547_v16  ;;  %v4412_v16 = vsel %vm2543_vm5, %v4411_v41, 0  ;;  %vm5810_vm6 = vcmask 695296  }
 0x62d   : > { %3814 = vmatpush1.bf16.msra.mxu0 %v3673_v58  ;;  %4423 = vmatpush1.bf16.msra.mxu1 %v7989_v7  ;;  %v4414_v27 = vand.u32 %v7994_v59, %v4412_v16 }
 0x62e   : > { %3815 = vmatprep.subr.bf16.mxu0 %v9785_v17  ;;  %v3658_v24 = vpop.permute.xlu0 %3657  ;;  %4424 = vmatprep.subr.bf16.mxu1 %v8142_v0 }
 0x630   : > { %v3656_v44 = vpop.permute.xlu1 %3655 }
 0x631   : > { %3816 = vmatpush1.bf16.msra.mxu0 %v9783_v49  ;;  %v3665_v56 = vsel %vm2565_vm11, %v3656_v44, %v3658_v24  ;;  %4425 = vmatpush1.bf16.msra.mxu1 %v7990_v55 }
 0x632   : > { %3817 = vmatprep.subr.bf16.mxu0 %v9771_v54  ;;  %v3654_v39 = vpop.permute.xlu0 %3653  ;;  %4426 = vmatprep.subr.bf16.mxu1 %v8142_v0 }
 0x634   : > { %v3652_v19 = vpop.permute.xlu1 %3651 }
 0x635   : > { %3818 = vmatpush1.bf16.msra.mxu0 %v9769_v57  ;;  %v3664_v46 = vsel %vm2565_vm11, %v3652_v19, %v3654_v39  ;;  %4427 = vmatpush1.bf16.msra.mxu1 %v7991_v62 }
 0x636   : > { %3819 = vmatprep.subr.bf16.mxu0 %v9763_v47  ;;  %v3662_v48 = vpop.permute.xlu0 %3661  ;;  %4428 = vmatprep.subr.bf16.mxu1 %v8142_v0 }
 0x637   : > { %v3666_v43 = vsel %vm2565_vm11, %v3660_v25, %v3662_v48 }
 0x638   : > { %v3621_v26 = vpop.permute.xlu1 %3620  ;;  %v3800_v49 = vsel %vm652_vm0, %v3666_v43, 0 }
 0x639   : > { %3820 = vmatpush1.bf16.msra.mxu0 %v9761_v29  ;;  %4429 = vmatpush1.bf16.msra.mxu1 %v7992_v10 }
 0x63a   : > { %6914 = vmatprep.subr.msk.bf16.mxu0 %vm652_vm0, %v3662_v48  ;;  %v3650_v17 = vpop.permute.xlu0 %3649  ;;  %4430 = vmatprep.subr.bf16.mxu1 %v8142_v0  ;;  %vm4389_vm0 = vcmask 416768  }
 0x63c   : > { %v3648_v42 = vpop.permute.xlu1 %3647 }
 0x63d   : > { %3822 = vmatpush2.bf16.msra.mxu0 %v3800_v49  ;;  %v3663_v12 = vsel %vm2565_vm11, %v3648_v42, %v3650_v17  ;;  %4431 = vmatpush1.bf16.msra.mxu1 %v7993_v32  ;;  %v7995_v49 = vld [vmem:[%s11589_s12 + $0x50] sm:$0xff]   ;;  %vm6317_vm11 = vcmask 261312  }
 0x63e   : > { %3823 = vmatprep.subr.bf16.mxu0 %v3658_v24  ;;  %v3619_v54 = vpop.permute.xlu0 %3618  ;;  %4440 = vmatprep.subr.bf16.mxu1 %v8142_v0 }
 0x640   : > { %v3617_v57 = vpop.permute.xlu1 %3616 }
 0x641   : > { %3824 = vmatpush2.bf16.msra.mxu0 %v3665_v56  ;;  %v3626_v2 = vsel %vm2530_vm12, %v3617_v57, %v3619_v54  ;;  %4441 = vmatpush2.bf16.msra.mxu1 %v4414_v27 }
 0x642   : > { %3825 = vmatprep.subr.bf16.mxu0 %v3654_v39  ;;  %v3623_v47 = vpop.permute.xlu0 %3622  ;;  %4442 = vmatprep.subr.bf16.mxu1 %v8142_v0 }
 0x643   : > { %v3627_v29 = vsel %vm2530_vm12, %v3621_v26, %v3623_v47  ;;  %v3702_v34 = vsel %vm2047_vm4, %v3623_v47, %v3650_v17 }
 0x644   : > { %v3613_v35 = vpop.permute.xlu1 %3612  ;;  %v3698_v45 = vsel %vm2047_vm4, %v3627_v29, %v3663_v12  ;;  %v7996_v12 = vld [vmem:[%s11589_s12 + $0x48] sm:$0xff]  }
 0x645   : > { %3826 = vmatpush2.bf16.msra.mxu0 %v3664_v46  ;;  %4443 = vmatpush2.bf16.msra.mxu1 %v7995_v49 }
 0x646   : > { %3827 = vmatprep.subr.bf16.mxu0 %v3702_v34  ;;  %v3615_v9 = vpop.permute.xlu0 %3614  ;;  %4444 = vmatprep.subr.bf16.mxu1 %v8142_v0 }
 0x647   : > { %v3625_v4 = vsel %vm2530_vm12, %v3613_v35, %v3615_v9 }
 0x648   : > { %v3582_v5 = vpop.permute.xlu1 %3581 }
 0x649   : > { %3828 = vmatpush2.bf16.msra.mxu0 %v3698_v45  ;;  %4445 = vmatpush2.bf16.msra.mxu1 %v7996_v12 }
 0x64a   : > { %3829 = vmatprep.subr.bf16.mxu0 %v3619_v54  ;;  %v3584_v14 = vpop.permute.xlu0 %3583  ;;  %4446 = vmatprep.subr.bf16.mxu1 %v8142_v0 }
 0x64b   : > { %v3588_v30 = vsel %vm2482_vm13, %v3582_v5, %v3584_v14 }
 0x64c   : > { %v3609_v21 = vpop.permute.xlu1 %3608 }
 0x64d   : > { %3830 = vmatpush2.bf16.msra.mxu0 %v3626_v2 }
 0x64e   : > { %3831 = vmatprep.subr.bf16.mxu0 %v3615_v9  ;;  %v3611_v11 = vpop.permute.xlu0 %3610 }
 0x64f   : > { %v3624_v8 = vsel %vm2530_vm12, %v3609_v21, %v3611_v11  ;;  %v3694_v31 = vsel %vm3593_vm3, %v3584_v14, %v3611_v11  ;;  %vm6324_vm12 = vcmask 326912  }
 0x650   : > { %v3690_v52 = vsel %vm3593_vm3, %v3588_v30, %v3624_v8  ;;  %v3578_v37 = vpop.permute.xlu1 %3577 }
 0x651   : > { %3832 = vmatpush2.bf16.msra.mxu0 %v3625_v4  ;;  %v7997_v4 = vld [vmem:[%s11589_s12 + $0x40] sm:$0xff]  }
 0x652   : > { %3833 = vmatprep.subr.bf16.mxu0 %v3694_v31  ;;  %v3580_v3 = vpop.permute.xlu0 %3579  ;;  %4447 = vmatpush2.bf16.msra.mxu1 %v7997_v4 }
 0x653   : > { %v3587_v63 = vsel %vm2482_vm13, %v3578_v37, %v3580_v3  ;;  %vm6331_vm13 = vcmask 392512  }
 0x655   : > { %3834 = vmatpush2.bf16.msra.mxu0 %v3690_v52 }
 0x656   : > { %3835 = vmatprep.subr.bf16.mxu0 %v3580_v3 }
 0x659   : > { %3836 = vmatpush2.bf16.msra.mxu0 %v3587_v63 }
 0x65c   : > { %3838 = vmatmul.mubr.bf16.vlgmr.msra.gmra.mxu0 %v7966_v61 }
 0x65d   : > { %6916 = vmatprep.mubr.msk.bf16.mxu0 %vm3777_vm7, %v7969_v6  ;;  %v3922_v25 = vpop.permute.xlu1 %3921 }
 0x65f   : > { %v3927_v58 = vpop.permute.xlu0 %3926 }
 0x661   : > { %v4026_v24 = vpop.permute.xlu1 %4025 }
 0x663   : > { %v4031_v44 = vpop.permute.xlu0 %4030 }
 0x664   : > { %3848 = vmatmul.mubr.bf16.gmra.mxu0 %v7971_v13 }
 0x665   : > { %6917 = vmatprep.mubr.msk.bf16.mxu0 %vm3777_vm7, %v7972_v50  ;;  %v3932_v39 = vpop.permute.xlu1 %3931 }
 0x667   : > { %v3937_v19 = vpop.permute.xlu0 %3936 }
 0x669   : > { %v4036_v48 = vpop.permute.xlu1 %4035 }
 0x66b   : > { %v4041_v26 = vpop.permute.xlu0 %4040 }
 0x66c   : > { %3858 = vmatmul.mubr.bf16.gmra.mxu0 %v7974_v28 }
 0x66d   : > { %6918 = vmatprep.mubr.msk.bf16.mxu0 %vm3777_vm7, %v7975_v20  ;;  %v3942_v43 = vpop.permute.xlu1 %3941 }
 0x66f   : > { %v10073_v54 = vpop.permute.xlu0 %3946 }
 0x671   : > { %v4046_v34 = vpop.permute.xlu1 %4045 }
 0x673   : > { %v4051_v11 = vpop.permute.xlu0 %4050 }
 0x674   : > { %3868 = vmatmul.mubr.bf16.gmra.mxu0 %v7977_v22 }
 0x675   : > { %6919 = vmatprep.mubr.msk.bf16.mxu0 %vm3777_vm7, %v7978_v18  ;;  %v3952_v6 = vpop.permute.xlu1 %3951 }
 0x677   : > { %v3957_v20 = vpop.permute.xlu0 %3956 }
 0x679   : > { %v4056_v33 = vpop.permute.xlu1 %4055 }
 0x67b   : > { %v4061_v41 = vpop.permute.xlu0 %4060 }
 0x67c   : > { %3878 = vmatmul.mubr.bf16.gmra.mxu0 %v7980_v38 }
 0x67d   : > { %6920 = vmatprep.mubr.msk.bf16.mxu0 %vm3777_vm7, %v7981_v15 }
 0x684   : > { %3888 = vmatmul.mubr.bf16.gmra.mxu0 %v7983_v1 }
 0x685   : > { %6921 = vmatprep.mubr.msk.bf16.mxu0 %vm3777_vm7, %v6913_v53  ;;  %vm6366_vm7 = vcmask 720512  }
 0x68c   : > { %3898 = vmatmul.mubr.bf16.gmra.mxu0 %v6912_v36 }
 0x71c   : > { %v3839_v17 = vpop.f32.mrf.mxu0 }
 0x71d   : > { %v3984_v42 = vmul.f32 %v3922_v25, %v3839_v17 }
 0x71e   : > { %v3841_v56 = vpop.f32.mrf.mxu0 }
 0x71f   : > { %v10075_v57 = vadd.f32 %v4026_v24, %v3984_v42  ;;  %v3985_v47 = vmul.f32 %v3922_v25, %v3841_v56  ;;  %v3967_v42 = vpop.permute.xlu0 %3966 }
 0x720   : > { %v3843_v46 = vpop.f32.mrf.mxu0 }
 0x721   : > { %v10078_v35 = vadd.f32 %v4026_v24, %v3985_v47  ;;  %v3986_v29 = vmul.f32 %v3927_v58, %v3843_v46  ;;  %v4114_v45 = vmax.f32 %v10075_v57, 0.0 }
 0x722   : > { %v3845_v9 = vpop.f32.mrf.mxu0 }
 0x723   : > { %v4115_v5 = vmax.f32 %v10078_v35, 0.0  ;;  %v10085_v14 = vadd.f32 %v4031_v44, %v3986_v29  ;;  %v3987_v2 = vmul.f32 %v3927_v58, %v3845_v9 }
 0x724   : > { %v3849_v21 = vpop.f32.mrf.mxu0 }
 0x725   : > { %v7569_v8 = vpack.i.bf16 %v4115_v5, %v4114_v45  ;;  %v10094_v31 = vadd.f32 %v4031_v44, %v3987_v2  ;;  %v3988_v30 = vmul.f32 %v3932_v39, %v3849_v21  ;;  %v4116_v3 = vmax.f32 %v10085_v14, 0.0 }
 0x726   : > { %v3851_v52 = vpop.f32.mrf.mxu0 }
 0x727   : > { %v4117_v37 = vmax.f32 %v10094_v31, 0.0  ;;  %v10099_v63 = vadd.f32 %v4036_v48, %v3988_v30  ;;  %v3989_v61 = vmul.f32 %v3932_v39, %v3851_v52  ;;  %7570 = vrot.lane.b32.xlu1 %v7569_v8, %s8143_s23  ;;  %v4071_v52 = vpop.permute.xlu0 %4070 }
 0x728   : > { %v3853_v13 = vpop.f32.mrf.mxu0 }
 0x729   : > { %v7574_v50 = vpack.i.bf16 %v4117_v37, %v4116_v3  ;;  %v10106_v28 = vadd.f32 %v4036_v48, %v3989_v61  ;;  %v3990_v0 = vmul.f32 %v3937_v19, %v3853_v13  ;;  %v4118_v18 = vmax.f32 %v10099_v63, 0.0 }
 0x72a   : > { %v3855_v22 = vpop.f32.mrf.mxu0 }
 0x72b   : > { %v4119_v38 = vmax.f32 %v10106_v28, 0.0  ;;  %v10110_v15 = vadd.f32 %v4041_v26, %v3990_v0  ;;  %v3991_v51 = vmul.f32 %v3937_v19, %v3855_v22  ;;  %7575 = vrot.lane.b32.xlu0 %v7574_v50, %s8143_s23  ;;  %v3962_v19 = vpop.permute.xlu1 %3961 }
 0x72c   : > { %v3859_v1 = vpop.f32.mrf.mxu0 }
 0x72d   : > { %v7579_v53 = vpack.i.bf16 %v4119_v38, %v4118_v18  ;;  %v10117_v36 = vadd.f32 %v4041_v26, %v3991_v51  ;;  %v3992_v23 = vmul.f32 %v3942_v43, %v3859_v1  ;;  %v4120_v7 = vmax.f32 %v10110_v15, 0.0 }
 0x72e   : > { %v3861_v60 = vpop.f32.mrf.mxu0 }
 0x72f   : > { %v4121_v55 = vmax.f32 %v10117_v36, 0.0  ;;  %v10121_v62 = vadd.f32 %v4046_v34, %v3992_v23  ;;  %v3993_v10 = vmul.f32 %v3942_v43, %v3861_v60  ;;  %7580 = vrot.lane.b32.xlu1 %v7579_v53, %s8143_s23  ;;  %v4066_v2 = vpop.permute.xlu1 %4065 }
 0x730   : > { %v3863_v32 = vpop.f32.mrf.mxu0 }
 0x731   : > { %v7584_v59 = vpack.i.bf16 %v4121_v55, %v4120_v7  ;;  %v10128_v16 = vadd.f32 %v4046_v34, %v3993_v10  ;;  %v3994_v27 = vmul.f32 %v10073_v54, %v3863_v32  ;;  %v4122_v58 = vmax.f32 %v10121_v62, 0.0 }
 0x732   : > { %v3865_v25 = vpop.f32.mrf.mxu0 }
 0x733   : > { %v4123_v24 = vmax.f32 %v10128_v16, 0.0  ;;  %v10133_v44 = vadd.f32 %v4051_v11, %v3994_v27  ;;  %v3995_v39 = vmul.f32 %v10073_v54, %v3865_v25  ;;  %7585 = vrot.lane.b32.xlu0 %v7584_v59, %s8143_s23  ;;  %v3972_v53 = vpop.permute.xlu1 %3971 }
 0x734   : > { %v3869_v48 = vpop.f32.mrf.mxu0 }
 0x735   : > { %v7589_v26 = vpack.i.bf16 %v4123_v24, %v4122_v58  ;;  %v10141_v43 = vadd.f32 %v4051_v11, %v3995_v39  ;;  %v3996_v17 = vmul.f32 %v3952_v6, %v3869_v48  ;;  %v4124_v56 = vmax.f32 %v10133_v44, 0.0 }
 0x736   : > { %v3871_v49 = vpop.f32.mrf.mxu0 }
 0x737   : > { %v4125_v47 = vmax.f32 %v10141_v43, 0.0  ;;  %v10145_v46 = vadd.f32 %v4056_v33, %v3996_v17  ;;  %v3997_v54 = vmul.f32 %v3952_v6, %v3871_v49  ;;  %7590 = vrot.lane.b32.xlu1 %v7589_v26, %s8143_s23  ;;  %v4076_v49 = vpop.permute.xlu1 %4075 }
 0x738   : > { %v3873_v29 = vpop.f32.mrf.mxu0 }
 0x739   : > { %v7594_v34 = vpack.i.bf16 %v4125_v47, %v4124_v56  ;;  %v10152_v9 = vadd.f32 %v4056_v33, %v3997_v54  ;;  %v3998_v12 = vmul.f32 %v3957_v20, %v3873_v29  ;;  %v4126_v21 = vmax.f32 %v10145_v46, 0.0 }
 0x73a   : > { %v3875_v11 = vpop.f32.mrf.mxu0 }
 0x73b   : > { %v4127_v4 = vmax.f32 %v10152_v9, 0.0  ;;  %v10156_v8 = vadd.f32 %v4061_v41, %v3998_v12  ;;  %v3999_v30 = vmul.f32 %v3957_v20, %v3875_v11  ;;  %7595 = vrot.lane.b32.xlu0 %v7594_v34, %s8143_s23 }
 0x73c   : > { %v3879_v61 = vpop.f32.mrf.mxu0 }
 0x73d   : > { %v7599_v6 = vpack.i.bf16 %v4127_v4, %v4126_v21  ;;  %v10163_v13 = vadd.f32 %v4061_v41, %v3999_v30  ;;  %v4000_v50 = vmul.f32 %v3962_v19, %v3879_v61  ;;  %v4128_v22 = vmax.f32 %v10156_v8, 0.0  ;;  %v3977_v41 = vpop.permute.xlu0 %3976 }
 0x73e   : > { %v3881_v0 = vpop.f32.mrf.mxu0 }
 0x73f   : > { %v4129_v51 = vmax.f32 %v10163_v13, 0.0  ;;  %v10167_v1 = vadd.f32 %v4066_v2, %v4000_v50  ;;  %v4001_v20 = vmul.f32 %v3962_v19, %v3881_v0  ;;  %7600 = vrot.lane.b32.xlu1 %v7599_v6, %s8143_s23 }
 0x740   : > { %v3883_v23 = vpop.f32.mrf.mxu0 }
 0x741   : > { %v7604_v33 = vpack.i.bf16 %v4129_v51, %v4128_v22  ;;  %v10174_v60 = vadd.f32 %v4066_v2, %v4001_v20  ;;  %v4002_v10 = vmul.f32 %v3967_v42, %v3883_v23  ;;  %v4130_v59 = vmax.f32 %v10167_v1, 0.0  ;;  %v4081_v2 = vpop.permute.xlu0 %4080  ;;  %v3982_v23 = vpop.permute.xlu1 %3981 }
 0x742   : > { %v3885_v32 = vpop.f32.mrf.mxu0 }
 0x743   : > { %v4131_v27 = vmax.f32 %v10174_v60, 0.0  ;;  %v10178_v25 = vadd.f32 %v4071_v52, %v4002_v10  ;;  %v4003_v39 = vmul.f32 %v3967_v42, %v3885_v32  ;;  %7605 = vrot.lane.b32.xlu0 %v7604_v33, %s8143_s23 }
 0x744   : > { %v3889_v19 = vpop.f32.mrf.mxu0 }
 0x745   : > { %v7609_v48 = vpack.i.bf16 %v4131_v27, %v4130_v59  ;;  %v10185_v26 = vadd.f32 %v4071_v52, %v4003_v39  ;;  %v4004_v17 = vmul.f32 %v3972_v53, %v3889_v19  ;;  %v4132_v29 = vmax.f32 %v10178_v25, 0.0  ;;  %v4086_v19 = vpop.permute.xlu0 %4085 }
 0x746   : > { %v3891_v54 = vpop.f32.mrf.mxu0 }
 0x747   : > { %v4133_v34 = vmax.f32 %v10185_v26, 0.0  ;;  %v10189_v12 = vadd.f32 %v4076_v49, %v4004_v17  ;;  %v4005_v42 = vmul.f32 %v3972_v53, %v3891_v54  ;;  %7610 = vrot.lane.b32.xlu1 %v7609_v48, %s8143_s23 }
 0x748   : > { %v3893_v11 = vpop.f32.mrf.mxu0 }
 0x749   : > { %v7614_v30 = vpack.i.bf16 %v4133_v34, %v4132_v29  ;;  %v10196_v52 = vadd.f32 %v4076_v49, %v4005_v42  ;;  %v4006_v61 = vmul.f32 %v3977_v41, %v3893_v11  ;;  %v4134_v50 = vmax.f32 %v10189_v12, 0.0 }
 0x74a   : > { %v3895_v6 = vpop.f32.mrf.mxu0 }
 0x74b   : > { %v4135_v0 = vmax.f32 %v10196_v52, 0.0  ;;  %v10200_v20 = vadd.f32 %v4081_v2, %v4006_v61  ;;  %v4007_v53 = vmul.f32 %v3977_v41, %v3895_v6  ;;  %7615 = vrot.lane.b32.xlu0 %v7614_v30, %s8143_s23 }
 0x74c   : > { %v3899_v33 = vpop.f32.mrf.mxu0 }
 0x74d   : > { %v7619_v10 = vpack.i.bf16 %v4135_v0, %v4134_v50  ;;  %v10207_v32 = vadd.f32 %v4081_v2, %v4007_v53  ;;  %v4008_v39 = vmul.f32 %v3982_v23, %v3899_v33  ;;  %v4136_v17 = vmax.f32 %v10200_v20, 0.0 }
 0x74e   : > { %v3901_v48 = vpop.f32.mrf.mxu0 }
 0x74f   : > { %v4137_v49 = vmax.f32 %v10207_v32, 0.0  ;;  %v10211_v54 = vadd.f32 %v4086_v19, %v4008_v39  ;;  %v4009_v41 = vmul.f32 %v3982_v23, %v3901_v48  ;;  %7620 = vrot.lane.b32.xlu1 %v7619_v10, %s8143_s23 }
 0x750   : > { %v3903_v42 = vpop.f32.mrf.mxu0 }
 0x751   : > { %v7624_v11 = vpack.i.bf16 %v4137_v49, %v4136_v17  ;;  %v10218_v2 = vadd.f32 %v4086_v19, %v4009_v41  ;;  %v11618_v61 = vmax.f32 %v10211_v54, 0.0 }
 0x752   : > { %v3904_v30 = vpop.f32.mrf.mxu0 }
 0x753   : > { %v11619_v6 = vmax.f32 %v10218_v2, 0.0  ;;  %7625 = vrot.lane.b32.xlu0 %v7624_v11, %s8143_s23 }
 0x755   : > { %v7629_v53 = vpack.i.bf16 %v11619_v6, %v11618_v61 }
 0x757   : > { %7630 = vrot.lane.b32.xlu1 %v7629_v53, %s8143_s23 }
 0x799   : > { %v7571_v23 = vpop.permute.xlu1 %7570 }
 0x79a   : > { %v7573_v33 = vunpack.i.h.bf16 %v7571_v23  ;;  %v7572_v10 = vunpack.i.l.bf16 %v7571_v23 }
 0x79c   : > { %v4218_v19 = vsel %vm1022_vm2, %v7572_v10, %v7573_v33  ;;  %v4258_v42 = vmax.f32 %v4115_v5, %v7573_v33 }
 0x79d   : > { %v7576_v39 = vpop.permute.xlu0 %7575  ;;  %v4257_v40 = vmax.f32 %v4114_v45, %v4218_v19 }
 0x79e   : > { %v7578_v48 = vunpack.i.h.bf16 %v7576_v39  ;;  %v7577_v41 = vunpack.i.l.bf16 %v7576_v39 }
 0x7a0   : > { %v4260_v11 = vmax.f32 %v4117_v37, %v7578_v48  ;;  %v4219_v30 = vsel %vm1022_vm2, %v7577_v41, %v7578_v48 }
 0x7a1   : > { %v4259_v53 = vmax.f32 %v4116_v3, %v4219_v30  ;;  %v7581_v23 = vpop.permute.xlu1 %7580 }
 0x7a2   : > { %v7583_v61 = vunpack.i.h.bf16 %v7581_v23  ;;  %v7582_v10 = vunpack.i.l.bf16 %v7581_v23  ;;  %v4284_v6 = vpack.c.bf16 %v4260_v11, %v4258_v42 }
 0x7a3   : > { %v4283_v39 = vpack.c.bf16 %v4259_v53, %v4257_v40 }
 0x7a4   : > { %6934 = vmatprep.mubr.msk.bf16.mxu1 %vm4389_vm0, %v4284_v6  ;;  %v4220_v37 = vsel %vm1022_vm2, %v7582_v10, %v7583_v61  ;;  %v4262_v57 = vmax.f32 %v4119_v38, %v7583_v61 }
 0x7a5   : > { %v7586_v35 = vpop.permute.xlu0 %7585  ;;  %4449 = vmatmul.mubr.bf16.vlgmr.msra.gmra.mxu1 %v4283_v39  ;;  %v4261_v40 = vmax.f32 %v4118_v18, %v4220_v37 }
 0x7a6   : > { %v7588_v5 = vunpack.i.h.bf16 %v7586_v35  ;;  %v7587_v31 = vunpack.i.l.bf16 %v7586_v35 }
 0x7a8   : > { %v4264_v45 = vmax.f32 %v4121_v55, %v7588_v5  ;;  %v4221_v14 = vsel %vm1022_vm2, %v7587_v31, %v7588_v5 }
 0x7a9   : > { %v7591_v3 = vpop.permute.xlu1 %7590  ;;  %v4263_v6 = vmax.f32 %v4120_v7, %v4221_v14 }
 0x7aa   : > { %v7593_v33 = vunpack.i.h.bf16 %v7591_v3  ;;  %v7592_v19 = vunpack.i.l.bf16 %v7591_v3  ;;  %v4286_v48 = vpack.c.bf16 %v4264_v45, %v4262_v57 }
 0x7ab   : > { %v4285_v41 = vpack.c.bf16 %v4263_v6, %v4261_v40 }
 0x7ac   : > { %6935 = vmatprep.mubr.msk.bf16.mxu1 %vm4389_vm0, %v4286_v48  ;;  %v4222_v55 = vsel %vm1022_vm2, %v7592_v19, %v7593_v33  ;;  %v4266_v61 = vmax.f32 %v4123_v24, %v7593_v33 }
 0x7ad   : > { %v7596_v28 = vpop.permute.xlu0 %7595  ;;  %4457 = vmatmul.mubr.bf16.gmra.mxu1 %v4285_v41  ;;  %v4265_v7 = vmax.f32 %v4122_v58, %v4222_v55 }
 0x7ae   : > { %v7598_v38 = vunpack.i.h.bf16 %v7596_v28  ;;  %v7597_v36 = vunpack.i.l.bf16 %v7596_v28 }
 0x7b0   : > { %v4268_v63 = vmax.f32 %v4125_v47, %v7598_v38  ;;  %v4223_v18 = vsel %vm1022_vm2, %v7597_v36, %v7598_v38  ;;  %v11655_v36 = vmax.f32 %v10218_v2, 0.0 }
 0x7b1   : > { %v7601_v15 = vpop.permute.xlu1 %7600  ;;  %v4267_v42 = vmax.f32 %v4124_v56, %v4223_v18 }
 0x7b2   : > { %v7603_v11 = vunpack.i.h.bf16 %v7601_v15  ;;  %v7602_v30 = vunpack.i.l.bf16 %v7601_v15  ;;  %v4288_v53 = vpack.c.bf16 %v4268_v63, %v4266_v61 }
 0x7b3   : > { %v4287_v23 = vpack.c.bf16 %v4267_v42, %v4265_v7 }
 0x7b4   : > { %6936 = vmatprep.mubr.msk.bf16.mxu1 %vm4389_vm0, %v4288_v53  ;;  %v4224_v47 = vsel %vm1022_vm2, %v7602_v30, %v7603_v11  ;;  %v4270_v10 = vmax.f32 %v4127_v4, %v7603_v11 }
 0x7b5   : > { %v7606_v16 = vpop.permute.xlu0 %7605  ;;  %4465 = vmatmul.mubr.bf16.gmra.mxu1 %v4287_v23  ;;  %v4269_v56 = vmax.f32 %v4126_v21, %v4224_v47 }
 0x7b6   : > { %v7608_v24 = vunpack.i.h.bf16 %v7606_v16  ;;  %v7607_v43 = vunpack.i.l.bf16 %v7606_v16 }
 0x7b8   : > { %v4272_v62 = vmax.f32 %v4129_v51, %v7608_v24  ;;  %v4225_v58 = vsel %vm1022_vm2, %v7607_v43, %v7608_v24 }
 0x7b9   : > { %v7611_v44 = vpop.permute.xlu1 %7610  ;;  %v4271_v39 = vmax.f32 %v4128_v22, %v4225_v58 }
 0x7ba   : > { %v7613_v35 = vunpack.i.h.bf16 %v7611_v44  ;;  %v7612_v5 = vunpack.i.l.bf16 %v7611_v44  ;;  %v4290_v31 = vpack.c.bf16 %v4272_v62, %v4270_v10 }
 0x7bb   : > { %v4289_v37 = vpack.c.bf16 %v4271_v39, %v4269_v56 }
 0x7bc   : > { %6937 = vmatprep.mubr.msk.bf16.mxu1 %vm4389_vm0, %v4290_v31  ;;  %v4226_v51 = vsel %vm1022_vm2, %v7612_v5, %v7613_v35  ;;  %v4274_v57 = vmax.f32 %v4131_v27, %v7613_v35 }
 0x7bd   : > { %v7616_v9 = vpop.permute.xlu0 %7615  ;;  %4473 = vmatmul.mubr.bf16.gmra.mxu1 %v4289_v37  ;;  %v4273_v22 = vmax.f32 %v4130_v59, %v4226_v51 }
 0x7be   : > { %v7618_v4 = vunpack.i.h.bf16 %v7616_v9  ;;  %v7617_v13 = vunpack.i.l.bf16 %v7616_v9 }
 0x7c0   : > { %v4276_v46 = vmax.f32 %v4133_v34, %v7618_v4  ;;  %v4227_v21 = vsel %vm1022_vm2, %v7617_v13, %v7618_v4 }
 0x7c1   : > { %v7621_v8 = vpop.permute.xlu1 %7620  ;;  %v4275_v45 = vmax.f32 %v4132_v29, %v4227_v21 }
 0x7c2   : > { %v7623_v14 = vunpack.i.h.bf16 %v7621_v8  ;;  %v7622_v3 = vunpack.i.l.bf16 %v7621_v8  ;;  %v4292_v40 = vpack.c.bf16 %v4276_v46, %v4274_v57 }
 0x7c3   : > { %v4291_v6 = vpack.c.bf16 %v4275_v45, %v4273_v22 }
 0x7c4   : > { %6938 = vmatprep.mubr.msk.bf16.mxu1 %vm4389_vm0, %v4292_v40  ;;  %v4228_v34 = vsel %vm1022_vm2, %v7622_v3, %v7623_v14  ;;  %v4278_v33 = vmax.f32 %v4135_v0, %v7623_v14 }
 0x7c5   : > { %v7626_v60 = vpop.permute.xlu0 %7625  ;;  %4481 = vmatmul.mubr.bf16.gmra.mxu1 %v4291_v6  ;;  %v4277_v29 = vmax.f32 %v4134_v50, %v4228_v34 }
 0x7c6   : > { %v7628_v27 = vunpack.i.h.bf16 %v7626_v60  ;;  %v7627_v26 = vunpack.i.l.bf16 %v7626_v60 }
 0x7c8   : > { %v4280_v1 = vmax.f32 %v4137_v49, %v7628_v27  ;;  %v4229_v59 = vsel %vm1022_vm2, %v7627_v26, %v7628_v27  ;;  %v11656_v49 = vmax.f32 %v10211_v54, 0.0 }
 0x7c9   : > { %v7631_v25 = vpop.permute.xlu1 %7630  ;;  %v4279_v19 = vmax.f32 %v4136_v17, %v4229_v59 }
 0x7ca   : > { %v7633_v48 = vunpack.i.h.bf16 %v7631_v25  ;;  %v7632_v41 = vunpack.i.l.bf16 %v7631_v25  ;;  %v4294_v28 = vpack.c.bf16 %v4280_v1, %v4278_v33 }
 0x7cb   : > { %v4293_v38 = vpack.c.bf16 %v4279_v19, %v4277_v29 }
 0x7cc   : > { %v4282_v52 = vmax.f32 %v11655_v36, %v7633_v48  ;;  %6939 = vmatprep.mubr.msk.bf16.mxu1 %vm4389_vm0, %v4294_v28  ;;  %v4230_v0 = vsel %vm1022_vm2, %v7632_v41, %v7633_v48  ;;  %vm4938_vm2 = vcmask 949248  }
 0x7cd   : > { %4489 = vmatmul.mubr.bf16.gmra.mxu1 %v4293_v38  ;;  %v4281_v12 = vmax.f32 %v11656_v49, %v4230_v0 }
 0x7ce   : > { %v4296_v32 = vpack.c.bf16 %v4282_v52, %v4282_v52  ;;  %v8000_v52 = vld [vmem:[%s11590_s13 + $0x4] ss:$16 sps:$4 sm:$0xff]  }
 0x7cf   : > { %v4295_v50 = vpack.c.bf16 %v4281_v12, %v4281_v12  ;;  %5013 = vmatprep.mubr.bf16.mxu0 %v8000_v52  ;;  %v5272_v52 = vld [vmem:[%s11591_s14 + $0x98] sm:$0xff] }
 0x7d0   : > { %6940 = vmatprep.mubr.msk.bf16.mxu1 %vm4389_vm0, %v4296_v32  ;;  %vm6373_vm0 = vcmask 786112  }
 0x7d5   : > { %4497 = vmatmul.mubr.bf16.gmra.mxu1 %v4295_v50 }
 0x865   : > { %v4450_v20 = vpop.f32.mrf.mxu1 }
 0x867   : > { %v4452_v17 = vpop.f32.mrf.mxu1 }
 0x869   : > { %v4453_v55 = vpop.f32.mrf.mxu1 }
 0x86a   : > { %v10300_v18 = vpack.c.bf16 %v4453_v55, %v4450_v20 }
 0x86b   : > { %v4455_v61 = vpop.f32.mrf.mxu1 }
 0x86c   : > { %v4518_v11 = vrot.slane %v10300_v18, 6  ;;  %v4550_v51 = vrot.slane %v10300_v18, 4  ;;  %v4582_v17 = vrot.slane %v10300_v18, 2 }
 0x86d   : > { %v4458_v63 = vpop.f32.mrf.mxu1 }
 0x86f   : > { %v4460_v2 = vpop.f32.mrf.mxu1 }
 0x871   : > { %v4461_v15 = vpop.f32.mrf.mxu1 }
 0x872   : > { %v10302_v7 = vpack.c.bf16 %v4461_v15, %v4458_v63 }
 0x873   : > { %v4463_v42 = vpop.f32.mrf.mxu1 }
 0x874   : > { %v4519_v54 = vrot.slane %v10302_v7, 6  ;;  %v4551_v47 = vrot.slane %v10302_v7, 4  ;;  %v4583_v50 = vrot.slane %v10302_v7, 2 }
 0x875   : > { %v4466_v30 = vpop.f32.mrf.mxu1 }
 0x876   : > { %v4520_v53 = vsel %vm2543_vm5, %v4518_v11, %v4519_v54  ;;  %v4552_v21 = vsel %vm2047_vm4, %v4550_v51, %v4551_v47  ;;  %v4584_v55 = vsel %vm2588_vm9, %v4582_v17, %v4583_v50 }
 0x877   : > { %4533 = vrot.lane.b32.xlu1 %v4520_v53, %s8143_s23  ;;  %v4468_v23 = vpop.f32.mrf.mxu1 }
 0x878   : > { %v5255_v23 = vld [vmem:[%s11591_s14 + $0x10] sm:$0xff] }
 0x879   : > { %v4469_v16 = vpop.f32.mrf.mxu1 }
 0x87a   : > { %v10308_v24 = vpack.c.bf16 %v4469_v16, %v4466_v30 }
 0x87b   : > { %v4471_v43 = vpop.f32.mrf.mxu1 }
 0x87c   : > { %v4553_v10 = vrot.slane %v10308_v24, 4  ;;  %v4521_v26 = vrot.slane %v10308_v24, 6  ;;  %v4585_v49 = vrot.slane %v10308_v24, 2  ;;  %v5430_v43 = vld [vmem:[%s11592_s15 + $0x10] sm:$0xff] }
 0x87d   : > { %v4474_v62 = vpop.f32.mrf.mxu1 }
 0x87e   : > { %v4554_v58 = vsel %vm2047_vm4, %v4551_v47, %v4553_v10  ;;  %v4522_v25 = vsel %vm2543_vm5, %v4519_v54, %v4521_v26  ;;  %v4586_v20 = vsel %vm2588_vm9, %v4583_v50, %v4585_v49  ;;  %v5428_v54 = vld [vmem:[%s11592_s15] sm:$0xff]  ;;  %v5254_v47 = vld [vmem:[%s11591_s14 + $0x8] sm:$0xff] }
 0x87f   : > { %4567 = vrot.lane.b32.xlu1 %v4554_v58, %s8146_s3  ;;  %v4476_v44 = vpop.f32.mrf.mxu1  ;;  %v5432_v58 = vld [vmem:[%s11592_s15 + $0x20] sm:$0xff]  ;;  %v5445_v50 = vld [vmem:[%s11592_s15 + $0x88] sm:$0xff] }
 0x880   : > { %v5256_v44 = vld [vmem:[%s11591_s14 + $0x18] sm:$0xff] }
 0x881   : > { %v4477_v56 = vpop.f32.mrf.mxu1 }
 0x882   : > { %v10314_v39 = vpack.c.bf16 %v4477_v56, %v4474_v62  ;;  %v5429_v62 = vld [vmem:[%s11592_s15 + $0x8] sm:$0xff]  ;;  %v5259_v56 = vld [vmem:[%s11591_s14 + $0x30] sm:$0xff] }
 0x883   : > { %v4479_v35 = vpop.f32.mrf.mxu1 }
 0x884   : > { %v4555_v5 = vrot.slane %v10314_v39, 4  ;;  %v4523_v40 = vrot.slane %v10314_v39, 6  ;;  %v4587_v36 = vrot.slane %v10314_v39, 2  ;;  %v5431_v35 = vld [vmem:[%s11592_s15 + $0x18] sm:$0xff] }
 0x885   : > { %v4482_v31 = vpop.f32.mrf.mxu1 }
 0x886   : > { %v4556_v37 = vsel %vm2047_vm4, %v4553_v10, %v4555_v5  ;;  %v4524_v32 = vsel %vm2543_vm5, %v4521_v26, %v4523_v40  ;;  %v4588_v12 = vsel %vm2588_vm9, %v4585_v49, %v4587_v36  ;;  %v5257_v10 = vld [vmem:[%s11591_s14 + $0x20] sm:$0xff]  ;;  %v5270_v49 = vld [vmem:[%s11591_s14 + $0x88] sm:$0xff] }
 0x887   : > { %4569 = vrot.lane.b32.xlu0 %v4556_v37, %s8146_s3  ;;  %v4484_v9 = vpop.f32.mrf.mxu1  ;;  %v5261_v37 = vld [vmem:[%s11591_s14 + $0x40] sm:$0xff] }
 0x888   : > { %v5433_v9 = vld [vmem:[%s11592_s15 + $0x28] sm:$0xff] }
 0x889   : > { %v4485_v4 = vpop.f32.mrf.mxu1 }
 0x88a   : > { %v10323_v46 = vpack.c.bf16 %v4485_v4, %v4482_v31  ;;  %v5258_v31 = vld [vmem:[%s11591_s14 + $0x28] sm:$0xff]  ;;  %v5436_v4 = vld [vmem:[%s11592_s15 + $0x40] sm:$0xff] }
 0x88b   : > { %4531 = vrot.lane.b32.xlu0 %v4518_v11, %s8143_s23  ;;  %v4487_v13 = vpop.f32.mrf.mxu1  ;;  %v5253_v11 = vld [vmem:[%s11591_s14] sm:$0xff] }
 0x88c   : > { %v4525_v45 = vrot.slane %v10323_v46, 6  ;;  %v4589_v41 = vrot.slane %v10323_v46, 2  ;;  %v4557_v30 = vrot.slane %v10323_v46, 4  ;;  %v5260_v13 = vld [vmem:[%s11591_s14 + $0x38] sm:$0xff] }
 0x88d   : > { %v4490_v57 = vpop.f32.mrf.mxu1 }
 0x88e   : > { %v4526_v27 = vsel %vm2543_vm5, %v4523_v40, %v4525_v45  ;;  %v4590_v0 = vsel %vm2588_vm9, %v4587_v36, %v4589_v41  ;;  %v4558_v16 = vsel %vm2047_vm4, %v4555_v5, %v4557_v30  ;;  %v5434_v5 = vld [vmem:[%s11592_s15 + $0x30] sm:$0xff]  ;;  %v5264_v40 = vld [vmem:[%s11591_s14 + $0x58] sm:$0xff] }
 0x88f   : > { %4565 = vrot.lane.b32.xlu0 %v4552_v21, %s8146_s3  ;;  %v4492_v8 = vpop.f32.mrf.mxu1  ;;  %v5438_v21 = vld [vmem:[%s11592_s15 + $0x50] sm:$0xff]  ;;  %v5268_v36 = vld [vmem:[%s11591_s14 + $0x78] sm:$0xff] }
 0x890   : > { %v5262_v8 = vld [vmem:[%s11591_s14 + $0x48] sm:$0xff] }
 0x891   : > { %v4493_v22 = vpop.f32.mrf.mxu1 }
 0x892   : > { %v10329_v3 = vpack.c.bf16 %v4493_v22, %v4490_v57  ;;  %v5435_v57 = vld [vmem:[%s11592_s15 + $0x38] sm:$0xff]  ;;  %v5265_v22 = vld [vmem:[%s11591_s14 + $0x60] sm:$0xff] }
 0x893   : > { %4563 = vrot.lane.b32.xlu0 %v4550_v51, %s8146_s3  ;;  %v4495_v14 = vpop.f32.mrf.mxu1  ;;  %v5263_v51 = vld [vmem:[%s11591_s14 + $0x50] sm:$0xff] }
 0x894   : > { %v4527_v33 = vrot.slane %v10329_v3, 6  ;;  %v4591_v19 = vrot.slane %v10329_v3, 2  ;;  %v4559_v2 = vrot.slane %v10329_v3, 4  ;;  %v5440_v14 = vld [vmem:[%s11592_s15 + $0x60] sm:$0xff] }
 0x895   : > { %v4498_v6 = vpop.f32.mrf.mxu1 }
 0x896   : > { %v10332_v60 = vpack.c.bf16 %v4498_v6, %v4498_v6  ;;  %v4592_v28 = vsel %vm2588_vm9, %v4589_v41, %v4591_v19  ;;  %v4528_v38 = vsel %vm2543_vm5, %v4525_v45, %v4527_v33  ;;  %v4560_v53 = vsel %vm2047_vm4, %v4557_v30, %v4559_v2  ;;  %v5437_v45 = vld [vmem:[%s11592_s15 + $0x48] sm:$0xff]  ;;  %v5267_v6 = vld [vmem:[%s11591_s14 + $0x70] sm:$0xff] }
 0x897   : > { %4539 = vrot.lane.b32.xlu0 %v4526_v27, %s8143_s23  ;;  %v4500_v34 = vpop.f32.mrf.mxu1  ;;  %v5439_v27 = vld [vmem:[%s11592_s15 + $0x58] sm:$0xff]  ;;  %v8036_v41 = vld [vmem:[%s11590_s13 + $0xc4] ss:$16 sps:$4 sm:$0xff]  }
 0x898   : > { %v4529_v1 = vrot.slane %v10332_v60, 6  ;;  %v4593_v61 = vrot.slane %v10332_v60, 2  ;;  %v4561_v63 = vrot.slane %v10332_v60, 4  ;;  %5061 = vmatprep.mubr.bf16.mxu1 %v8036_v41  ;;  %v8028_v41 = vld [vmem:[%s11590_s13 + $0x8c] ss:$16 sps:$4 sm:$0xff]  }
 0x899   : > { %v4501_v59 = vpop.f32.mrf.mxu1 }
 0x89a   : > { %v4530_v29 = vsel %vm2543_vm5, %v4527_v33, %v4529_v1  ;;  %v4594_v15 = vsel %vm2588_vm9, %v4591_v19, %v4593_v61  ;;  %v4562_v42 = vsel %vm2047_vm4, %v4559_v2, %v4561_v63  ;;  %v5442_v33 = vld [vmem:[%s11592_s15 + $0x70] sm:$0xff]  ;;  %v5266_v1 = vld [vmem:[%s11591_s14 + $0x68] sm:$0xff] }
 0x89b   : > { %4535 = vrot.lane.b32.xlu0 %v4522_v25, %s8143_s23  ;;  %4543 = vrot.lane.b32.xlu1 %v4530_v29, %s8143_s23  ;;  %v4502_v48 = vpop.f32.mrf.mxu1  ;;  %v5269_v29 = vld [vmem:[%s11591_s14 + $0x80] sm:$0xff]  ;;  %v5441_v19 = vld [vmem:[%s11592_s15 + $0x68] sm:$0xff] }
 0x89c   : > { %v5446_v2 = vld [vmem:[%s11592_s15 + $0x90] sm:$0xff] }
 0x89f   : > { %4605 = vrot.lane.b32.xlu0 %v4592_v28, %s11654_s1  ;;  %4541 = vrot.lane.b32.xlu1 %v4528_v38, %s8143_s23  ;;  %v5444_v38 = vld [vmem:[%s11592_s15 + $0x80] sm:$0xff] }
 0x8a3   : > { %4603 = vrot.lane.b32.xlu0 %v4590_v0, %s11654_s1  ;;  %4537 = vrot.lane.b32.xlu1 %v4524_v32, %s8143_s23  ;;  %v5443_v0 = vld [vmem:[%s11592_s15 + $0x78] sm:$0xff] }
 0x8a7   : > { %4601 = vrot.lane.b32.xlu0 %v4588_v12, %s11654_s1  ;;  %4627 = vrot.lane.b32.xlu1 %v10332_v60, %s11657_s24 }
 0x8ab   : > { %4599 = vrot.lane.b32.xlu0 %v4586_v20, %s11654_s1  ;;  %4625 = vrot.lane.b32.xlu1 %v10329_v3, %s11657_s24 }
 0x8af   : > { %4597 = vrot.lane.b32.xlu0 %v4584_v55, %s11654_s1  ;;  %4623 = vrot.lane.b32.xlu1 %v10323_v46, %s11657_s24  ;;  %v5271_v55 = vld [vmem:[%s11591_s14 + $0x90] sm:$0xff] }
 0x8b3   : > { %4595 = vrot.lane.b32.xlu0 %v4582_v17, %s11654_s1  ;;  %4621 = vrot.lane.b32.xlu1 %v10314_v39, %s11657_s24 }
 0x8b7   : > { %4615 = vrot.lane.b32.xlu0 %v10300_v18, %s11657_s24  ;;  %4619 = vrot.lane.b32.xlu1 %v10308_v24, %s11657_s24 }
 0x8bb   : > { %4607 = vrot.lane.b32.xlu0 %v4594_v15, %s11654_s1  ;;  %4575 = vrot.lane.b32.xlu1 %v4562_v42, %s8146_s3  ;;  %v5274_v42 = vld [vmem:[%s11591_s14 + $0xa8] sm:$0xff]  ;;  %s11666_s1 = sld [smem:[#allocation6_spill]] }
 0x8bf   : > { %5280 = vperm.xlu0 %7457, %v5253_v11   ;;  %4617 = vrot.lane.b32.xlu1 %v10302_v7, %s11657_s24 }
 0x8c1   : > { %s593_s26 = sand.u32 1, %s11666_s1   ;;  %s8150_s1 = smov [#allocation2]  }
 0x8c2   : > { %s594_s2 = scalar_lea.vmem [#allocation2], %s593_s26  ;;  %s6604_s20 = scalar_lea.sflag [#allocation3], %s593_s26 }
 0x8c3   : > { %5455 = vperm.xlu0 %7457, %v5428_v54   ;;  %4573 = vrot.lane.b32.xlu1 %v4560_v53, %s8146_s3  ;;  %v8003_v54 = vld [vmem:[%s11590_s13 + $0x24] ss:$16 sps:$4 sm:$0xff]   ;;  %s6616_s28 = sshll.u32 %s594_s2, 4  ;;  %s8084_s22 = sshll.u32 %s8150_s1, 4  ;;  %s6617_s28 = int_to_ptr.vmem [resolvable:$true] %s6616_s28  ;;  %s8085_s22 = int_to_ptr.vmem [resolvable:$false] %s8084_s22 }
 0x8c4   : > { %v8040_v53 = vld [vmem:[%s11590_s13 + $0xe4] ss:$16 sps:$4 sm:$0xff]   ;;  %s8080_s4 = scalar_lea.vmem %s6617_s28, 16  ;;  %s8086_s5 = scalar_lea.vmem %s8085_s22, 32 }
 0x8c5   : > { %p8081_p11 = scmp.ne.s32.totalorder %s6617_s28, %s8080_s4  ;;  %p8087_p0 = scmp.lt.s32.totalorder %s6617_s28, %s8085_s22 }
 0x8c6   : > { %p8088_p1 = scmp.lt.s32.totalorder %s8086_s5, %s8080_s4 }
 0x8c7   : > { %5290 = vperm.xlu0 %7457, %v5255_v23   ;;  %4571 = vrot.lane.b32.xlu1 %v4558_v16, %s8146_s3  ;;  %s11670_s3 = smov %s11669_s21  ;;  %p8082_p12 = pnand %p8081_p11, %p8289_p5 }
 0x8c8   : > { %p8089_p2 = por %p8088_p1, %p8087_p0 }
 0x8c9   : > { %p8083_p13 = pneg %p8082_p12 }
 0x8cb   : > { %5465 = vperm.xlu0 %7457, %v5430_v43   ;;  %5285 = vperm.xlu1 %7458, %v5254_v47   ;;  %v8006_v43 = vld [vmem:[%s11590_s13 + $0x44] ss:$16 sps:$4 sm:$0xff]   ;;  %p8090_p3 = pnand %p8089_p2, %p8083_p13 }
 0x8cf   : > { %5300 = vperm.xlu0 %7457, %v5257_v10   ;;  %5460 = vperm.xlu1 %7458, %v5429_v62   ;;  %v8044_v10 = vld [vmem:[%s11590_s13 + $0xe0] ss:$16 sps:$4 sm:$0xff]  }
 0x8d3   : > { %5475 = vperm.xlu0 %7457, %v5432_v58   ;;  %5295 = vperm.xlu1 %7458, %v5256_v44   ;;  %v8046_v58 = vld [vmem:[%s11590_s13 + $0x104] ss:$16 sps:$4 sm:$0xff]  }
 0x8d7   : > { %5310 = vperm.xlu0 %7457, %v5259_v56   ;;  %5470 = vperm.xlu1 %7458, %v5431_v35   ;;  %v8004_v56 = vld [vmem:[%s11590_s13 + $0x40] ss:$16 sps:$4 sm:$0xff]  }
 0x8db   : > { %5485 = vperm.xlu0 %7457, %v5434_v5   ;;  %5305 = vperm.xlu1 %7458, %v5258_v31   ;;  %v8009_v5 = vld [vmem:[%s11590_s13 + $0x64] ss:$16 sps:$4 sm:$0xff]   ;;  %v8050_v31 = vld [vmem:[%s11590_s13 + $0x100] ss:$16 sps:$4 sm:$0xff]  }
 0x8df   : > { %5320 = vperm.xlu0 %7457, %v5261_v37   ;;  %5480 = vperm.xlu1 %7458, %v5433_v9   ;;  %v8052_v37 = vld [vmem:[%s11590_s13 + $0x124] ss:$16 sps:$4 sm:$0xff]  }
 0x8e3   : > { %5495 = vperm.xlu0 %7457, %v5436_v4   ;;  %5315 = vperm.xlu1 %7458, %v5260_v13  }
 0x8e7   : > { %5330 = vperm.xlu0 %7457, %v5263_v51   ;;  %5490 = vperm.xlu1 %7458, %v5435_v57   ;;  %v8007_v51 = vld [vmem:[%s11590_s13 + $0x60] ss:$16 sps:$4 sm:$0xff]   ;;  %v8012_v57 = vld [vmem:[%s11590_s13 + $0x84] ss:$16 sps:$4 sm:$0xff]  }
 0x8e9   : > { %v4534_v26 = vpop.permute.xlu1 %4533 }
 0x8eb   : > { %5505 = vperm.xlu0 %7457, %v5438_v21   ;;  %5325 = vperm.xlu1 %7458, %v5262_v8   ;;  %v8056_v8 = vld [vmem:[%s11590_s13 + $0x120] ss:$16 sps:$4 sm:$0xff]  }
 0x8ef   : > { %5340 = vperm.xlu0 %7457, %v5265_v22   ;;  %5500 = vperm.xlu1 %7458, %v5437_v45   ;;  %v8058_v22 = vld [vmem:[%s11590_s13 + $0x144] ss:$16 sps:$4 sm:$0xff]  }
 0x8f1   : > { %v4568_v59 = vpop.permute.xlu1 %4567 }
 0x8f3   : > { %5515 = vperm.xlu0 %7457, %v5440_v14   ;;  %5335 = vperm.xlu1 %7458, %v5264_v40   ;;  %v8010_v40 = vld [vmem:[%s11590_s13 + $0x80] ss:$16 sps:$4 sm:$0xff]  }
 0x8f7   : > { %5350 = vperm.xlu0 %7457, %v5267_v6   ;;  %5510 = vperm.xlu1 %7458, %v5439_v27   ;;  %v8015_v6 = vld [vmem:[%s11590_s13 + $0xa4] ss:$16 sps:$4 sm:$0xff]   ;;  %v8062_v27 = vld [vmem:[%s11590_s13 + $0x140] ss:$16 sps:$4 sm:$0xff]  }
 0x8f9   : > { %v4570_v34 = vpop.permute.xlu0 %4569 }
 0x8fa   : > { %7097 = vmatprep.subr.bf16.mxu0 %v4570_v34  ;;  %7392 = vmatprep.subr.bf16.mxu1 %v4570_v34  ;;  %v8018_v34 = vld [vmem:[%s11590_s13 + $0xc] ss:$16 sps:$4 sm:$0xff]  }
 0x8fb   : > { %7098 = vmatpush3.bf16.msra.mxu0 %v4534_v26  ;;  %7400 = vmatpush3.bf16.msra.mxu1 %v4534_v26  ;;  %v8013_v26 = vld [vmem:[%s11590_s13 + $0xa0] ss:$16 sps:$4 sm:$0xff]  }
 0x8fc   : > { %5525 = vperm.xlu0 %7457, %v5442_v33   ;;  %5345 = vperm.xlu1 %7458, %v5266_v1   ;;  %v8016_v33 = vld [vmem:[%s11590_s13 + $0x8] ss:$16 sps:$4 sm:$0xff]   ;;  %v8019_v1 = vld [vmem:[%s11590_s13 + $0x2c] ss:$16 sps:$4 sm:$0xff]  }
 0x8fd   : > { %7099 = vmatprep.subr.bf16.mxu0 %v4568_v59  ;;  %7393 = vmatprep.subr.bf16.mxu1 %v4568_v59  ;;  %v4532_v25 = vpop.permute.xlu0 %4531  ;;  %v8021_v59 = vld [vmem:[%s11590_s13 + $0x28] ss:$16 sps:$4 sm:$0xff]  }
 0x8fe   : > { %v4637_v48 = vsel %vm2543_vm5, %v10332_v60, %v4532_v25  ;;  %v8022_v25 = vld [vmem:[%s11590_s13 + $0x4c] ss:$16 sps:$4 sm:$0xff]  }
 0x8ff   : > { %7100 = vmatpush3.bf16.msra.mxu0 %v4637_v48  ;;  %7401 = vmatpush3.bf16.msra.mxu1 %v4637_v48  ;;  %v8027_v48 = vld [vmem:[%s11590_s13 + $0x68] ss:$16 sps:$4 sm:$0xff]  }
 0x900   : > { %5360 = vperm.xlu0 %7457, %v5269_v29   ;;  %5520 = vperm.xlu1 %7458, %v5441_v19   ;;  %v8024_v29 = vld [vmem:[%s11590_s13 + $0x48] ss:$16 sps:$4 sm:$0xff]   ;;  %v8025_v19 = vld [vmem:[%s11590_s13 + $0x6c] ss:$16 sps:$4 sm:$0xff]  }
 0x901   : > { %v4566_v28 = vpop.permute.xlu0 %4565 }
 0x902   : > { %7101 = vmatprep.subr.bf16.mxu0 %v4566_v28  ;;  %7394 = vmatprep.subr.bf16.mxu1 %v4566_v28  ;;  %v8064_v28 = vld [vmem:[%s11590_s13 + $0x164] ss:$16 sps:$4 sm:$0xff]  }
 0x903   : > { %7102 = vmatpush3.bf16.msra.mxu0 %v10329_v3  ;;  %7402 = vmatpush3.bf16.msra.mxu1 %v10329_v3 }
 0x904   : > { %5535 = vperm.xlu0 %7457, %v5444_v38   ;;  %5355 = vperm.xlu1 %7458, %v5268_v36   ;;  %v8068_v38 = vld [vmem:[%s11590_s13 + $0x160] ss:$16 sps:$4 sm:$0xff]   ;;  %v8030_v36 = vld [vmem:[%s11590_s13 + $0x88] ss:$16 sps:$4 sm:$0xff]  }
 0x905   : > { %v4564_v60 = vpop.permute.xlu0 %4563 }
 0x908   : > { %5375 = vperm.xlu0 %7457, %v5272_v52   ;;  %5530 = vperm.xlu1 %7458, %v5443_v0   ;;  %v4695_v52 = vld [vmem:[%s11590_s13 + $0x180] sm:$0xff]  ;;  %v8033_v0 = vld [vmem:[%s11590_s13 + $0xa8] ss:$16 sps:$4 sm:$0xff]  }
 0x909   : > { %v4540_v32 = vpop.permute.xlu0 %4539 }
 0x90c   : > { %5365 = vperm.xlu1 %7458, %v5270_v49   ;;  %v6989_v49 = vcombine.low %v4695_v52, %v4695_v52 }
 0x90d   : > { %v4536_v3 = vpop.permute.xlu0 %4535  ;;  %v4544_v12 = vpop.permute.xlu1 %4543 }
 0x90e   : > { %v4641_v20 = vsel %vm2047_vm4, %v4544_v12, %v4564_v60  ;;  %v8031_v60 = vld [vmem:[%s11590_s13 + $0xac] ss:$16 sps:$4 sm:$0xff]   ;;  %v8039_v12 = vld [vmem:[%s11590_s13 + $0xc8] ss:$16 sps:$4 sm:$0xff]   ;;  %vm8149_vm4 = vmmov 0  }
 0x90f   : > { %7103 = vmatprep.subr.bf16.mxu0 %v4641_v20  ;;  %7395 = vmatprep.subr.bf16.mxu1 %v4641_v20  ;;  %v8045_v20 = vld [vmem:[%s11590_s13 + $0xe8] ss:$16 sps:$4 sm:$0xff]  }
 0x910   : > { %5540 = vperm.xlu1 %7458, %v5445_v50   ;;  %7104 = vmatpush3.bf16.msra.mxu0 %v10323_v46  ;;  %v8042_v50 = vld [vmem:[%s11590_s13 + $0xec] ss:$16 sps:$4 sm:$0xff]  }
 0x911   : > { %7403 = vmatpush3.bf16.msra.mxu1 %v10323_v46  ;;  %v4542_v17 = vpop.permute.xlu1 %4541  ;;  %v4606_v61 = vpop.permute.xlu0 %4605 }
 0x912   : > { %7105 = vmatprep.subr.bf16.mxu0 %v4542_v17  ;;  %7396 = vmatprep.subr.bf16.mxu1 %v4542_v17  ;;  %v8048_v17 = vld [vmem:[%s11590_s13 + $0x10c] ss:$16 sps:$4 sm:$0xff]  }
 0x914   : > { %5370 = vperm.xlu1 %7458, %v5271_v55   ;;  %7106 = vmatpush3.bf16.msra.mxu0 %v10314_v39  ;;  %v8051_v55 = vld [vmem:[%s11590_s13 + $0x108] ss:$16 sps:$4 sm:$0xff]  }
 0x915   : > { %7404 = vmatpush3.bf16.msra.mxu1 %v10314_v39  ;;  %7107 = vmatprep.subr.bf16.mxu0 %v4540_v32  ;;  %v4538_v63 = vpop.permute.xlu1 %4537  ;;  %v4604_v46 = vpop.permute.xlu0 %4603 }
 0x916   : > { %7397 = vmatprep.subr.bf16.mxu1 %v4540_v32  ;;  %v6990_v32 = vcombine.high %v4695_v52, %v4695_v52 }
 0x918   : > { %5545 = vperm.xlu1 %7458, %v5446_v2   ;;  %7108 = vmatpush3.bf16.msra.mxu0 %v10308_v24  ;;  %v8060_v2 = vld [vmem:[%s11590_s13 + $0x14c] ss:$16 sps:$4 sm:$0xff]  }
 0x919   : > { %7405 = vmatpush3.bf16.msra.mxu1 %v10308_v24  ;;  %7109 = vmatprep.subr.bf16.mxu0 %v4538_v63  ;;  %v4628_v15 = vpop.permute.xlu1 %4627  ;;  %v4602_v11 = vpop.permute.xlu0 %4601  ;;  %v7998_v24 = vld [vmem:[%s11590_s13] ss:$16 sps:$4 sm:$0xff]  }
 0x91a   : > { %7398 = vmatprep.subr.bf16.mxu1 %v4538_v63  ;;  %v8057_v63 = vld [vmem:[%s11590_s13 + $0x128] ss:$16 sps:$4 sm:$0xff]  }
 0x91c   : > { %5385 = vperm.xlu1 %7458, %v5274_v42   ;;  %7110 = vmatpush3.bf16.msra.mxu0 %v10302_v7  ;;  %v4696_v42 = vld [vmem:[%s11590_s13 + $0x188] sm:$0xff] }
 0x91d   : > { %7406 = vmatpush3.bf16.msra.mxu1 %v10302_v7  ;;  %7111 = vmatprep.subr.bf16.mxu0 %v4536_v3  ;;  %v4626_v39 = vpop.permute.xlu1 %4625  ;;  %v8034_v7 = vld [vmem:[%s11590_s13 + $0xc0] ss:$16 sps:$4 sm:$0xff]   ;;  %v4600_v23 = vpop.permute.xlu0 %4599 }
 0x91e   : > { %7399 = vmatprep.subr.bf16.mxu1 %v4536_v3  ;;  %v8037_v3 = vld [vmem:[%s11590_s13 + $0xcc] ss:$16 sps:$4 sm:$0xff]  }
 0x920   : > { %7112 = vmatpush3.bf16.msra.mxu0 %v10300_v18 }
 0x921   : > { %7407 = vmatpush3.bf16.msra.mxu1 %v10300_v18  ;;  %7408 = vmatprep.subr.msk.bf16.mxu0 %vm2543_vm5, %v4628_v15  ;;  %v4624_v30 = vpop.permute.xlu1 %4623  ;;  %v8001_v18 = vld [vmem:[%s11590_s13 + $0x20] ss:$16 sps:$4 sm:$0xff]   ;;  %v4598_v62 = vpop.permute.xlu0 %4597  ;;  %v8066_v15 = vld [vmem:[%s11590_s13 + $0x16c] ss:$16 sps:$4 sm:$0xff]  }
 0x923   : > { %5014 = vmatmul.mubr.bf16.vlgmr.msra.gmra.mxu0 %v7998_v24  ;;  %v6991_v24 = vcombine.low %v4696_v42, %v4696_v42 }
 0x924   : > { %7192 = vmatpush3.bf16.msra.mxu0 %v4606_v61  ;;  %5021 = vmatprep.mubr.bf16.mxu0 %v8003_v54  ;;  %v8054_v61 = vld [vmem:[%s11590_s13 + $0x12c] ss:$16 sps:$4 sm:$0xff]  }
 0x925   : > { %7193 = vmatprep.subr.bf16.mxu0 %v4626_v39  ;;  %v4622_v16 = vpop.permute.xlu1 %4621  ;;  %5062 = vmatmul.mubr.bf16.vlgmr.msra.gmra.mxu1 %v8034_v7  ;;  %v4596_v35 = vpop.permute.xlu0 %4595  ;;  %v8069_v39 = vld [vmem:[%s11590_s13 + $0x168] ss:$16 sps:$4 sm:$0xff]  }
 0x926   : > { %5069 = vmatprep.mubr.bf16.mxu1 %v8040_v53 }
 0x928   : > { %7194 = vmatpush3.bf16.msra.mxu0 %v4604_v46  ;;  %v8063_v46 = vld [vmem:[%s11590_s13 + $0x148] ss:$16 sps:$4 sm:$0xff]  }
 0x929   : > { %7195 = vmatprep.subr.bf16.mxu0 %v4624_v30  ;;  %v4620_v47 = vpop.permute.xlu1 %4619  ;;  %v4616_v4 = vpop.permute.xlu0 %4615 }
 0x92b   : > { %5022 = vmatmul.mubr.bf16.gmra.mxu0 %v8001_v18 }
 0x92c   : > { %7196 = vmatpush3.bf16.msra.mxu0 %v4602_v11  ;;  %5029 = vmatprep.mubr.bf16.mxu0 %v8006_v43  ;;  %v6992_v11 = vcombine.high %v4696_v42, %v4696_v42 }
 0x92d   : > { %7197 = vmatprep.subr.bf16.mxu0 %v4622_v16  ;;  %v4576_v44 = vpop.permute.xlu1 %4575  ;;  %5070 = vmatmul.mubr.bf16.gmra.mxu1 %v8044_v10  ;;  %v4608_v45 = vpop.permute.xlu0 %4607  ;;  %v8074_v10 = vld [vmem:[%s11593_s16 + $0x28] ss:$0 sps:$4 sm:$0x77]  }
 0x92e   : > { %5077 = vmatprep.mubr.bf16.mxu1 %v8046_v58  ;;  %v4645_v13 = vsel %vm2588_vm9, %v4576_v44, %v4596_v35  ;;  %v11620_v35 = vmov 0.0   ;;  %vm6303_vm9 = vcmask 130112  }
 0x92f   : > { %7328 = vmatprep.subr.bf16.mxu1 %v11620_v35 }
 0x930   : > { %7198 = vmatpush3.bf16.msra.mxu0 %v4600_v23 }
 0x931   : > { %7199 = vmatprep.subr.bf16.mxu0 %v4620_v47  ;;  %v4618_v9 = vpop.permute.xlu1 %4617 }
 0x933   : > { %5030 = vmatmul.mubr.bf16.gmra.mxu0 %v8004_v56 }
 0x934   : > { %7200 = vmatpush3.bf16.msra.mxu0 %v4598_v62  ;;  %5037 = vmatprep.mubr.bf16.mxu0 %v8009_v5  ;;  %v11658_v62 = vmov 65535  }
 0x935   : > { %7201 = vmatprep.subr.bf16.mxu0 %v4618_v9  ;;  %5078 = vmatmul.mubr.bf16.gmra.mxu1 %v8050_v31  ;;  %v4574_v21 = vpop.permute.xlu1 %4573  ;;  %v5850_v58 = vsel %vm2543_vm5, 4294967295, %v11658_v62 }
 0x936   : > { %5085 = vmatprep.mubr.bf16.mxu1 %v8052_v37  ;;  %v5851_v5 = vsel %vm3593_vm3, %v5850_v58, 0  ;;  %vm6359_vm3 = vcmask 654912  }
 0x937   : > { %v5853_v31 = vand.u32 %v8074_v10, %v5851_v5 }
 0x938   : > { %7202 = vmatpush3.bf16.msra.mxu0 %v4645_v13 }
 0x939   : > { %7203 = vmatprep.subr.bf16.mxu0 %v4616_v4  ;;  %v4572_v14 = vpop.permute.xlu1 %4571  ;;  %7329 = vmatpush3.bf16.msra.mxu1 %v5853_v31  ;;  %v8075_v4 = vld [vmem:[%s11593_s16 + $0x20] sm:$0xff]  }
 0x93a   : > { %7330 = vmatprep.subr.bf16.mxu1 %v11620_v35 }
 0x93b   : > { %5038 = vmatmul.mubr.bf16.gmra.mxu0 %v8007_v51 }
 0x93c   : > { %7204 = vmatpush3.bf16.msra.mxu0 %v4574_v21  ;;  %5045 = vmatprep.mubr.bf16.mxu0 %v8012_v57 }
 0x93d   : > { %7205 = vmatprep.subr.bf16.mxu0 %v4608_v45  ;;  %5086 = vmatmul.mubr.bf16.gmra.mxu1 %v8056_v8  ;;  %v8076_v8 = vld [vmem:[%s11593_s16 + $0x18] sm:$0xff]  }
 0x93e   : > { %5093 = vmatprep.mubr.bf16.mxu1 %v8058_v22  ;;  %7331 = vmatpush3.bf16.msra.mxu1 %v8075_v4 }
 0x93f   : > { %7332 = vmatprep.subr.bf16.mxu1 %v11620_v35 }
 0x940   : > { %7206 = vmatpush3.bf16.msra.mxu0 %v4572_v14  ;;  %v5281_v14 = vpop.permute.xlu0 %5280 }
 0x942   : > { %7333 = vmatpush3.bf16.msra.mxu1 %v8076_v8 }
 0x943   : > { %5046 = vmatmul.mubr.bf16.gmra.mxu0 %v8010_v40  ;;  %7334 = vmatprep.subr.bf16.mxu1 %v11620_v35 }
 0x944   : > { %5053 = vmatprep.mubr.bf16.mxu0 %v8015_v6 }
 0x945   : > { %5094 = vmatmul.mubr.bf16.gmra.mxu1 %v8062_v27 }
 0x946   : > { %5101 = vmatprep.mubr.bf16.mxu1 %v8064_v28  ;;  %v10749_v27 = vpop.permute.xlu1 %5285 }
 0x94b   : > { %5054 = vmatmul.mubr.bf16.gmra.mxu0 %v8013_v26  ;;  %v8077_v26 = vld [vmem:[%s11593_s16 + $0x10] sm:$0xff]  }
 0x94c   : > { %6993 = vmatprep.mubr.msk.bf16.mxu0 %vm4938_vm2, %v8018_v34  ;;  %7335 = vmatpush3.bf16.msra.mxu1 %v8077_v26 }
 0x94d   : > { %5102 = vmatmul.mubr.bf16.gmra.mxu1 %v8068_v38  ;;  %7336 = vmatprep.subr.bf16.mxu1 %v11620_v35 }
 0x94e   : > { %5109 = vmatprep.mubr.bf16.mxu1 %v6990_v32 }
 0x953   : > { %5150 = vmatmul.mubr.bf16.vlgmr.msra.gmra.mxu0 %v8016_v33 }
 0x954   : > { %6994 = vmatprep.mubr.msk.bf16.mxu0 %vm4938_vm2, %v8019_v1 }
 0x955   : > { %5110 = vmatmul.mubr.bf16.gmra.mxu1 %v6989_v49 }
 0x95b   : > { %5158 = vmatmul.mubr.bf16.gmra.mxu0 %v8021_v59 }
 0x95c   : > { %6995 = vmatprep.mubr.msk.bf16.mxu0 %vm4938_vm2, %v8022_v25  ;;  %v5456_v25 = vpop.permute.xlu0 %5455 }
 0x963   : > { %5166 = vmatmul.mubr.bf16.gmra.mxu0 %v8024_v29  ;;  %v8078_v29 = vld [vmem:[%s11593_s16 + $0x8] sm:$0xff]  }
 0x964   : > { %6996 = vmatprep.mubr.msk.bf16.mxu0 %vm4938_vm2, %v8025_v19  ;;  %7337 = vmatpush3.bf16.msra.mxu1 %v8078_v29 }
 0x965   : > { %7338 = vmatprep.subr.bf16.mxu1 %v11620_v35 }
 0x96b   : > { %5174 = vmatmul.mubr.bf16.gmra.mxu0 %v8027_v48 }
 0x96c   : > { %6997 = vmatprep.mubr.msk.bf16.mxu0 %vm4938_vm2, %v8028_v41  ;;  %v5461_v41 = vpop.permute.xlu1 %5460 }
 0x973   : > { %5182 = vmatmul.mubr.bf16.gmra.mxu0 %v8030_v36 }
 0x974   : > { %6998 = vmatprep.mubr.msk.bf16.mxu0 %vm4938_vm2, %v8031_v60 }
 0x97b   : > { %5190 = vmatmul.mubr.bf16.gmra.mxu0 %v8033_v0  ;;  %v5291_v0 = vpop.permute.xlu0 %5290 }
 0x97c   : > { %6999 = vmatprep.mubr.msk.bf16.mxu0 %vm4938_vm2, %v8037_v3  ;;  %v5296_v3 = vpop.permute.xlu1 %5295 }
 0x983   : > { %5198 = vmatmul.mubr.bf16.gmra.mxu0 %v8039_v12 }
 0x984   : > { %7000 = vmatprep.mubr.msk.bf16.mxu0 %vm4938_vm2, %v8042_v50 }
 0x98b   : > { %5206 = vmatmul.mubr.bf16.gmra.mxu0 %v8045_v20 }
 0x98c   : > { %7001 = vmatprep.mubr.msk.bf16.mxu0 %vm4938_vm2, %v8048_v17 }
 0x993   : > { %5214 = vmatmul.mubr.bf16.gmra.mxu0 %v8051_v55 }
 0x994   : > { %7002 = vmatprep.mubr.msk.bf16.mxu0 %vm4938_vm2, %v8054_v61  ;;  %v5466_v61 = vpop.permute.xlu0 %5465 }
 0x998   : > { %v5301_v10 = vpop.permute.xlu0 %5300 }
 0x99b   : > { %5222 = vmatmul.mubr.bf16.gmra.mxu0 %v8057_v63 }
 0x99c   : > { %7003 = vmatprep.mubr.msk.bf16.mxu0 %vm4938_vm2, %v8060_v2  ;;  %v10800_v4 = vpop.permute.xlu0 %5475 }
 0x9a3   : > { %5230 = vmatmul.mubr.bf16.gmra.mxu0 %v8063_v46 }
 0x9a4   : > { %7004 = vmatprep.mubr.msk.bf16.mxu0 %vm4938_vm2, %v8066_v15  ;;  %v5471_v15 = vpop.permute.xlu1 %5470 }
 0x9a8   : > { %v10796_v58 = vpop.permute.xlu1 %5305 }
 0x9ab   : > { %5238 = vmatmul.mubr.bf16.gmra.mxu0 %v8069_v39 }
 0x9ac   : > { %7005 = vmatprep.mubr.msk.bf16.mxu0 %vm4938_vm2, %v6992_v11  ;;  %vm6380_vm2 = vcmask 851712  }
 0x9b3   : > { %5246 = vmatmul.mubr.bf16.gmra.mxu0 %v6991_v24 }
 0x9e3   : > { %v10692_v54 = vpop.f32.mrf.mxu0 }
 0x9e5   : > { %v10694_v30 = vpop.f32.mrf.mxu0  ;;  %v10696_v7 = vpop.f32.mrf.mxu1 }
 0x9e6   : > { %v7115_v26 = vadd.f32 %v10694_v30, %v10692_v54  ;;  %v8079_v54 = vld [vmem:[%s11593_s16] sm:$0xff]  }
 0x9e7   : > { %v10698_v53 = vpop.f32.mrf.mxu0  ;;  %v10700_v23 = vpop.f32.mrf.mxu1  ;;  %7339 = vmatpush3.bf16.msra.mxu1 %v8079_v54 }
 0x9e9   : > { %v10702_v16 = vpop.f32.mrf.mxu0  ;;  %v10704_v18 = vpop.f32.mrf.mxu1 }
 0x9eb   : > { %v10706_v43 = vpop.f32.mrf.mxu0  ;;  %v10708_v47 = vpop.f32.mrf.mxu1 }
 0x9ed   : > { %v10715_v44 = vpop.f32.mrf.mxu0  ;;  %v10717_v56 = vpop.f32.mrf.mxu1 }
 0x9ee   : > { %v7121_v30 = vadd.f32 %v10715_v44, %v10706_v43 }
 0x9ef   : > { %v10721_v37 = vpop.f32.mrf.mxu0  ;;  %v10723_v9 = vpop.f32.mrf.mxu1 }
 0x9f1   : > { %v10728_v13 = vpop.f32.mrf.mxu0  ;;  %v10730_v51 = vpop.f32.mrf.mxu1 }
 0x9f3   : > { %v10733_v57 = vpop.f32.mrf.mxu0  ;;  %v10735_v21 = vpop.f32.mrf.mxu1 }
 0x9f5   : > { %v10740_v22 = vpop.f32.mrf.mxu0  ;;  %v10742_v45 = vpop.f32.mrf.mxu1 }
 0x9f7   : > { %v10745_v40 = vpop.f32.mrf.mxu0  ;;  %v10747_v6 = vpop.f32.mrf.mxu1 }
 0x9f9   : > { %v10754_v34 = vpop.f32.mrf.mxu0  ;;  %v10756_v33 = vpop.f32.mrf.mxu1 }
 0x9fb   : > { %v10759_v1 = vpop.f32.mrf.mxu0  ;;  %v10761_v59 = vpop.f32.mrf.mxu1 }
 0x9fd   : > { %v10766_v19 = vpop.f32.mrf.mxu0  ;;  %v7167_v48 = vpop.f32.mrf.mxu1 }
 0x9ff   : > { %v10769_v28 = vpop.f32.mrf.mxu0  ;;  %v7168_v38 = vpop.f32.mrf.mxu1 }
 0xa00   : > { %v10771_v36 = vadd.f32 %v7168_v38, %v7167_v48  ;;  %v10804_v48 = vpop.permute.xlu1 %5480 }
 0xa01   : > { %v10773_v60 = vpop.f32.mrf.mxu0  ;;  %v7170_v52 = vpop.f32.mrf.mxu1 }
 0xa03   : > { %v10776_v32 = vpop.f32.mrf.mxu0  ;;  %v7171_v49 = vpop.f32.mrf.mxu1 }
 0xa04   : > { %v10778_v12 = vadd.f32 %v7171_v49, %v7170_v52 }
 0xa05   : > { %v10780_v50 = vpop.f32.mrf.mxu0  ;;  %v7173_v20 = vpop.f32.mrf.mxu1 }
 0xa06   : > { %11659 = vst [vmem:[#allocation14_spill] sm:$0xff] %v10778_v12 }
 0xa07   : > { %v10782_v17 = vpop.f32.mrf.mxu0  ;;  %v7174_v55 = vpop.f32.mrf.mxu1 }
 0xa08   : > { %v10784_v63 = vadd.f32 %v7174_v55, %v7173_v20  ;;  %v7118_v20 = vadd.f32 %v10702_v16, %v10698_v53 }
 0xa09   : > { %v10786_v2 = vpop.f32.mrf.mxu0  ;;  %v7176_v46 = vpop.f32.mrf.mxu1 }
 0xa0a   : > { %11660 = vst [vmem:[#allocation15_spill] sm:$0xff] %v10784_v63  ;;  %v10810_v63 = vpop.permute.xlu1 %5315 }
 0xa0b   : > { %v10788_v42 = vpop.f32.mrf.mxu0  ;;  %v7177_v39 = vpop.f32.mrf.mxu1 }
 0xa0c   : > { %v10790_v11 = vadd.f32 %v7177_v39, %v7176_v46  ;;  %v10808_v39 = vpop.permute.xlu0 %5310 }
 0xa0d   : > { %v10792_v24 = vpop.f32.mrf.mxu0 }
 0xa0e   : > { %11661 = vst [vmem:[#allocation16_spill] sm:$0xff] %v10790_v11 }
 0xa0f   : > { %v10794_v62 = vpop.f32.mrf.mxu0 }
 0xa11   : > { %v10798_v5 = vpop.f32.mrf.mxu0 }
 0xa13   : > { %v7207_v31 = vpop.f32.mrf.mxu0 }
 0xa15   : > { %v7208_v8 = vpop.f32.mrf.mxu0 }
 0xa16   : > { %v7209_v29 = vadd.f32 %v7208_v8, %v7207_v31 }
 0xa17   : > { %v7210_v38 = vpop.f32.mrf.mxu0 }
 0xa18   : > { %v5152_v52 = vadd.f32 %v7209_v29, %v7115_v26 }
 0xa19   : > { %v7211_v49 = vpop.f32.mrf.mxu0 }
 0xa1a   : > { %v5403_v55 = vmul.f32 %v5281_v14, %v5152_v52  ;;  %v7212_v46 = vadd.f32 %v7211_v49, %v7210_v38  ;;  %v11662_v14 = vmov 0.0   ;;  %v10824_v38 = vpop.permute.xlu0 %5485  ;;  %v7124_v52 = vadd.f32 %v10728_v13, %v10721_v37 }
 0xa1b   : > { %v7213_v35 = vpop.f32.mrf.mxu0  ;;  %7340 = vmatprep.mubr.msk.bf16.mxu1 %vm8149_vm4, %v11662_v14  ;;  %v7127_v37 = vadd.f32 %v10740_v22, %v10733_v57  ;;  %v7130_v57 = vadd.f32 %v10754_v34, %v10745_v40  ;;  %v7133_v34 = vadd.f32 %v10766_v19, %v10759_v1  ;;  %v5449_v1 = vld [vmem:[%s11592_s15 + $0xa8] sm:$0xff] }
 0xa1c   : > { %v5155_v11 = vadd.f32 %v7212_v46, %v7118_v20  ;;  %v10817_v31 = vadd.f32 %v5456_v25, %v5403_v55 }
 0xa1d   : > { %v7214_v12 = vpop.f32.mrf.mxu0 }
 0xa1e   : > { %v5404_v53 = vmul.f32 %v10749_v27, %v5155_v11  ;;  %v7215_v16 = vadd.f32 %v7214_v12, %v7213_v35  ;;  %v5603_v44 = vmax.f32 %v10817_v31, 0.0  ;;  %v10830_v12 = vpop.permute.xlu1 %5490 }
 0xa1f   : > { %v7216_v8 = vpop.f32.mrf.mxu0 }
 0xa20   : > { %v10822_v26 = vadd.f32 %v5461_v41, %v5404_v53  ;;  %v5160_v29 = vadd.f32 %v7215_v16, %v7121_v30  ;;  %v5447_v30 = vld [vmem:[%s11592_s15 + $0x98] sm:$0xff] }
 0xa21   : > { %v7217_v43 = vpop.f32.mrf.mxu0 }
 0xa22   : > { %v5604_v27 = vmax.f32 %v10822_v26, 0.0  ;;  %v5405_v35 = vmul.f32 %v5291_v0, %v5160_v29  ;;  %v7218_v25 = vadd.f32 %v7217_v43, %v7216_v8  ;;  %v10841_v0 = vpop.permute.xlu0 %5320  ;;  %v10848_v8 = vpop.permute.xlu1 %5325 }
 0xa23   : > { %v7219_v11 = vpop.f32.mrf.mxu0 }
 0xa24   : > { %v5163_v49 = vadd.f32 %v7218_v25, %v7124_v52  ;;  %v7634_v41 = vpack.i.bf16 %v5604_v27, %v5603_v44  ;;  %v10838_v13 = vadd.f32 %v5466_v61, %v5405_v35 }
 0xa25   : > { %v7220_v20 = vpop.f32.mrf.mxu0 }
 0xa26   : > { %v5406_v55 = vmul.f32 %v5296_v3, %v5163_v49  ;;  %v7221_v46 = vadd.f32 %v7220_v20, %v7219_v11  ;;  %7635 = vrot.lane.b32.xlu0 %v7634_v41, %s8143_s23  ;;  %v5605_v3 = vmax.f32 %v10838_v13, 0.0  ;;  %v10861_v40 = vpop.permute.xlu0 %5495  ;;  %v7179_v20 = vpop.f32.mrf.mxu1 }
 0xa27   : > { %v7222_v54 = vpop.f32.mrf.mxu0 }
 0xa28   : > { %v10846_v53 = vadd.f32 %v5471_v15, %v5406_v55  ;;  %v5168_v16 = vadd.f32 %v7221_v46, %v7127_v37  ;;  %v5273_v15 = vld [vmem:[%s11591_s14 + $0xa0] sm:$0xff]  ;;  %v10870_v37 = vpop.permute.xlu1 %5500 }
 0xa29   : > { %v7223_v22 = vpop.f32.mrf.mxu0  ;;  %v5448_v46 = vld [vmem:[%s11592_s15 + $0xa0] sm:$0xff] }
 0xa2a   : > { %v5606_v61 = vmax.f32 %v10846_v53, 0.0  ;;  %v5407_v29 = vmul.f32 %v5301_v10, %v5168_v16  ;;  %v7224_v52 = vadd.f32 %v7223_v22, %v7222_v54  ;;  %5550 = vperm.xlu0 %7457, %v5447_v30  }
 0xa2b   : > { %v7225_v43 = vpop.f32.mrf.mxu0 }
 0xa2c   : > { %v5171_v35 = vadd.f32 %v7224_v52, %v7130_v57  ;;  %v7639_v25 = vpack.i.bf16 %v5606_v61, %v5605_v3  ;;  %v10866_v10 = vadd.f32 %v10800_v4, %v5407_v29  ;;  %v7136_v4 = vadd.f32 %v10773_v60, %v10769_v28  ;;  %v7180_v29 = vpop.f32.mrf.mxu1  ;;  %v5331_v52 = vpop.permute.xlu0 %5330 }
 0xa2d   : > { %v7226_v11 = vpop.f32.mrf.mxu0 }
 0xa2e   : > { %v5408_v49 = vmul.f32 %v10796_v58, %v5171_v35  ;;  %v7227_v41 = vadd.f32 %v7226_v11, %v7225_v43  ;;  %5380 = vperm.xlu0 %7457, %v5273_v15   ;;  %7640 = vrot.lane.b32.xlu1 %v7639_v25, %s8143_s23  ;;  %v5607_v30 = vmax.f32 %v10866_v10, 0.0  ;;  %v10889_v15 = vadd.f32 %v7180_v29, %v7179_v20  ;;  %v7182_v35 = vpop.f32.mrf.mxu1 }
 0xa2f   : > { %v7228_v55 = vpop.f32.mrf.mxu0  ;;  %v7139_v25 = vadd.f32 %v10780_v50, %v10776_v32  ;;  %v5276_v32 = vld [vmem:[%s11591_s14 + $0xb8] sm:$0xff] }
 0xa30   : > { %v10879_v19 = vadd.f32 %v10804_v48, %v5408_v49  ;;  %v5176_v58 = vadd.f32 %v7227_v41, %v7133_v34  ;;  %v5275_v48 = vld [vmem:[%s11591_s14 + $0xb0] sm:$0xff]  ;;  %v7183_v20 = vpop.f32.mrf.mxu1 }
 0xa31   : > { %v7229_v54 = vpop.f32.mrf.mxu0  ;;  %v10910_v50 = vadd.f32 %v7183_v20, %v7182_v35 }
 0xa32   : > { %v5608_v16 = vmax.f32 %v10879_v19, 0.0  ;;  %v5409_v57 = vmul.f32 %v10808_v39, %v5176_v58  ;;  %v7230_v22 = vadd.f32 %v7229_v54, %v7228_v55  ;;  %5555 = vperm.xlu0 %7457, %v5448_v46   ;;  %5560 = vperm.xlu1 %7458, %v5449_v1   ;;  %v10895_v39 = vpop.permute.xlu1 %5335  ;;  %v5450_v46 = vld [vmem:[%s11592_s15 + $0xb0] sm:$0xff]  ;;  %v5506_v1 = vpop.permute.xlu0 %5505  ;;  %v7142_v58 = vadd.f32 %v10786_v2, %v10782_v17 }
 0xa33   : > { %v7231_v43 = vpop.f32.mrf.mxu0  ;;  %v7145_v2 = vadd.f32 %v10792_v24, %v10788_v42  ;;  %v5452_v42 = vld [vmem:[%s11592_s15 + $0xc0] sm:$0xff] }
 0xa34   : > { %v5179_v28 = vadd.f32 %v7230_v22, %v7136_v4  ;;  %v7644_v60 = vpack.i.bf16 %v5608_v16, %v5607_v30  ;;  %v10900_v11 = vadd.f32 %v10824_v38, %v5409_v57 }
 0xa35   : > { %v7232_v34 = vpop.f32.mrf.mxu0 }
 0xa36   : > { %v5410_v49 = vmul.f32 %v10810_v63, %v5179_v28  ;;  %v7233_v41 = vadd.f32 %v7232_v34, %v7231_v43  ;;  %5390 = vperm.xlu1 %7458, %v5275_v48   ;;  %7645 = vrot.lane.b32.xlu0 %v7644_v60, %s8143_s23  ;;  %v5609_v54 = vmax.f32 %v10900_v11, 0.0  ;;  %v7185_v43 = vpop.f32.mrf.mxu1  ;;  %v5511_v48 = vpop.permute.xlu1 %5510 }
 0xa37   : > { %v7234_v55 = vpop.f32.mrf.mxu0 }
 0xa38   : > { %v10913_v38 = vadd.f32 %v10830_v12, %v5410_v49  ;;  %v5184_v63 = vadd.f32 %v7233_v41, %v7139_v25  ;;  %v5451_v12 = vld [vmem:[%s11592_s15 + $0xb8] sm:$0xff]  ;;  %v7186_v49 = vpop.f32.mrf.mxu1  ;;  %v5341_v41 = vpop.permute.xlu0 %5340 }
 0xa39   : > { %v7235_v4 = vpop.f32.mrf.mxu0  ;;  %v10940_v24 = vadd.f32 %v7186_v49, %v7185_v43 }
 0xa3a   : > { %v5610_v57 = vmax.f32 %v10913_v38, 0.0  ;;  %v5411_v22 = vmul.f32 %v10841_v0, %v5184_v63  ;;  %v7236_v29 = vadd.f32 %v7235_v4, %v7234_v55  ;;  %5565 = vperm.xlu1 %7458, %v5450_v46   ;;  %5395 = vperm.xlu0 %7457, %v5276_v32   ;;  %v5277_v55 = vld [vmem:[%s11591_s14 + $0xc0] sm:$0xff]  ;;  %v7188_v46 = vpop.f32.mrf.mxu1  ;;  %v5346_v32 = vpop.permute.xlu1 %5345  ;;  %v7148_v63 = vadd.f32 %v10798_v5, %v10794_v62 }
 0xa3b   : > { %v7237_v28 = vpop.f32.mrf.mxu0 }
 0xa3c   : > { %v5187_v60 = vadd.f32 %v7236_v29, %v7142_v58  ;;  %v7649_v17 = vpack.i.bf16 %v5610_v57, %v5609_v54  ;;  %v10930_v35 = vadd.f32 %v10861_v40, %v5411_v22  ;;  %v7189_v43 = vpop.f32.mrf.mxu1  ;;  %v5516_v5 = vpop.permute.xlu0 %5515 }
 0xa3d   : > { %v7238_v0 = vpop.f32.mrf.mxu0 }
 0xa3e   : > { %v5412_v25 = vmul.f32 %v10848_v8, %v5187_v60  ;;  %v7239_v34 = vadd.f32 %v7238_v0, %v7237_v28  ;;  %5570 = vperm.xlu0 %7457, %v5451_v12   ;;  %7650 = vrot.lane.b32.xlu1 %v7649_v17, %s8143_s23  ;;  %v5611_v4 = vmax.f32 %v10930_v35, 0.0 }
 0xa3f   : > { %v7240_v20 = vpop.f32.mrf.mxu0 }
 0xa40   : > { %v10943_v40 = vadd.f32 %v10870_v37, %v5412_v25  ;;  %v5192_v8 = vadd.f32 %v7239_v34, %v7145_v2  ;;  %v7151_v37 = vadd.f32 %v10700_v23, %v10696_v7  ;;  %v5521_v25 = vpop.permute.xlu1 %5520  ;;  %v7154_v7 = vadd.f32 %v10708_v47, %v10704_v18  ;;  %v5351_v46 = vpop.permute.xlu0 %5350 }
 0xa41   : > { %v7241_v58 = vpop.f32.mrf.mxu0 }
 0xa42   : > { %v5612_v22 = vmax.f32 %v10943_v40, 0.0  ;;  %v5413_v29 = vmul.f32 %v5331_v52, %v5192_v8  ;;  %v7242_v28 = vadd.f32 %v7241_v58, %v7240_v20  ;;  %5400 = vperm.xlu0 %7457, %v5277_v55   ;;  %5575 = vperm.xlu1 %7458, %v5452_v42   ;;  %v7157_v58 = vadd.f32 %v10723_v9, %v10717_v56 }
 0xa43   : > { %v7243_v12 = vpop.f32.mrf.mxu0  ;;  %v7160_v56 = vadd.f32 %v10735_v21, %v10730_v51 }
 0xa44   : > { %v5195_v60 = vadd.f32 %v7242_v28, %v7148_v63  ;;  %v7654_v62 = vpack.i.bf16 %v5612_v22, %v5611_v4  ;;  %v10955_v2 = vadd.f32 %v5506_v1, %v5413_v29  ;;  %v5356_v29 = vpop.permute.xlu1 %5355  ;;  %v5526_v9 = vpop.permute.xlu0 %5525 }
 0xa45   : > { %v7244_v17 = vpop.f32.mrf.mxu0 }
 0xa46   : > { %v5414_v52 = vmul.f32 %v10895_v39, %v5195_v60  ;;  %v7245_v0 = vadd.f32 %v7244_v17, %v7243_v12  ;;  %7655 = vrot.lane.b32.xlu0 %v7654_v62, %s8143_s23  ;;  %v5613_v55 = vmax.f32 %v10955_v2, 0.0 }
 0xa47   : > { %v7246_v34 = vpop.f32.mrf.mxu0 }
 0xa48   : > { %v10959_v49 = vadd.f32 %v5511_v48, %v5414_v52  ;;  %v5200_v20 = vadd.f32 %v7245_v0, %v7151_v37  ;;  %v5531_v0 = vpop.permute.xlu1 %5530 }
 0xa49   : > { %v7247_v23 = vpop.f32.mrf.mxu0 }
 0xa4a   : > { %v5614_v42 = vmax.f32 %v10959_v49, 0.0  ;;  %v5415_v1 = vmul.f32 %v5341_v41, %v5200_v20  ;;  %v7248_v8 = vadd.f32 %v7247_v23, %v7246_v34  ;;  %v7163_v20 = vadd.f32 %v10747_v6, %v10742_v45 }
 0xa4b   : > { %v7249_v39 = vpop.f32.mrf.mxu0  ;;  %v7166_v45 = vadd.f32 %v10761_v59, %v10756_v33 }
 0xa4c   : > { %v5203_v63 = vadd.f32 %v7248_v8, %v7154_v7  ;;  %v7659_v48 = vpack.i.bf16 %v5614_v42, %v5613_v55  ;;  %v10971_v47 = vadd.f32 %v5516_v5, %v5415_v1  ;;  %v5361_v1 = vpop.permute.xlu0 %5360  ;;  %v5366_v6 = vpop.permute.xlu1 %5365 }
 0xa4d   : > { %v7250_v18 = vpop.f32.mrf.mxu0 }
 0xa4e   : > { %v5416_v28 = vmul.f32 %v5346_v32, %v5203_v63  ;;  %v7251_v43 = vadd.f32 %v7250_v18, %v7249_v39  ;;  %7660 = vrot.lane.b32.xlu1 %v7659_v48, %s8143_s23  ;;  %v5615_v62 = vmax.f32 %v10971_v47, 0.0 }
 0xa4f   : > { %v7252_v41 = vpop.f32.mrf.mxu0 }
 0xa50   : > { %v10974_v12 = vadd.f32 %v5521_v25, %v5416_v28  ;;  %v5208_v60 = vadd.f32 %v7251_v43, %v7157_v58 }
 0xa51   : > { %v7253_v37 = vpop.f32.mrf.mxu0 }
 0xa52   : > { %v5616_v17 = vmax.f32 %v10974_v12, 0.0  ;;  %v5417_v52 = vmul.f32 %v5351_v46, %v5208_v60  ;;  %v7254_v5 = vadd.f32 %v7253_v37, %v7252_v41  ;;  %v5536_v60 = vpop.permute.xlu0 %5535  ;;  %v5541_v37 = vpop.permute.xlu1 %5540 }
 0xa53   : > { %v7255_v32 = vpop.f32.mrf.mxu0 }
 0xa54   : > { %v5211_v34 = vadd.f32 %v7254_v5, %v7160_v56  ;;  %v7664_v25 = vpack.i.bf16 %v5616_v17, %v5615_v62  ;;  %v10986_v21 = vadd.f32 %v5526_v9, %v5417_v52 }
 0xa55   : > { %v7256_v51 = vpop.f32.mrf.mxu0 }
 0xa56   : > { %v5418_v7 = vmul.f32 %v5356_v29, %v5211_v34  ;;  %v7257_v23 = vadd.f32 %v7256_v51, %v7255_v32  ;;  %7665 = vrot.lane.b32.xlu0 %v7664_v25, %s8143_s23  ;;  %v5617_v58 = vmax.f32 %v10986_v21, 0.0 }
 0xa57   : > { %v7258_v8 = vpop.f32.mrf.mxu0 }
 0xa58   : > { %v10989_v46 = vadd.f32 %v5531_v0, %v5418_v7  ;;  %v5216_v39 = vadd.f32 %v7257_v23, %v7163_v20  ;;  %v11663_v7 = vld [vmem:[#allocation14_spill] sm:$0xff] }
 0xa59   : > { %v7259_v63 = vpop.f32.mrf.mxu0 }
 0xa5a   : > { %v5618_v48 = vmax.f32 %v10989_v46, 0.0  ;;  %v5419_v18 = vmul.f32 %v5361_v1, %v5216_v39  ;;  %v7260_v28 = vadd.f32 %v7259_v63, %v7258_v8 }
 0xa5b   : > { %v7261_v29 = vpop.f32.mrf.mxu0 }
 0xa5c   : > { %v5219_v43 = vadd.f32 %v7260_v28, %v7166_v45  ;;  %v7669_v41 = vpack.i.bf16 %v5618_v48, %v5617_v58  ;;  %v10999_v9 = vadd.f32 %v5536_v60, %v5419_v18 }
 0xa5d   : > { %v7262_v56 = vpop.f32.mrf.mxu0 }
 0xa5e   : > { %v5420_v33 = vmul.f32 %v5366_v6, %v5219_v43  ;;  %v7263_v59 = vadd.f32 %v7262_v56, %v7261_v29  ;;  %7670 = vrot.lane.b32.xlu1 %v7669_v41, %s8143_s23  ;;  %v5619_v34 = vmax.f32 %v10999_v9, 0.0  ;;  %v11665_v29 = vld [vmem:[#allocation16_spill] sm:$0xff] }
 0xa5f   : > { %v7264_v52 = vpop.f32.mrf.mxu0 }
 0xa60   : > { %v11002_v5 = vadd.f32 %v5541_v37, %v5420_v33  ;;  %v5224_v0 = vadd.f32 %v7263_v59, %v10771_v36  ;;  %v11664_v36 = vld [vmem:[#allocation15_spill] sm:$0xff] }
 0xa61   : > { %v7265_v32 = vpop.f32.mrf.mxu0 }
 0xa62   : > { %v5620_v20 = vmax.f32 %v11002_v5, 0.0  ;;  %v7266_v25 = vadd.f32 %v7265_v32, %v7264_v52 }
 0xa63   : > { %v7267_v51 = vpop.f32.mrf.mxu0 }
 0xa64   : > { %v5227_v23 = vadd.f32 %v7266_v25, %v11663_v7  ;;  %v7674_v1 = vpack.i.bf16 %v5620_v20, %v5619_v34 }
 0xa65   : > { %v7268_v8 = vpop.f32.mrf.mxu0 }
 0xa66   : > { %v7269_v39 = vadd.f32 %v7268_v8, %v7267_v51  ;;  %7675 = vrot.lane.b32.xlu0 %v7674_v1, %s8143_s23 }
 0xa67   : > { %v7270_v45 = vpop.f32.mrf.mxu0 }
 0xa68   : > { %v5232_v6 = vadd.f32 %v7269_v39, %v11664_v36  ;;  %v5371_v39 = vpop.permute.xlu1 %5370 }
 0xa69   : > { %v7271_v63 = vpop.f32.mrf.mxu0 }
 0xa6a   : > { %v7272_v18 = vadd.f32 %v7271_v63, %v7270_v45  ;;  %v5376_v45 = vpop.permute.xlu0 %5375 }
 0xa6b   : > { %v7273_v28 = vpop.f32.mrf.mxu0  ;;  %v5422_v31 = vmul.f32 %v5376_v45, %v5227_v23 }
 0xa6c   : > { %v5235_v43 = vadd.f32 %v7272_v18, %v11665_v29  ;;  %v5546_v36 = vpop.permute.xlu1 %5545 }
 0xa6d   : > { %v7274_v41 = vpop.f32.mrf.mxu0 }
 0xa6e   : > { %v7275_v60 = vadd.f32 %v7274_v41, %v7273_v28 }
 0xa6f   : > { %v7276_v56 = vpop.f32.mrf.mxu0 }
 0xa70   : > { %v5240_v33 = vadd.f32 %v7275_v60, %v10889_v15 }
 0xa71   : > { %v7277_v59 = vpop.f32.mrf.mxu0 }
 0xa72   : > { %v7278_v37 = vadd.f32 %v7277_v59, %v7276_v56 }
 0xa73   : > { %v7279_v52 = vpop.f32.mrf.mxu0 }
 0xa74   : > { %v5243_v32 = vadd.f32 %v7278_v37, %v10910_v50  ;;  %v5386_v50 = vpop.permute.xlu1 %5385 }
 0xa75   : > { %v7280_v25 = vpop.f32.mrf.mxu0 }
 0xa76   : > { %v7281_v51 = vadd.f32 %v7280_v25, %v7279_v52 }
 0xa77   : > { %v7282_v7 = vpop.f32.mrf.mxu0 }
 0xa78   : > { %v11018_v1 = vadd.f32 %v7281_v51, %v10940_v24  ;;  %v5421_v24 = vmul.f32 %v5371_v39, %v5224_v0 }
 0xa79   : > { %v7283_v8 = vpop.f32.mrf.mxu0 }
 0xa98   : > { %v7636_v63 = vpop.permute.xlu0 %7635 }
 0xa99   : > { %v7638_v18 = vunpack.i.h.bf16 %v7636_v63  ;;  %v7637_v28 = vunpack.i.l.bf16 %v7636_v63 }
 0xa9b   : > { %v5729_v15 = vmax.f32 %v5604_v27, %v7638_v18  ;;  %v5728_v29 = vmax.f32 %v5603_v44, %v7637_v28  ;;  %v11031_v44 = vadd.f32 %v5546_v36, %v5421_v24 }
 0xa9d   : > { %v5753_v41 = vpack.c.bf16 %v5729_v15, %v5728_v29  ;;  %v5621_v0 = vmax.f32 %v11031_v44, 0.0 }
 0xa9f   : > { %7341 = vmatmul.mubr.msk.bf16.vlgmr.msra.gmra.mxu1 %vm5810_vm6, %v5753_v41 }
 0xaa0   : > { %v7641_v60 = vpop.permute.xlu1 %7640  ;;  %7344 = vmatprep.mubr.msk.bf16.mxu1 %vm8149_vm4, %v11662_v14 }
 0xaa1   : > { %v7643_v56 = vunpack.i.h.bf16 %v7641_v60  ;;  %v7642_v59 = vunpack.i.l.bf16 %v7641_v60 }
 0xaa3   : > { %v5731_v37 = vmax.f32 %v5606_v61, %v7643_v56  ;;  %v5730_v26 = vmax.f32 %v5605_v3, %v7642_v59  ;;  %v5424_v61 = vmul.f32 %v5386_v50, %v5235_v43 }
 0xaa5   : > { %v5754_v27 = vpack.c.bf16 %v5731_v37, %v5730_v26  ;;  %v5551_v52 = vpop.permute.xlu0 %5550 }
 0xaa6   : > { %v11033_v25 = vadd.f32 %v5551_v52, %v5422_v31 }
 0xaa7   : > { %7345 = vmatmul.mubr.msk.bf16.gmra.mxu1 %vm5810_vm6, %v5754_v27 }
 0xaa8   : > { %v5622_v51 = vmax.f32 %v11033_v25, 0.0  ;;  %7348 = vmatprep.mubr.msk.bf16.mxu1 %vm8149_vm4, %v11662_v14 }
 0xaa9   : > { %v5381_v53 = vpop.permute.xlu0 %5380 }
 0xaaa   : > { %v7679_v13 = vpack.i.bf16 %v5622_v51, %v5621_v0  ;;  %v5423_v3 = vmul.f32 %v5381_v53, %v5232_v6 }
 0xaac   : > { %7680 = vrot.lane.b32.xlu1 %v7679_v13, %s8143_s23 }
 0xaad   : > { %v5556_v23 = vpop.permute.xlu0 %5555  ;;  %v5561_v7 = vpop.permute.xlu1 %5560 }
 0xaae   : > { %v11045_v8 = vadd.f32 %v5556_v23, %v5423_v3  ;;  %v11047_v39 = vadd.f32 %v5561_v7, %v5424_v61 }
 0xab0   : > { %v5623_v45 = vmax.f32 %v11045_v8, 0.0  ;;  %v5624_v36 = vmax.f32 %v11047_v39, 0.0 }
 0xab1   : > { %v7646_v63 = vpop.permute.xlu0 %7645  ;;  %v5391_v18 = vpop.permute.xlu1 %5390 }
 0xab2   : > { %v7684_v6 = vpack.i.bf16 %v5624_v36, %v5623_v45  ;;  %v7648_v28 = vunpack.i.h.bf16 %v7646_v63  ;;  %v7647_v15 = vunpack.i.l.bf16 %v7646_v63  ;;  %v5425_v60 = vmul.f32 %v5391_v18, %v5240_v33 }
 0xab4   : > { %v5733_v43 = vmax.f32 %v5608_v16, %v7648_v28  ;;  %v5732_v29 = vmax.f32 %v5607_v30, %v7647_v15  ;;  %7685 = vrot.lane.b32.xlu0 %v7684_v6, %s8143_s23 }
 0xab5   : > { %v5396_v50 = vpop.permute.xlu0 %5395  ;;  %v5566_v41 = vpop.permute.xlu1 %5565 }
 0xab6   : > { %v5755_v24 = vpack.c.bf16 %v5733_v43, %v5732_v29  ;;  %v5426_v56 = vmul.f32 %v5396_v50, %v5243_v32  ;;  %v11060_v59 = vadd.f32 %v5566_v41, %v5425_v60 }
 0xab8   : > { %7349 = vmatmul.mubr.msk.bf16.gmra.mxu1 %vm5810_vm6, %v5755_v24  ;;  %v5625_v16 = vmax.f32 %v11060_v59, 0.0  ;;  %v6016_v59 = vld [vmem:[%s11594_s17 + $0xc8] sm:$0xff] }
 0xab9   : > { %v5571_v37 = vpop.permute.xlu0 %5570  ;;  %v7651_v26 = vpop.permute.xlu1 %7650  ;;  %7352 = vmatprep.mubr.msk.bf16.mxu1 %vm8149_vm4, %v11662_v14 }
 0xaba   : > { %v11065_v19 = vadd.f32 %v5571_v37, %v5426_v56  ;;  %v7653_v10 = vunpack.i.h.bf16 %v7651_v26  ;;  %v7652_v30 = vunpack.i.l.bf16 %v7651_v26 }
 0xabc   : > { %v5626_v31 = vmax.f32 %v11065_v19, 0.0  ;;  %v5735_v33 = vmax.f32 %v5610_v57, %v7653_v10  ;;  %v5734_v32 = vmax.f32 %v5609_v54, %v7652_v30  ;;  %v5991_v19 = vld [vmem:[%s11594_s17] sm:$0xff] }
 0xabd   : > { %v5401_v27 = vpop.permute.xlu0 %5400  ;;  %v5576_v52 = vpop.permute.xlu1 %5575 }
 0xabe   : > { %v7689_v53 = vpack.i.bf16 %v5626_v31, %v5625_v16  ;;  %v5756_v13 = vpack.c.bf16 %v5735_v33, %v5734_v32  ;;  %v5427_v3 = vmul.f32 %v5401_v27, %v11018_v1 }
 0xac0   : > { %v11078_v61 = vadd.f32 %v5576_v52, %v5427_v3  ;;  %7353 = vmatmul.mubr.msk.bf16.gmra.mxu1 %vm5810_vm6, %v5756_v13  ;;  %7690 = vrot.lane.b32.xlu1 %v7689_v53, %s8143_s23  ;;  %v6017_v52 = vld [vmem:[%s11594_s17 + $0xd0] sm:$0xff] }
 0xac1   : > { %v7656_v38 = vpop.permute.xlu0 %7655  ;;  %7356 = vmatprep.mubr.msk.bf16.mxu1 %vm8149_vm4, %v11662_v14  ;;  %v7661_v23 = vpop.permute.xlu1 %7660 }
 0xac2   : > { %v5627_v11 = vmax.f32 %v11078_v61, 0.0  ;;  %v7658_v54 = vunpack.i.h.bf16 %v7656_v38  ;;  %v7657_v57 = vunpack.i.l.bf16 %v7656_v38  ;;  %v7663_v18 = vunpack.i.h.bf16 %v7661_v23 }
 0xac3   : > { %v7662_v6 = vunpack.i.l.bf16 %v7661_v23 }
 0xac4   : > { %v5737_v7 = vmax.f32 %v5612_v22, %v7658_v54  ;;  %v5736_v1 = vmax.f32 %v5611_v4, %v7657_v57  ;;  %5701 = vrot.lane.b32.xlu0 %v5627_v11, %s8143_s23  ;;  %v5739_v28 = vmax.f32 %v5614_v42, %v7663_v18  ;;  %v5993_v54 = vld [vmem:[%s11594_s17 + $0x10] sm:$0xff]  ;;  %v6018_v57 = vld [vmem:[%s11594_s17 + $0xd8] sm:$0xff] }
 0xac5   : > { %v5738_v40 = vmax.f32 %v5613_v55, %v7662_v6 }
 0xac6   : > { %v5757_v63 = vpack.c.bf16 %v5737_v7, %v5736_v1 }
 0xac7   : > { %v5758_v4 = vpack.c.bf16 %v5739_v28, %v5738_v40  ;;  %v5994_v28 = vld [vmem:[%s11594_s17 + $0x18] sm:$0xff]  ;;  %v6019_v40 = vld [vmem:[%s11594_s17 + $0xe0] sm:$0xff] }
 0xac8   : > { %7357 = vmatmul.mubr.msk.bf16.gmra.mxu1 %vm5810_vm6, %v5757_v63  ;;  %v7666_v35 = vpop.permute.xlu0 %7665 }
 0xac9   : > { %7360 = vmatprep.mubr.msk.bf16.mxu1 %vm8149_vm4, %v11662_v14  ;;  %v7668_v22 = vunpack.i.h.bf16 %v7666_v35  ;;  %v7667_v15 = vunpack.i.l.bf16 %v7666_v35 }
 0xacb   : > { %v5741_v43 = vmax.f32 %v5616_v17, %v7668_v22  ;;  %v5740_v29 = vmax.f32 %v5615_v62, %v7667_v15 }
 0xacd   : > { %v5759_v42 = vpack.c.bf16 %v5741_v43, %v5740_v29 }
 0xad0   : > { %7361 = vmatmul.mubr.msk.bf16.gmra.mxu1 %vm5810_vm6, %v5758_v4  ;;  %v7671_v49 = vpop.permute.xlu1 %7670 }
 0xad1   : > { %7364 = vmatprep.mubr.msk.bf16.mxu1 %vm8149_vm4, %v11662_v14  ;;  %v7673_v50 = vunpack.i.h.bf16 %v7671_v49  ;;  %v7672_v2 = vunpack.i.l.bf16 %v7671_v49 }
 0xad3   : > { %v5743_v55 = vmax.f32 %v5618_v48, %v7673_v50  ;;  %v5742_v41 = vmax.f32 %v5617_v58, %v7672_v2  ;;  %v5995_v50 = vld [vmem:[%s11594_s17 + $0x20] sm:$0xff]  ;;  %v6020_v2 = vld [vmem:[%s11594_s17 + $0xe8] sm:$0xff] }
 0xad5   : > { %v5760_v17 = vpack.c.bf16 %v5743_v55, %v5742_v41 }
 0xad8   : > { %7365 = vmatmul.mubr.msk.bf16.gmra.mxu1 %vm5810_vm6, %v5759_v42  ;;  %v7676_v12 = vpop.permute.xlu0 %7675 }
 0xad9   : > { %7368 = vmatprep.mubr.msk.bf16.mxu1 %vm8149_vm4, %v11662_v14  ;;  %v7678_v24 = vunpack.i.h.bf16 %v7676_v12  ;;  %v7677_v47 = vunpack.i.l.bf16 %v7676_v12 }
 0xadb   : > { %v5745_v62 = vmax.f32 %v5620_v20, %v7678_v24  ;;  %v5744_v60 = vmax.f32 %v5619_v34, %v7677_v47  ;;  %v5996_v24 = vld [vmem:[%s11594_s17 + $0x28] sm:$0xff]  ;;  %v6021_v47 = vld [vmem:[%s11594_s17 + $0xf0] sm:$0xff] }
 0xadd   : > { %v5761_v46 = vpack.c.bf16 %v5745_v62, %v5744_v60 }
 0xae0   : > { %7369 = vmatmul.mubr.msk.bf16.gmra.mxu1 %vm5810_vm6, %v5760_v17 }
 0xae1   : > { %7372 = vmatprep.mubr.msk.bf16.mxu1 %vm8149_vm4, %v11662_v14 }
 0xae8   : > { %7373 = vmatmul.mubr.msk.bf16.gmra.mxu1 %vm5810_vm6, %v5761_v46 }
 0xae9   : > { %7376 = vmatprep.mubr.msk.bf16.mxu1 %vm8149_vm4, %v11662_v14 }
 0xb1e   : > { %v7681_v21 = vpop.permute.xlu1 %7680 }
 0xb1f   : > { %v7683_v58 = vunpack.i.h.bf16 %v7681_v21  ;;  %v7682_v48 = vunpack.i.l.bf16 %v7681_v21 }
 0xb21   : > { %v5747_v56 = vmax.f32 %v5622_v51, %v7683_v58  ;;  %v5746_v37 = vmax.f32 %v5621_v0, %v7682_v48 }
 0xb23   : > { %v5762_v5 = vpack.c.bf16 %v5747_v56, %v5746_v37  ;;  %v5997_v56 = vld [vmem:[%s11594_s17 + $0x30] sm:$0xff]  ;;  %v6022_v37 = vld [vmem:[%s11594_s17 + $0xf8] sm:$0xff] }
 0xb25   : > { %7377 = vmatmul.mubr.msk.bf16.gmra.mxu1 %vm5810_vm6, %v5762_v5 }
 0xb26   : > { %v7686_v9 = vpop.permute.xlu0 %7685  ;;  %7380 = vmatprep.mubr.msk.bf16.mxu1 %vm8149_vm4, %v11662_v14 }
 0xb27   : > { %v7688_v34 = vunpack.i.h.bf16 %v7686_v9  ;;  %v7687_v20 = vunpack.i.l.bf16 %v7686_v9 }
 0xb29   : > { %v5749_v26 = vmax.f32 %v5624_v36, %v7688_v34  ;;  %v5748_v10 = vmax.f32 %v5623_v45, %v7687_v20 }
 0xb2b   : > { %v5763_v25 = vpack.c.bf16 %v5749_v26, %v5748_v10 }
 0xb2d   : > { %7381 = vmatmul.mubr.msk.bf16.gmra.mxu1 %vm5810_vm6, %v5763_v25  ;;  %v5998_v25 = vld [vmem:[%s11594_s17 + $0x38] sm:$0xff] }
 0xb2e   : > { %7384 = vmatprep.mubr.msk.bf16.mxu1 %vm8149_vm4, %v11662_v14 }
 0xb32   : > { %v7691_v44 = vpop.permute.xlu1 %7690 }
 0xb33   : > { %v7693_v0 = vunpack.i.h.bf16 %v7691_v44  ;;  %v7692_v51 = vunpack.i.l.bf16 %v7691_v44  ;;  %v6023_v44 = vld [vmem:[%s11594_s17 + $0x100] sm:$0xff] }
 0xb35   : > { %v5751_v30 = vmax.f32 %v5626_v31, %v7693_v0  ;;  %v5750_v33 = vmax.f32 %v5625_v16, %v7692_v51 }
 0xb36   : > { %v5702_v36 = vpop.permute.xlu0 %5701 }
 0xb37   : > { %v5764_v39 = vpack.c.bf16 %v5751_v30, %v5750_v33  ;;  %v5752_v8 = vmax.f32 %v5627_v11, %v5702_v36 }
 0xb39   : > { %7385 = vmatmul.mubr.msk.bf16.gmra.mxu1 %vm5810_vm6, %v5764_v39  ;;  %v5765_v45 = vpack.c.bf16 %v5752_v8, %v5752_v8  ;;  %v5999_v8 = vld [vmem:[%s11594_s17 + $0x40] sm:$0xff] }
 0xb3a   : > { %7388 = vmatprep.mubr.msk.bf16.mxu1 %vm8149_vm4, %v11662_v14  ;;  %v5992_v14 = vld [vmem:[%s11594_s17 + $0x8] sm:$0xff]  ;;  %vm6387_vm4 = vcmask 917312  }
 0xb41   : > { %7389 = vmatmul.mubr.msk.bf16.gmra.mxu1 %vm5810_vm6, %v5765_v45  ;;  %v6024_v45 = vld [vmem:[%s11594_s17 + $0x108] sm:$0xff]  ;;  %vm6394_vm6 = vcmask 982912  }
 0xb5f   : > { %v5889_v16 = vpop.f32.mrf.mxu1 }
 0xb60   : > { %v6041_v31 = vmul.f32 %v5991_v19, %v5889_v16  ;;  %v6066_v32 = vmul.f32 %v6016_v59, %v5889_v16 }
 0xb61   : > { %v7342_v27 = vpop.f32.mrf.mxu1 }
 0xb62   : > { %v6092_v53 = vsel %vm6091_vm8, %v6041_v31, 0.0  ;;  %v6167_v13 = vsel %vm6091_vm8, %v6066_v32, 0.0 }
 0xb63   : > { %v5892_v3 = vpop.f32.mrf.mxu1  ;;  %6093 = vadd.xlane.f32.xlu1 %v6092_v53  ;;  %6168 = vadd.xlane.f32.xlu0 %v6167_v13 }
 0xb64   : > { %v6042_v61 = vmul.f32 %v5992_v14, %v5892_v3  ;;  %v6067_v38 = vmul.f32 %v6017_v52, %v5892_v3  ;;  %v6000_v14 = vld [vmem:[%s11594_s17 + $0x48] sm:$0xff]  ;;  %v6025_v3 = vld [vmem:[%s11594_s17 + $0x110] sm:$0xff] }
 0xb65   : > { %v7343_v11 = vpop.f32.mrf.mxu1 }
 0xb66   : > { %v6170_v23 = vsel %vm6091_vm8, %v6067_v38, 0.0  ;;  %v6095_v7 = vsel %vm6091_vm8, %v6042_v61, 0.0 }
 0xb67   : > { %v5897_v1 = vpop.f32.mrf.mxu1  ;;  %6171 = vadd.xlane.f32.xlu1 %v6170_v23  ;;  %6096 = vadd.xlane.f32.xlu0 %v6095_v7  ;;  %v6001_v23 = vld [vmem:[%s11594_s17 + $0x50] sm:$0xff] }
 0xb68   : > { %v6043_v63 = vmul.f32 %v5993_v54, %v5897_v1  ;;  %v6068_v18 = vmul.f32 %v6018_v57, %v5897_v1 }
 0xb69   : > { %v7346_v6 = vpop.f32.mrf.mxu1 }
 0xb6a   : > { %v6173_v35 = vsel %vm6091_vm8, %v6068_v18, 0.0  ;;  %v6098_v4 = vsel %vm6091_vm8, %v6043_v63, 0.0  ;;  %v6026_v18 = vld [vmem:[%s11594_s17 + $0x118] sm:$0xff] }
 0xb6b   : > { %v5900_v22 = vpop.f32.mrf.mxu1  ;;  %6174 = vadd.xlane.f32.xlu1 %v6173_v35  ;;  %6099 = vadd.xlane.f32.xlu0 %v6098_v4  ;;  %v6002_v4 = vld [vmem:[%s11594_s17 + $0x58] sm:$0xff] }
 0xb6c   : > { %v6044_v15 = vmul.f32 %v5994_v28, %v5900_v22  ;;  %v6069_v43 = vmul.f32 %v6019_v40, %v5900_v22 }
 0xb6d   : > { %v7347_v29 = vpop.f32.mrf.mxu1 }
 0xb6e   : > { %v6176_v49 = vsel %vm6091_vm8, %v6069_v43, 0.0  ;;  %v6101_v42 = vsel %vm6091_vm8, %v6044_v15, 0.0 }
 0xb6f   : > { %6177 = vadd.xlane.f32.xlu1 %v6176_v49  ;;  %6102 = vadd.xlane.f32.xlu0 %v6101_v42  ;;  %v6027_v49 = vld [vmem:[%s11594_s17 + $0x120] sm:$0xff] }
 0xb78   : > { %v5905_v55 = vpop.f32.mrf.mxu1 }
 0xb79   : > { %v6045_v41 = vmul.f32 %v5995_v50, %v5905_v55  ;;  %v6070_v12 = vmul.f32 %v6020_v2, %v5905_v55 }
 0xb7a   : > { %v7350_v17 = vpop.f32.mrf.mxu1 }
 0xb7b   : > { %v6179_v62 = vsel %vm6091_vm8, %v6070_v12, 0.0  ;;  %v6104_v60 = vsel %vm6091_vm8, %v6045_v41, 0.0  ;;  %v6003_v41 = vld [vmem:[%s11594_s17 + $0x60] sm:$0xff] }
 0xb7c   : > { %v5908_v46 = vpop.f32.mrf.mxu1  ;;  %6180 = vadd.xlane.f32.xlu1 %v6179_v62  ;;  %6105 = vadd.xlane.f32.xlu0 %v6104_v60  ;;  %v6028_v62 = vld [vmem:[%s11594_s17 + $0x128] sm:$0xff] }
 0xb7d   : > { %v6046_v21 = vmul.f32 %v5996_v24, %v5908_v46  ;;  %v6071_v58 = vmul.f32 %v6021_v47, %v5908_v46 }
 0xb7e   : > { %v7351_v48 = vpop.f32.mrf.mxu1 }
 0xb7f   : > { %v6182_v5 = vsel %vm6091_vm8, %v6071_v58, 0.0  ;;  %v6107_v9 = vsel %vm6091_vm8, %v6046_v21, 0.0  ;;  %v6007_v21 = vld [vmem:[%s11594_s17 + $0x80] sm:$0xff] }
 0xb80   : > { %v5913_v34 = vpop.f32.mrf.mxu1  ;;  %6183 = vadd.xlane.f32.xlu1 %v6182_v5  ;;  %6108 = vadd.xlane.f32.xlu0 %v6107_v9 }
 0xb81   : > { %v6047_v20 = vmul.f32 %v5997_v56, %v5913_v34  ;;  %v6072_v26 = vmul.f32 %v6022_v37, %v5913_v34  ;;  %v6004_v56 = vld [vmem:[%s11594_s17 + $0x68] sm:$0xff]  ;;  %v6033_v34 = vld [vmem:[%s11594_s17 + $0x150] sm:$0xff] }
 0xb82   : > { %v7354_v10 = vpop.f32.mrf.mxu1 }
 0xb83   : > { %v6185_v0 = vsel %vm6091_vm8, %v6072_v26, 0.0  ;;  %v6110_v51 = vsel %vm6091_vm8, %v6047_v20, 0.0 }
 0xb84   : > { %v5916_v30 = vpop.f32.mrf.mxu1  ;;  %6186 = vadd.xlane.f32.xlu1 %v6185_v0  ;;  %6111 = vadd.xlane.f32.xlu0 %v6110_v51 }
 0xb85   : > { %v6048_v33 = vmul.f32 %v5998_v25, %v5916_v30  ;;  %v6073_v39 = vmul.f32 %v6023_v44, %v5916_v30  ;;  %v6029_v25 = vld [vmem:[%s11594_s17 + $0x130] sm:$0xff] }
 0xb86   : > { %v7355_v36 = vpop.f32.mrf.mxu1 }
 0xb87   : > { %v6188_v19 = vsel %vm6091_vm8, %v6073_v39, 0.0  ;;  %v6113_v59 = vsel %vm6091_vm8, %v6048_v33, 0.0  ;;  %v6005_v36 = vld [vmem:[%s11594_s17 + $0x70] sm:$0xff] }
 0xb88   : > { %v5921_v16 = vpop.f32.mrf.mxu1  ;;  %6189 = vadd.xlane.f32.xlu1 %v6188_v19  ;;  %6114 = vadd.xlane.f32.xlu0 %v6113_v59  ;;  %v6030_v19 = vld [vmem:[%s11594_s17 + $0x138] sm:$0xff] }
 0xb89   : > { %v6049_v31 = vmul.f32 %v5999_v8, %v5921_v16  ;;  %v6074_v32 = vmul.f32 %v6024_v45, %v5921_v16 }
 0xb8a   : > { %v7358_v27 = vpop.f32.mrf.mxu1 }
 0xb8b   : > { %v6191_v52 = vsel %vm6091_vm8, %v6074_v32, 0.0  ;;  %v6116_v53 = vsel %vm6091_vm8, %v6049_v31, 0.0  ;;  %v6032_v31 = vld [vmem:[%s11594_s17 + $0x148] sm:$0xff] }
 0xb8c   : > { %v5924_v13 = vpop.f32.mrf.mxu1  ;;  %6192 = vadd.xlane.f32.xlu1 %v6191_v52  ;;  %6117 = vadd.xlane.f32.xlu0 %v6116_v53 }
 0xb8d   : > { %v6050_v61 = vmul.f32 %v6000_v14, %v5924_v13  ;;  %v6075_v11 = vmul.f32 %v6025_v3, %v5924_v13  ;;  %v6008_v14 = vld [vmem:[%s11594_s17 + $0x88] sm:$0xff]  ;;  %v6006_v13 = vld [vmem:[%s11594_s17 + $0x78] sm:$0xff] }
 0xb8e   : > { %v7359_v38 = vpop.f32.mrf.mxu1 }
 0xb8f   : > { %v6119_v54 = vsel %vm6091_vm8, %v6050_v61, 0.0  ;;  %v6194_v63 = vsel %vm6091_vm8, %v6075_v11, 0.0  ;;  %v6031_v38 = vld [vmem:[%s11594_s17 + $0x140] sm:$0xff] }
 0xb90   : > { %v5929_v57 = vpop.f32.mrf.mxu1  ;;  %6120 = vadd.xlane.f32.xlu0 %v6119_v54 }
 0xb91   : > { %v6051_v1 = vmul.f32 %v6001_v23, %v5929_v57  ;;  %v6076_v40 = vmul.f32 %v6026_v18, %v5929_v57  ;;  %v6009_v23 = vld [vmem:[%s11594_s17 + $0x90] sm:$0xff] }
 0xb92   : > { %v7362_v7 = vpop.f32.mrf.mxu1 }
 0xb93   : > { %v6122_v35 = vsel %vm6091_vm8, %v6051_v1, 0.0  ;;  %v6197_v29 = vsel %vm6091_vm8, %v6076_v40, 0.0  ;;  %v6292_v7 = vlaneseq }
 0xb94   : > { %v5932_v6 = vpop.f32.mrf.mxu1  ;;  %6195 = vadd.xlane.f32.xlu0 %v6194_v63  ;;  %v6034_v63 = vld [vmem:[%s11594_s17 + $0x158] sm:$0xff] }
 0xb95   : > { %v6052_v43 = vmul.f32 %v6002_v4, %v5932_v6  ;;  %v6077_v2 = vmul.f32 %v6027_v49, %v5932_v6 }
 0xb96   : > { %v7363_v28 = vpop.f32.mrf.mxu1 }
 0xb97   : > { %v6125_v55 = vsel %vm6091_vm8, %v6052_v43, 0.0  ;;  %v6200_v47 = vsel %vm6091_vm8, %v6077_v2, 0.0  ;;  %v11297_v28 = vand.u32 127, %v6292_v7 }
 0xb98   : > { %6123 = vadd.xlane.f32.xlu0 %v6122_v35  ;;  %v5937_v22 = vpop.f32.mrf.mxu1 }
 0xb99   : > { %v6053_v24 = vmul.f32 %v6003_v41, %v5937_v22  ;;  %v6078_v58 = vmul.f32 %v6028_v62, %v5937_v22  ;;  %v6010_v22 = vld [vmem:[%s11594_s17 + $0x98] sm:$0xff]  ;;  %v6298_v43 = vadd.s32 4294967288, %v11297_v28  ;;  %v6035_v41 = vld [vmem:[%s11594_s17 + $0x160] sm:$0xff] }
 0xb9a   : > { %v7366_v15 = vpop.f32.mrf.mxu1 }
 0xb9b   : > { %v6128_v48 = vsel %vm6091_vm8, %v6053_v24, 0.0  ;;  %v6203_v26 = vsel %vm6091_vm8, %v6078_v58, 0.0  ;;  %v11303_v15 = vshrl.u32 %v6292_v7, 7 }
 0xb9c   : > { %6198 = vadd.xlane.f32.xlu0 %v6197_v29  ;;  %v5940_v42 = vpop.f32.mrf.mxu1 }
 0xb9d   : > { %v6054_v20 = vmul.f32 %v6004_v56, %v5940_v42  ;;  %v6079_v30 = vmul.f32 %v6029_v25, %v5940_v42  ;;  %v11316_v24 = vsub.s32 %v6298_v43, %v11303_v15 }
 0xb9e   : > { %v7367_v50 = vpop.f32.mrf.mxu1 }
 0xb9f   : > { %v6131_v33 = vsel %vm6091_vm8, %v6054_v20, 0.0  ;;  %v6206_v45 = vsel %vm6091_vm8, %v6079_v30, 0.0 }
 0xba0   : > { %6126 = vadd.xlane.f32.xlu0 %v6125_v55  ;;  %v5945_v12 = vpop.f32.mrf.mxu1  ;;  %v6305_v55 = vadd.s32 4294967280, %v11297_v28 }
 0xba1   : > { %v6055_v8 = vmul.f32 %v6005_v36, %v5945_v12  ;;  %v6080_v59 = vmul.f32 %v6030_v19, %v5945_v12  ;;  %v11313_v12 = vsub.s32 %v11297_v28, %v11303_v15 }
 0xba2   : > { %v7370_v17 = vpop.f32.mrf.mxu1  ;;  %v11320_v58 = vsub.s32 %v6305_v55, %v11303_v15 }
 0xba3   : > { %v6134_v16 = vsel %vm6091_vm8, %v6055_v8, 0.0  ;;  %v6209_v27 = vsel %vm6091_vm8, %v6080_v59, 0.0 }
 0xba4   : > { %6201 = vadd.xlane.f32.xlu0 %v6200_v47  ;;  %v5948_v60 = vpop.f32.mrf.mxu1 }
 0xba5   : > { %v6056_v3 = vmul.f32 %v6006_v13, %v5948_v60  ;;  %v6081_v11 = vmul.f32 %v6031_v38, %v5948_v60 }
 0xba6   : > { %v7371_v46 = vpop.f32.mrf.mxu1 }
 0xba7   : > { %v6137_v54 = vsel %vm6091_vm8, %v6056_v3, 0.0  ;;  %v6212_v57 = vsel %vm6091_vm8, %v6081_v11, 0.0 }
 0xba8   : > { %6129 = vadd.xlane.f32.xlu0 %v6128_v48  ;;  %v5953_v37 = vpop.f32.mrf.mxu1  ;;  %v6312_v48 = vadd.s32 4294967272, %v11297_v28 }
 0xba9   : > { %v6057_v5 = vmul.f32 %v6007_v21, %v5953_v37  ;;  %v6082_v32 = vmul.f32 %v6032_v31, %v5953_v37 }
 0xbaa   : > { %v7374_v9 = vpop.f32.mrf.mxu1  ;;  %v11339_v8 = vsub.s32 %v6312_v48, %v11303_v15 }
 0xbab   : > { %v6140_v10 = vsel %vm6091_vm8, %v6057_v5, 0.0  ;;  %v6215_v53 = vsel %vm6091_vm8, %v6082_v32, 0.0  ;;  %v6011_v5 = vld [vmem:[%s11594_s17 + $0xa0] sm:$0xff] }
 0xbac   : > { %6204 = vadd.xlane.f32.xlu0 %v6203_v26  ;;  %6141 = vadd.xlane.f32.xlu1 %v6140_v10  ;;  %v5956_v44 = vpop.f32.mrf.mxu1 }
 0xbad   : > { %v6083_v0 = vmul.f32 %v6033_v34, %v5956_v44  ;;  %v6058_v52 = vmul.f32 %v6008_v14, %v5956_v44 }
 0xbae   : > { %v7375_v51 = vpop.f32.mrf.mxu1 }
 0xbaf   : > { %v6218_v39 = vsel %vm6091_vm8, %v6083_v0, 0.0  ;;  %v6143_v61 = vsel %vm6091_vm8, %v6058_v52, 0.0 }
 0xbb0   : > { %6132 = vadd.xlane.f32.xlu0 %v6131_v33  ;;  %6219 = vadd.xlane.f32.xlu1 %v6218_v39  ;;  %v6036_v33 = vld [vmem:[%s11594_s17 + $0x168] sm:$0xff] }
 0xbb4   : > { %6207 = vadd.xlane.f32.xlu0 %v6206_v45 }
 0xbb8   : > { %6135 = vadd.xlane.f32.xlu0 %v6134_v16 }
 0xbbc   : > { %6210 = vadd.xlane.f32.xlu0 %v6209_v27  ;;  %v6012_v27 = vld [vmem:[%s11594_s17 + $0xa8] sm:$0xff] }
 0xbc0   : > { %6216 = vadd.xlane.f32.xlu0 %v6215_v53 }
 0xbc4   : > { %6144 = vadd.xlane.f32.xlu0 %v6143_v61 }
 0xbc8   : > { %6138 = vadd.xlane.f32.xlu0 %v6137_v54  ;;  %v6037_v54 = vld [vmem:[%s11594_s17 + $0x170] sm:$0xff] }
 0xbcc   : > { %6213 = vadd.xlane.f32.xlu0 %v6212_v57 }
 0xbe5   : > { %v5961_v1 = vpop.f32.mrf.mxu1 }
 0xbe6   : > { %v6059_v18 = vmul.f32 %v6009_v23, %v5961_v1  ;;  %v6084_v40 = vmul.f32 %v6034_v63, %v5961_v1  ;;  %v6319_v23 = vadd.s32 4294967264, %v11297_v28 }
 0xbe7   : > { %v7378_v6 = vpop.f32.mrf.mxu1 }
 0xbe8   : > { %v6146_v35 = vsel %vm6091_vm8, %v6059_v18, 0.0  ;;  %v6221_v2 = vsel %vm6091_vm8, %v6084_v40, 0.0  ;;  %v6013_v18 = vld [vmem:[%s11594_s17 + $0xb0] sm:$0xff]  ;;  %v11361_v40 = vsub.s32 %v6319_v23, %v11303_v15  ;;  %v6333_v23 = vadd.s32 4294967248, %v11297_v28 }
 0xbe9   : > { %6147 = vadd.xlane.f32.xlu1 %v6146_v35  ;;  %v5964_v4 = vpop.f32.mrf.mxu1  ;;  %v6326_v35 = vadd.s32 4294967256, %v11297_v28 }
 0xbea   : > { %v6060_v49 = vmul.f32 %v6010_v22, %v5964_v4  ;;  %v6085_v62 = vmul.f32 %v6035_v41, %v5964_v4 }
 0xbeb   : > { %v7379_v29 = vpop.f32.mrf.mxu1  ;;  %v11371_v41 = vsub.s32 %v6326_v35, %v11303_v15  ;;  %v6361_v35 = vadd.s32 4294967216, %v11297_v28 }
 0xbec   : > { %v6094_v42 = vpop.xlane.xlu1 %6093  ;;  %v6169_v50 = vpop.xlane.xlu0 %6168  ;;  %v6149_v21 = vsel %vm6091_vm8, %v6060_v49, 0.0  ;;  %v6224_v30 = vsel %vm6091_vm8, %v6085_v62, 0.0  ;;  %v6038_v29 = vld [vmem:[%s11594_s17 + $0x178] sm:$0xff] }
 0xbed   : > { %6222 = vadd.xlane.f32.xlu1 %v6221_v2  ;;  %v5969_v17 = vpop.f32.mrf.mxu1  ;;  %v6297_v56 = vrot.slane %v6094_v42, %v11313_v12  ;;  %v6450_v37 = vrot.slane %v6169_v50, %v11313_v12 }
 0xbee   : > { %v6061_v44 = vmul.f32 %v6011_v5, %v5969_v17  ;;  %v6086_v59 = vmul.f32 %v6036_v33, %v5969_v17 }
 0xbef   : > { %v7382_v47 = vpop.f32.mrf.mxu1 }
 0xbf0   : > { %v6172_v60 = vpop.xlane.xlu1 %6171  ;;  %v6097_v46 = vpop.xlane.xlu0 %6096  ;;  %v6152_v32 = vsel %vm6091_vm8, %v6061_v44, 0.0  ;;  %v6227_v11 = vsel %vm6091_vm8, %v6086_v59, 0.0 }
 0xbf1   : > { %v6454_v9 = vrot.slane %v6172_v60, %v11316_v24  ;;  %v6302_v34 = vrot.slane %v6097_v46, %v11316_v24  ;;  %6150 = vadd.xlane.f32.xlu1 %v6149_v21  ;;  %v5972_v20 = vpop.f32.mrf.mxu1  ;;  %v6014_v21 = vld [vmem:[%s11594_s17 + $0xb8] sm:$0xff] }
 0xbf2   : > { %v6062_v38 = vmul.f32 %v6012_v27, %v5972_v20  ;;  %v6087_v1 = vmul.f32 %v6037_v54, %v5972_v20 }
 0xbf3   : > { %v6455_v26 = vsel %vm6303_vm9, %v6454_v9, %v6450_v37  ;;  %v6304_v10 = vsel %vm6303_vm9, %v6302_v34, %v6297_v56  ;;  %v7383_v25 = vpop.f32.mrf.mxu1 }
 0xbf4   : > { %v6175_v0 = vpop.xlane.xlu1 %6174  ;;  %v6100_v51 = vpop.xlane.xlu0 %6099  ;;  %v6155_v63 = vsel %vm6091_vm8, %v6062_v38, 0.0  ;;  %v6230_v43 = vsel %vm6091_vm8, %v6087_v1, 0.0 }
 0xbf5   : > { %v6459_v39 = vrot.slane %v6175_v0, %v11320_v58  ;;  %v6309_v36 = vrot.slane %v6100_v51, %v11320_v58  ;;  %6225 = vadd.xlane.f32.xlu1 %v6224_v30  ;;  %v6015_v51 = vld [vmem:[%s11594_s17 + $0xc0] sm:$0xff] }
 0xbf7   : > { %v6460_v45 = vsel %vm6310_vm10, %v6459_v39, %v6455_v26  ;;  %v6311_v19 = vsel %vm6310_vm10, %v6309_v36, %v6304_v10  ;;  %v6039_v10 = vld [vmem:[%s11594_s17 + $0x180] sm:$0xff]  ;;  %v6040_v36 = vld [vmem:[%s11594_s17 + $0x188] sm:$0xff] }
 0xbf8   : > { %v6178_v16 = vpop.xlane.xlu1 %6177  ;;  %v6103_v31 = vpop.xlane.xlu0 %6102 }
 0xbf9   : > { %v6464_v14 = vrot.slane %v6178_v16, %v11339_v8  ;;  %v6316_v52 = vrot.slane %v6103_v31, %v11339_v8  ;;  %6153 = vadd.xlane.f32.xlu1 %v6152_v32  ;;  %v5977_v53 = vpop.f32.mrf.mxu1 }
 0xbfa   : > { %v6063_v22 = vmul.f32 %v6013_v18, %v5977_v53  ;;  %v6088_v17 = vmul.f32 %v6038_v29, %v5977_v53  ;;  %v6354_v18 = vadd.s32 4294967224, %v11297_v28  ;;  %v6375_v29 = vadd.s32 4294967200, %v11297_v28 }
 0xbfb   : > { %v6465_v13 = vsel %vm6317_vm11, %v6464_v14, %v6460_v45  ;;  %v6318_v3 = vsel %vm6317_vm11, %v6316_v52, %v6311_v19  ;;  %v7386_v61 = vpop.f32.mrf.mxu1 }
 0xbfc   : > { %v6158_v46 = vsel %vm6091_vm8, %v6063_v22, 0.0  ;;  %v6233_v26 = vsel %vm6091_vm8, %v6088_v17, 0.0  ;;  %v6368_v22 = vadd.s32 4294967208, %v11297_v28  ;;  %v6364_v17 = vsub.s32 %v6361_v35, %v11303_v15 }
 0xbfd   : > { %6228 = vadd.xlane.f32.xlu1 %v6227_v11  ;;  %v5980_v57 = vpop.f32.mrf.mxu1 }
 0xbfe   : > { %v6064_v9 = vmul.f32 %v6014_v21, %v5980_v57  ;;  %v6089_v44 = vmul.f32 %v6039_v10, %v5980_v57  ;;  %v6371_v21 = vsub.s32 %v6368_v22, %v11303_v15 }
 0xbff   : > { %v7387_v7 = vpop.f32.mrf.mxu1 }
 0xc00   : > { %v6161_v0 = vsel %vm6091_vm8, %v6064_v9, 0.0  ;;  %v6236_v39 = vsel %vm6091_vm8, %v6089_v44, 0.0  ;;  %v6340_v7 = vadd.s32 4294967240, %v11297_v28 }
 0xc01   : > { %6156 = vadd.xlane.f32.xlu1 %v6155_v63  ;;  %v5985_v6 = vpop.f32.mrf.mxu1  ;;  %v6347_v63 = vadd.s32 4294967232, %v11297_v28 }
 0xc02   : > { %v6065_v33 = vmul.f32 %v6015_v51, %v5985_v6  ;;  %v6090_v19 = vmul.f32 %v6040_v36, %v5985_v6 }
 0xc03   : > { %v7390_v4 = vpop.f32.mrf.mxu1 }
 0xc04   : > { %v6164_v59 = vsel %vm6091_vm8, %v6065_v33, 0.0  ;;  %v6239_v31 = vsel %vm6091_vm8, %v6090_v19, 0.0  ;;  %v11440_v4 = vsub.s32 %v6333_v23, %v11303_v15  ;;  %vm6401_vm8 = vcmask 1048512  }
 0xc05   : > { %v6181_v49 = vpop.xlane.xlu1 %6180  ;;  %v6106_v42 = vpop.xlane.xlu0 %6105  ;;  %6231 = vadd.xlane.f32.xlu1 %v6230_v43  ;;  %v11444_v43 = vsub.s32 %v6340_v7, %v11303_v15 }
 0xc06   : > { %v6469_v50 = vrot.slane %v6181_v49, %v11361_v40  ;;  %v6323_v2 = vrot.slane %v6106_v42, %v11361_v40  ;;  %v5988_v55 = vpop.f32.mrf.mxu1  ;;  %v11448_v49 = vsub.s32 %v6347_v63, %v11303_v15  ;;  %v6357_v42 = vsub.s32 %v6354_v18, %v11303_v15 }
 0xc08   : > { %v6470_v47 = vsel %vm6324_vm12, %v6469_v50, %v6465_v13  ;;  %v6325_v62 = vsel %vm6324_vm12, %v6323_v2, %v6318_v3  ;;  %v7391_v60 = vpop.f32.mrf.mxu1  ;;  %v7025_v13 = vld [vmem:[%s11595_s18] ss:$0 sm:$0xff]  ;;  %v6382_v50 = vadd.s32 4294967192, %v11297_v28 }
 0xc09   : > { %v6184_v48 = vpop.xlane.xlu1 %6183  ;;  %v6109_v56 = vpop.xlane.xlu0 %6108  ;;  %6159 = vadd.xlane.f32.xlu1 %v6158_v46 }
 0xc0a   : > { %v6474_v37 = vrot.slane %v6184_v48, %v11371_v41  ;;  %v6330_v5 = vrot.slane %v6109_v56, %v11371_v41  ;;  %v6385_v9 = vsub.s32 %v6382_v50, %v11303_v15 }
 0xc0c   : > { %v11382_v34 = vsel %vm6331_vm13, %v6474_v37, %v6470_v47  ;;  %v11385_v20 = vsel %vm6331_vm13, %v6330_v5, %v6325_v62  ;;  %v6389_v47 = vadd.s32 4294967184, %v11297_v28  ;;  %v6396_v62 = vadd.s32 4294967176, %v11297_v28 }
 0xc0d   : > { %v11391_v25 = vpop.xlane.xlu0 %6111  ;;  %6234 = vadd.xlane.f32.xlu1 %v6233_v26  ;;  %v6187_v54 = vpop.xlane.xlu1 %6186  ;;  %v6378_v37 = vsub.s32 %v6375_v29, %v11303_v15 }
 0xc0e   : > { %v6479_v60 = vrot.slane %v6187_v54, %v11440_v4  ;;  %v6337_v46 = vrot.slane %v11391_v25, %v11440_v4  ;;  %v6392_v44 = vsub.s32 %v6389_v47, %v11303_v15 }
 0xc10   : > { %v6480_v51 = vsel %vm6338_vm14, %v6479_v60, %v11382_v34 }
 0xc11   : > { %v11397_v30 = vpop.xlane.xlu0 %6114  ;;  %6162 = vadd.xlane.f32.xlu1 %v6161_v0  ;;  %v6190_v1 = vpop.xlane.xlu1 %6189  ;;  %v6399_v0 = vsub.s32 %v6396_v62, %v11303_v15 }
 0xc12   : > { %v6484_v48 = vrot.slane %v6190_v1, %v11444_v43  ;;  %v6344_v56 = vrot.slane %v11397_v30, %v11444_v43  ;;  %v6339_v30 = vsel %vm6338_vm14, %v6337_v46, %v11385_v20 }
 0xc14   : > { %v6485_v36 = vsel %vm6345_vm15, %v6484_v48, %v6480_v51 }
 0xc15   : > { %v11403_v45 = vpop.xlane.xlu0 %6117  ;;  %6237 = vadd.xlane.f32.xlu1 %v6236_v39  ;;  %v6193_v55 = vpop.xlane.xlu1 %6192 }
 0xc16   : > { %v6489_v5 = vrot.slane %v6193_v55, %v11448_v49  ;;  %v6351_v28 = vrot.slane %v11403_v45, %v11448_v49  ;;  %v6346_v45 = vsel %vm6345_vm15, %v6344_v56, %v6339_v30 }
 0xc18   : > { %v6490_v15 = vsel %vm6352_vm1, %v6489_v5, %v6485_v36 }
 0xc19   : > { %v11406_v16 = vpop.xlane.xlu0 %6120  ;;  %6165 = vadd.xlane.f32.xlu1 %v6164_v59 }
 0xc1a   : > { %v6358_v10 = vrot.slane %v11406_v16, %v6357_v42  ;;  %v6353_v16 = vsel %vm6352_vm1, %v6351_v28, %v6346_v45 }
 0xc1d   : > { %v11409_v32 = vpop.xlane.xlu0 %6195  ;;  %6240 = vadd.xlane.f32.xlu1 %v6239_v31 }
 0xc1e   : > { %v6494_v25 = vrot.slane %v11409_v32, %v6357_v42  ;;  %v6360_v32 = vsel %vm6359_vm3, %v6358_v10, %v6353_v16 }
 0xc21   : > { %v11411_v27 = vpop.xlane.xlu0 %6123 }
 0xc22   : > { %v6365_v33 = vrot.slane %v11411_v27, %v6364_v17  ;;  %v6495_v27 = vsel %vm6359_vm3, %v6494_v25, %v6490_v15  ;;  %vm6570_vm3 = vcmask 1041409  }
 0xc25   : > { %v11413_v14 = vpop.xlane.xlu0 %6198 }
 0xc26   : > { %v6499_v39 = vrot.slane %v11413_v14, %v6364_v17 }
 0xc29   : > { %v11415_v52 = vpop.xlane.xlu0 %6126 }
 0xc2a   : > { %v6372_v19 = vrot.slane %v11415_v52, %v6371_v21  ;;  %v6367_v52 = vsel %vm6366_vm7, %v6365_v33, %v6360_v32 }
 0xc2d   : > { %v11417_v53 = vpop.xlane.xlu0 %6201 }
 0xc2e   : > { %6588 = vbcast.lane.b32.xlu1 %v7025_v13, 256  ;;  %v6504_v59 = vrot.slane %v11417_v53, %v6371_v21  ;;  %v6500_v53 = vsel %vm6366_vm7, %v6499_v39, %v6495_v27 }
 0xc31   : > { %v11422_v3 = vpop.xlane.xlu0 %6129 }
 0xc32   : > { %v6379_v34 = vrot.slane %v11422_v3, %v6378_v37  ;;  %v6374_v3 = vsel %vm6373_vm0, %v6372_v19, %v6367_v52 }
 0xc34   : > { %v6381_v1 = vsel %vm6380_vm2, %v6379_v34, %v6374_v3 }
 0xc35   : > { %v11424_v61 = vpop.xlane.xlu0 %6204  ;;  %v6142_v50 = vpop.xlane.xlu1 %6141 }
 0xc36   : > { %v6509_v20 = vrot.slane %v11424_v61, %v6378_v37  ;;  %v6505_v61 = vsel %vm6373_vm0, %v6504_v59, %v6500_v53  ;;  %v6406_v51 = vrot.slane %v6142_v50, %v11313_v12 }
 0xc39   : > { %v11426_v38 = vpop.xlane.xlu0 %6132  ;;  %v6220_v55 = vpop.xlane.xlu1 %6219 }
 0xc3a   : > { %v6386_v14 = vrot.slane %v11426_v38, %v6385_v9  ;;  %v6510_v38 = vsel %vm6380_vm2, %v6509_v20, %v6505_v61  ;;  %v6533_v30 = vrot.slane %v6220_v55, %v11316_v24 }
 0xc3c   : > { %v6388_v63 = vsel %vm6387_vm4, %v6386_v14, %v6381_v1 }
 0xc3d   : > { %v11428_v11 = vpop.xlane.xlu0 %6207 }
 0xc3e   : > { %v6514_v13 = vrot.slane %v11428_v11, %v6385_v9 }
 0xc40   : > { %v6515_v18 = vsel %vm6387_vm4, %v6514_v13, %v6510_v38 }
 0xc41   : > { %v11430_v57 = vpop.xlane.xlu0 %6135 }
 0xc42   : > { %v6393_v54 = vrot.slane %v11430_v57, %v6392_v44 }
 0xc44   : > { %v6395_v57 = vsel %vm6394_vm6, %v6393_v54, %v6388_v63 }
 0xc45   : > { %v11436_v6 = vpop.xlane.xlu0 %6210 }
 0xc46   : > { %v6519_v23 = vrot.slane %v11436_v6, %v6392_v44 }
 0xc48   : > { %v6520_v6 = vsel %vm6394_vm6, %v6519_v23, %v6515_v18 }
 0xc49   : > { %v11452_v2 = vpop.xlane.xlu0 %6216 }
 0xc4a   : > { %v6529_v9 = vrot.slane %v11452_v2, %v11313_v12 }
 0xc4c   : > { %v6534_v45 = vsel %vm6303_vm9, %v6533_v30, %v6529_v9 }
 0xc4d   : > { %v11469_v26 = vpop.xlane.xlu0 %6144 }
 0xc4e   : > { %v6410_v10 = vrot.slane %v11469_v26, %v11316_v24 }
 0xc50   : > { %v6411_v26 = vsel %vm6303_vm9, %v6410_v10, %v6406_v51  ;;  %vm6576_vm9 = vcmask 582656  }
 0xc51   : > { %v6139_v31 = vpop.xlane.xlu0 %6138 }
 0xc52   : > { %v6400_v7 = vrot.slane %v6139_v31, %v6399_v0 }
 0xc54   : > { %v6402_v22 = vsel %vm6401_vm8, %v6400_v7, %v6395_v57 }
 0xc55   : > { %v6214_v11 = vpop.xlane.xlu0 %6213 }
 0xc56   : > { %v6524_v35 = vrot.slane %v6214_v11, %v6399_v0 }
 0xc58   : > { %v6525_v29 = vsel %vm6401_vm8, %v6524_v35, %v6520_v6 }
 0xc59   : > { %v6571_v42 = vsel %vm6570_vm3, %v6525_v29, %v6402_v22 }
 0xc5a   : > { %v6575_v1 = vsel %vm2543_vm5, %v6571_v42, 0.0 }
 0xc72   : > { %v6148_v17 = vpop.xlane.xlu1 %6147 }
 0xc73   : > { %v6415_v44 = vrot.slane %v6148_v17, %v11320_v58 }
 0xc75   : > { %v6416_v15 = vsel %vm6310_vm10, %v6415_v44, %v6411_v26 }
 0xc76   : > { %v6223_v47 = vpop.xlane.xlu1 %6222 }
 0xc77   : > { %v6538_v0 = vrot.slane %v6223_v47, %v11320_v58 }
 0xc79   : > { %v6539_v24 = vsel %vm6310_vm10, %v6538_v0, %v6534_v45  ;;  %vm6601_vm10 = vcmask 8192  }
 0xc7a   : > { %v6151_v62 = vpop.xlane.xlu1 %6150 }
 0xc7b   : > { %v6420_v33 = vrot.slane %v6151_v62, %v11339_v8 }
 0xc7d   : > { %v6421_v34 = vsel %vm6317_vm11, %v6420_v33, %v6416_v15 }
 0xc7e   : > { %v6226_v60 = vpop.xlane.xlu1 %6225 }
 0xc7f   : > { %v6543_v39 = vrot.slane %v6226_v60, %v11339_v8 }
 0xc82   : > { %v6154_v46 = vpop.xlane.xlu1 %6153 }
 0xc83   : > { %v6425_v36 = vrot.slane %v6154_v46, %v11361_v40 }
 0xc85   : > { %v6426_v32 = vsel %vm6324_vm12, %v6425_v36, %v6421_v34 }
 0xc86   : > { %v6229_v21 = vpop.xlane.xlu1 %6228 }
 0xc87   : > { %v6548_v2 = vrot.slane %v6229_v21, %v11361_v40  ;;  %v6544_v40 = vsel %vm6317_vm11, %v6543_v39, %v6539_v24 }
 0xc8a   : > { %v6157_v48 = vpop.xlane.xlu1 %6156 }
 0xc8b   : > { %v6430_v19 = vrot.slane %v6157_v48, %v11371_v41 }
 0xc8d   : > { %v6431_v14 = vsel %vm6331_vm13, %v6430_v19, %v6426_v32 }
 0xc8e   : > { %v6232_v56 = vpop.xlane.xlu1 %6231 }
 0xc8f   : > { %v6553_v58 = vrot.slane %v6232_v56, %v11371_v41  ;;  %v6549_v41 = vsel %vm6324_vm12, %v6548_v2, %v6544_v40 }
 0xc91   : > { %v6554_v13 = vsel %vm6331_vm13, %v6553_v58, %v6549_v41 }
 0xc92   : > { %v6160_v37 = vpop.xlane.xlu1 %6159 }
 0xc93   : > { %v6435_v16 = vrot.slane %v6160_v37, %v11440_v4 }
 0xc96   : > { %v6235_v5 = vpop.xlane.xlu1 %6234 }
 0xc97   : > { %v6558_v8 = vrot.slane %v6235_v5, %v11440_v4  ;;  %v6436_v4 = vsel %vm6338_vm14, %v6435_v16, %v6431_v14 }
 0xc99   : > { %v6559_v53 = vsel %vm6338_vm14, %v6558_v8, %v6554_v13 }
 0xc9a   : > { %v6163_v28 = vpop.xlane.xlu1 %6162 }
 0xc9b   : > { %v6440_v20 = vrot.slane %v6163_v28, %v11444_v43 }
 0xc9e   : > { %v6238_v25 = vpop.xlane.xlu1 %6237 }
 0xc9f   : > { %v6563_v31 = vrot.slane %v6238_v25, %v11444_v43  ;;  %v6441_v43 = vsel %vm6345_vm15, %v6440_v20, %v6436_v4 }
 0xca1   : > { %v6564_v23 = vsel %vm6345_vm15, %v6563_v31, %v6559_v53 }
 0xca2   : > { %v6166_v59 = vpop.xlane.xlu1 %6165 }
 0xca3   : > { %v6445_v27 = vrot.slane %v6166_v59, %v11448_v49 }
 0xca5   : > { %v6446_v3 = vsel %vm6352_vm1, %v6445_v27, %v6441_v43 }
 0xca6   : > { %v6241_v52 = vpop.xlane.xlu1 %6240 }
 0xca7   : > { %v6568_v54 = vrot.slane %v6241_v52, %v11448_v49 }
 0xca9   : > { %v6569_v61 = vsel %vm6352_vm1, %v6568_v54, %v6564_v23 }
 0xcaa   : > { %v6572_v7 = vsel %vm6570_vm3, %v6569_v61, %v6446_v3  ;;  %v6589_v63 = vpop.permute.xlu1 %6588 }
 0xcab   : > { %v6577_v38 = vsel %vm6576_vm9, %v6572_v7, 0.0 }
 0xcac   : > { %v6578_v11 = vadd.f32 %v6577_v38, %v6575_v1 }
 0xcae   : > { %6579 = vadd.xlane.f32.xlu0 %v6578_v11 }
 0xd37   : > { %v6580_v18 = vpop.xlane.xlu0 %6579 }
 0xd38   : > { %v6591_v49 = vadd.f32 %v6589_v63, %v6580_v18 }
 0xd3a   : > { %6594 = vperm.xlu0 %7457, %v6591_v49  }
 0xdb5   : > { %v6595_v35 = vpop.permute.xlu0 %6594 }
 0xdb6   : > { %v6599_v57 = vrot.slane %v6595_v35, %v11313_v12 }
 0xdb8   : > { %6602 = vst.msk [vmem:[%s594_s2] sm:$0x1] %vm6601_vm10, %v6599_v57 }
 0xdb9   : > { %8093 = shalt.err (!%p8090_p3)
}
 0xdba   : > { %s8094_s6 = scalar_lea.hbm %s6614_s30, 16  ;;  %s8098_s2 = scalar_lea.hbm %s11670_s3, 32 }
 0xdbb   : > { %p8095_p4 = scmp.ne.s32.totalorder %s6614_s30, %s8094_s6  ;;  %p8099_p9 = scmp.lt.s32.totalorder %s6614_s30, %s11670_s3 }
 0xdbc   : > { %p8100_p10 = scmp.lt.s32.totalorder %s8098_s2, %s8094_s6 }
 0xdbd   : > { %p8096_p7 = pnand %p8095_p4, %p8289_p5 }
 0xdbe   : > { %p8101_p11 = por %p8100_p10, %p8099_p9 }
 0xdbf   : > { %p8097_p8 = pneg %p8096_p7 }
 0xdc1   : > { %p8102_p12 = pnand %p8101_p11, %p8097_p8 }
 0xdc3   : > { %8105 = shalt.err (!%p8102_p12)
}
 0xdc4   : > { %7410 = dma.vmem_to_hbm [thread:$0]  (%p8289_p5), %s6617_s28, 16, %s6614_s30, %s6604_s20  }
 0xdc5 PF: > { %s11671_s4 = sld [smem:[#allocation8_spill]] }
 0xdc6   : > { %s11672_s5 = sld [smem:[#allocation5_spill]] }
 0xdcb   : > { %p7416_p13 = scmp.ge.s32.totalorder %s11671_s4, 2 }
 0xdcc   : > { %s6628_s1 = sand.u32 1, %s11672_s5  }
 0xdcd   : > { %p7413_p0 = pnand %p7416_p13, %p8293_p6  ;;  %s6629_s22 = scalar_lea.sflag [#allocation3], %s6628_s1 }
 0xdcf   : > { %p7414_p1 = pneg %p7413_p0 }
 0xdd1   : > { %8123 = dma.done.wait (%p7414_p1), %s6629_s22, 16  }
 0xdd2   : > { %8125 = vsyncadd (%p7414_p1), %s6629_s22, 4294967280  ;;  %s11674_s21 = sld [smem:[#allocation10_spill]] }
 0xdd3   : > { %s11675_s0 = sld [smem:[#allocation6_spill]] }
 0xdd4   : > { %s11676_s30 = sld [smem:[#allocation7_spill]] }
 0xdd5   : > { %s11677_s20 = sld [smem:[#allocation11_spill]] }
 0xdd8   : > { %p29_p2 = scmp.ge.s32.totalorder %s11674_s21, 4  }
 0xdda   :  { %31 = sbr.rel (!%p29_p2) target bundleno = 12 (0xc), region = 131 }
 0xddf   :  { %6633 = vsyncpa [#allocation3], 1 }
 0xde0   :  { %6635 = vsyncpa [#allocation3 + $0x1], 1 }

</bundles_post_ra>
